<compile_context>
chip_gen: v6e
topology: v6e:2x2x1
jax: 0.10.0
libtpu: 0.0.40
codegen_flags: <defaults>
</compile_context>

<pallas_src>
import functools

import jax
import jax.numpy as jnp
from jax.experimental import pallas as pl
from jax.experimental.pallas import tpu as pltpu

LANE = 128            # feature dims are padded to multiples of the 128 lanes
_BF16 = jnp.bfloat16
_F32 = jnp.float32
_BN_EPS = 1e-5


def _round_up(x, m):
    return ((x + m - 1) // m) * m


# --------------------------------- kernel -----------------------------------


def _fused_sage_kernel(*refs, n_layers, n_true, out_true):
    """Whole-graph fused GraphSAGE forward (single grid step, all in VMEM).

    refs layout (inputs then outputs):
      adj_ref, x_ref,
      [w_ref, b_ref, gamma_ref, beta_ref]  x (n_layers - 1)   hidden layers
      [w_ref, b_ref]                                          final layer
      out_ref
    """
    adj_ref, x_ref = refs[0], refs[1]
    out_ref = refs[-1]

    p = 2
    layer_refs = []
    for li in range(n_layers):
        if li < n_layers - 1:
            layer_refs.append(tuple(refs[p:p + 4]))
            p += 4
        else:
            layer_refs.append(tuple(refs[p:p + 2]) + (None, None))
            p += 2

    adj = adj_ref[...]                                   # (N, N) f32, 0/1
    # Mean-aggregator weights: fold 1/max(deg, 1) into the matmul epilogue
    # instead of materializing a normalized adjacency.
    deg = jnp.sum(adj, axis=1, keepdims=True)
    inv_deg = 1.0 / jnp.maximum(deg, 1.0)                # (N, 1) f32
    adj_b = adj.astype(_BF16)                            # 0/1 -> exact in bf16

    n_pad = adj.shape[0]
    row_ids = jax.lax.broadcasted_iota(jnp.int32, (n_pad, 1), 0)
    row_mask = (row_ids < n_true).astype(_F32)           # mask padded nodes
    inv_n = 1.0 / float(n_true)

    h = x_ref[...].astype(_F32)                          # activations stay f32
    for w_ref, b_ref, g_ref, be_ref in layer_refs:
        hb = h.astype(_BF16)
        # Mean aggregation: bf16 MXU matmul, f32 accumulation.
        agg = jnp.dot(adj_b, hb, preferred_element_type=_F32) * inv_deg
        # SAGEConv: concat([agg, x]) @ [W_l; W_r] + b  (K = 2*F_in, fills MXU).
        cat = jnp.concatenate([agg.astype(_BF16), hb], axis=1)
        hc = jnp.dot(cat, w_ref[...], preferred_element_type=_F32) + b_ref[...]

        if g_ref is not None:
            # BatchNorm1d (training-mode batch statistics over the true node
            # rows, two-pass variance, all f32) + ReLU, fused in place.
            hm = hc * row_mask
            mean = jnp.sum(hm, axis=0, keepdims=True) * inv_n
            cent = (hc - mean) * row_mask
            var = jnp.sum(cent * cent, axis=0, keepdims=True) * inv_n
            inv_std = jax.lax.rsqrt(var + _BN_EPS)
            h = jnp.maximum(
                (hc - mean) * (inv_std * g_ref[...]) + be_ref[...], 0.0)
            # TODO(synk): F.dropout treated as identity (eval / p=0.0
            # semantics); a stochastic version would use pltpu.prng_seed +
            # pltpu.prng_random_bits.
        else:
            # Final layer: log_softmax over the true class lanes only.
            lane_ids = jax.lax.broadcasted_iota(jnp.int32, hc.shape, 1)
            hmask = jnp.where(lane_ids < out_true, hc, -1e30)
            m = jnp.max(hmask, axis=-1, keepdims=True)
            s = hmask - m
            lse = jnp.log(jnp.sum(jnp.exp(s), axis=-1, keepdims=True))
            out_ref[...] = jnp.where(lane_ids < out_true, s - lse, 0.0)


# -------------------------------- wrapper -----------------------------------


@functools.partial(jax.jit, static_argnames=("n_true", "out_true"))
def sage_forward(adj_pad, x_pad, params, *, n_true, out_true):
    n_pad = adj_pad.shape[0]
    n_layers = len(params)
    out_pad = params[-1]["w"].shape[1]

    flat_inputs = [adj_pad, x_pad]
    in_specs = [
        pl.BlockSpec(adj_pad.shape, lambda i: (0, 0)),
        pl.BlockSpec(x_pad.shape, lambda i: (0, 0)),
    ]
    for li, layer in enumerate(params):
        names = ("w", "b", "gamma", "beta") if li < n_layers - 1 else ("w", "b")
        for nm in names:
            arr = layer[nm]
            flat_inputs.append(arr)
            in_specs.append(pl.BlockSpec(arr.shape, lambda i: (0, 0)))

    kernel = functools.partial(_fused_sage_kernel, n_layers=n_layers,
                               n_true=n_true, out_true=out_true)

    # Advisory cost estimate (padded shapes).
    f_in = x_pad.shape[1]
    flops = 0
    for layer in params:
        k2, fo = layer["w"].shape
        flops += 2 * n_pad * n_pad * (k2 // 2) + 2 * n_pad * k2 * fo
    bytes_acc = sum(int(a.size) * a.dtype.itemsize for a in flat_inputs)
    bytes_acc += n_pad * out_pad * 4
    del f_in

    # Whole working set is tiny here; keep the limit well below v7x's 64 MiB
    # physical VMEM per TensorCore (review: cap <= ~48 MiB on v7x).
    vmem_limit = int(min(max(8 * bytes_acc, 8 * 2 ** 20), 48 * 2 ** 20))

    return pl.pallas_call(
        kernel,
        grid=(1,),
        in_specs=in_specs,
        out_specs=pl.BlockSpec((n_pad, out_pad), lambda i: (0, 0)),
        out_shape=jax.ShapeDtypeStruct((n_pad, out_pad), _F32),
        compiler_params=pltpu.CompilerParams(vmem_limit_bytes=vmem_limit),
        cost_estimate=pl.CostEstimate(flops=flops,
                                      transcendentals=n_pad * out_pad,
                                      bytes_accessed=bytes_acc),
    )(*flat_inputs)


# -------------------------- parameter construction --------------------------


def _init_layer(key, fan_in, fan_out, pad_in, pad_out):
    kl, kr, kb = jax.random.split(key, 3)
    bound = 1.0 / float(fan_in) ** 0.5
    wl = jax.random.uniform(kl, (fan_in, fan_out), _F32, -bound, bound)
    wr = jax.random.uniform(kr, (fan_in, fan_out), _F32, -bound, bound)
    b = jax.random.uniform(kb, (1, fan_out), _F32, -bound, bound)
    wl = jnp.pad(wl, ((0, pad_in - fan_in), (0, pad_out - fan_out)))
    wr = jnp.pad(wr, ((0, pad_in - fan_in), (0, pad_out - fan_out)))
    # Pre-stack [W_l; W_r] -> one K=2*F_in contraction in the kernel.
    w = jnp.concatenate([wl, wr], axis=0).astype(_BF16)
    b = jnp.pad(b, ((0, 0), (0, pad_out - fan_out)))
    return w, b


def init_sage_params(key, in_dim, hid_dim, out_dim, n_layers,
                     in_pad, hid_pad, out_pad):
    dims = [in_dim] + [hid_dim] * (n_layers - 1) + [out_dim]
    pads = [in_pad] + [hid_pad] * (n_layers - 1) + [out_pad]
    params = []
    for i in range(n_layers):
        key, sub = jax.random.split(key)
        w, b = _init_layer(sub, dims[i], dims[i + 1], pads[i], pads[i + 1])
        layer = {"w": w, "b": b}
        if i < n_layers - 1:                     # hidden layers: BatchNorm1d
            gamma = jnp.pad(jnp.ones((1, dims[i + 1]), _F32),
                            ((0, 0), (0, pads[i + 1] - dims[i + 1])))
            layer["gamma"] = gamma
            layer["beta"] = jnp.zeros((1, pads[i + 1]), _F32)
        params.append(layer)
    return params


# ---------------------------------- main -------------------------------------


if __name__ == "__main__":
    N_NODES = 200
    IN_DIM, HID_DIM, OUT_DIM = 16, 32, 8
    N_LAYERS = 3
    DROPOUT = 0.0          # identity (see TODO in the kernel)

    key = jax.random.PRNGKey(0)
    kx, kadj, kparams = jax.random.split(key, 3)

    x = jax.random.normal(kx, (N_NODES, IN_DIM), _F32)
    # Deterministic random sparse-ish graph as a dense 0/1 adjacency (adj_t).
    adj = (jax.random.uniform(kadj, (N_NODES, N_NODES)) < 0.2).astype(_F32)
    adj = jnp.maximum(adj, jnp.eye(N_NODES, dtype=_F32))       # self loops

    # Pad nodes and feature dims to 128 so every block is lane-dense.
    n_pad = _round_up(N_NODES, LANE)
    in_pad = _round_up(IN_DIM, LANE)
    hid_pad = _round_up(HID_DIM, LANE)
    out_pad = _round_up(OUT_DIM, LANE)

    x_pad = jnp.pad(x, ((0, n_pad - N_NODES), (0, in_pad - IN_DIM)))
    adj_pad = jnp.pad(adj, ((0, n_pad - N_NODES), (0, n_pad - N_NODES)))

    params = init_sage_params(kparams, IN_DIM, HID_DIM, OUT_DIM, N_LAYERS,
                              in_pad=in_pad, hid_pad=hid_pad, out_pad=out_pad)

    out_padded = sage_forward(adj_pad, x_pad, params,
                              n_true=N_NODES, out_true=OUT_DIM)
    out_padded = jax.block_until_ready(out_padded)
    out = out_padded[:N_NODES, :OUT_DIM]

    assert out.shape == (N_NODES, OUT_DIM)
    assert bool(jnp.all(jnp.isfinite(out)))
    # rows of log_softmax should (log-)sum to ~0
    row_logsumexp = jax.scipy.special.logsumexp(out, axis=-1)
    assert bool(jnp.all(jnp.abs(row_logsumexp) < 2e-3))

    print("KERNEL_OK")
</pallas_src>

<mosaic_0001>
module attributes {stable_mosaic.version = 11 : i64} {
  func.func @_fused_sage_kernel(%arg0: i32, %arg1: memref<256x256xf32, #tpu.memory_space<vmem>>, %arg2: memref<256x128xf32, #tpu.memory_space<vmem>>, %arg3: memref<256x128xbf16, #tpu.memory_space<vmem>>, %arg4: memref<1x128xf32, #tpu.memory_space<vmem>>, %arg5: memref<1x128xf32, #tpu.memory_space<vmem>>, %arg6: memref<1x128xf32, #tpu.memory_space<vmem>>, %arg7: memref<256x128xbf16, #tpu.memory_space<vmem>>, %arg8: memref<1x128xf32, #tpu.memory_space<vmem>>, %arg9: memref<1x128xf32, #tpu.memory_space<vmem>>, %arg10: memref<1x128xf32, #tpu.memory_space<vmem>>, %arg11: memref<256x128xbf16, #tpu.memory_space<vmem>>, %arg12: memref<1x128xf32, #tpu.memory_space<vmem>>, %arg13: memref<256x128xf32, #tpu.memory_space<vmem>>) attributes {dimension_semantics = [#tpu.dimension_semantics<arbitrary>], iteration_bounds = array<i64: 1>, scalar_prefetch = 0 : i64, scratch_operands = 0 : i64, tpu.core_type = #tpu.core_type<tc>, window_params = [{pipeline_mode = #tpu.pipeline_mode<synchronous>, transform_indices = @transform_0, window_bounds = array<i64: 256, 256>}, {pipeline_mode = #tpu.pipeline_mode<synchronous>, transform_indices = @transform_1, window_bounds = array<i64: 256, 128>}, {pipeline_mode = #tpu.pipeline_mode<synchronous>, transform_indices = @transform_2, window_bounds = array<i64: 256, 128>}, {pipeline_mode = #tpu.pipeline_mode<synchronous>, transform_indices = @transform_3, window_bounds = array<i64: 1, 128>}, {pipeline_mode = #tpu.pipeline_mode<synchronous>, transform_indices = @transform_4, window_bounds = array<i64: 1, 128>}, {pipeline_mode = #tpu.pipeline_mode<synchronous>, transform_indices = @transform_5, window_bounds = array<i64: 1, 128>}, {pipeline_mode = #tpu.pipeline_mode<synchronous>, transform_indices = @transform_6, window_bounds = array<i64: 256, 128>}, {pipeline_mode = #tpu.pipeline_mode<synchronous>, transform_indices = @transform_7, window_bounds = array<i64: 1, 128>}, {pipeline_mode = #tpu.pipeline_mode<synchronous>, transform_indices = @transform_8, window_bounds = array<i64: 1, 128>}, {pipeline_mode = #tpu.pipeline_mode<synchronous>, transform_indices = @transform_9, window_bounds = array<i64: 1, 128>}, {pipeline_mode = #tpu.pipeline_mode<synchronous>, transform_indices = @transform_10, window_bounds = array<i64: 256, 128>}, {pipeline_mode = #tpu.pipeline_mode<synchronous>, transform_indices = @transform_11, window_bounds = array<i64: 1, 128>}, {pipeline_mode = #tpu.pipeline_mode<synchronous>, transform_indices = @transform_12, window_bounds = array<i64: 256, 128>}]} {
    %c0 = arith.constant 0 : index
    %c0_0 = arith.constant 0 : index
    %0 = vector.load %arg1[%c0, %c0_0] : memref<256x256xf32, #tpu.memory_space<vmem>>, vector<256x256xf32>
    %cst = arith.constant dense<0.000000e+00> : vector<256xf32>
    %1 = vector.multi_reduction <add>, %0, %cst [1] : vector<256x256xf32> to vector<256xf32>
    %2 = vector.shape_cast %1 : vector<256xf32> to vector<256x1xf32>
    %cst_1 = arith.constant 1.000000e+00 : f32
    %3 = vector.broadcast %cst_1 : f32 to vector<256x1xf32>
    %4 = arith.maximumf %2, %3 : vector<256x1xf32>
    %cst_2 = arith.constant 1.000000e+00 : f32
    %5 = vector.broadcast %cst_2 : f32 to vector<256x1xf32>
    %6 = arith.divf %5, %4 : vector<256x1xf32>
    %7 = arith.truncf %0 : vector<256x256xf32> to vector<256x256xbf16>
    %8 = tpu.iota {dimensions = array<i32: 0>} : vector<256x1xi32>
    %c200_i32 = arith.constant 200 : i32
    %9 = vector.broadcast %c200_i32 : i32 to vector<256x1xi32>
    %10 = arith.cmpi slt, %8, %9 : vector<256x1xi32>
    %11 = arith.extui %10 : vector<256x1xi1> to vector<256x1xi32>
    %12 = arith.sitofp %11 : vector<256x1xi32> to vector<256x1xf32>
    %c0_3 = arith.constant 0 : index
    %c0_4 = arith.constant 0 : index
    %13 = vector.load %arg2[%c0_3, %c0_4] : memref<256x128xf32, #tpu.memory_space<vmem>>, vector<256x128xf32>
    %14 = arith.truncf %13 : vector<256x128xf32> to vector<256x128xbf16>
    %cst_5 = arith.constant dense<0.000000e+00> : vector<256x128xf32>
    %15 = tpu.matmul %7, %14, %cst_5 {dimension_numbers = #tpu.dot_dimension_numbers<[1], [0], [0], [1], [0, 0, 1, 1], [], []>} : vector<256x256xbf16>, vector<256x128xbf16>, vector<256x128xf32> -> vector<256x128xf32>
    %16 = vector.broadcast %6 : vector<256x1xf32> to vector<256x128xf32>
    %17 = arith.mulf %15, %16 : vector<256x128xf32>
    %18 = arith.truncf %17 : vector<256x128xf32> to vector<256x128xbf16>
    %19 = tpu.concatenate %18, %14 in 1 : vector<256x128xbf16>, vector<256x128xbf16> -> vector<256x256xbf16>
    %c0_6 = arith.constant 0 : index
    %c0_7 = arith.constant 0 : index
    %20 = vector.load %arg3[%c0_6, %c0_7] : memref<256x128xbf16, #tpu.memory_space<vmem>>, vector<256x128xbf16>
    %cst_8 = arith.constant dense<0.000000e+00> : vector<256x128xf32>
    %21 = tpu.matmul %19, %20, %cst_8 {dimension_numbers = #tpu.dot_dimension_numbers<[1], [0], [0], [1], [0, 0, 1, 1], [], []>} : vector<256x256xbf16>, vector<256x128xbf16>, vector<256x128xf32> -> vector<256x128xf32>
    %c0_9 = arith.constant 0 : index
    %c0_10 = arith.constant 0 : index
    %22 = vector.load %arg4[%c0_9, %c0_10] : memref<1x128xf32, #tpu.memory_space<vmem>>, vector<1x128xf32>
    %23 = vector.broadcast %22 : vector<1x128xf32> to vector<256x128xf32>
    %24 = arith.addf %21, %23 : vector<256x128xf32>
    %25 = vector.broadcast %12 : vector<256x1xf32> to vector<256x128xf32>
    %26 = arith.mulf %24, %25 : vector<256x128xf32>
    %cst_11 = arith.constant dense<0.000000e+00> : vector<128xf32>
    %27 = vector.multi_reduction <add>, %26, %cst_11 [0] : vector<256x128xf32> to vector<128xf32>
    %28 = vector.shape_cast %27 : vector<128xf32> to vector<1x128xf32>
    %cst_12 = arith.constant 5.000000e-03 : f32
    %29 = vector.broadcast %cst_12 : f32 to vector<1x128xf32>
    %30 = arith.mulf %28, %29 : vector<1x128xf32>
    %31 = vector.broadcast %30 : vector<1x128xf32> to vector<256x128xf32>
    %32 = arith.subf %24, %31 : vector<256x128xf32>
    %33 = vector.broadcast %12 : vector<256x1xf32> to vector<256x128xf32>
    %34 = arith.mulf %32, %33 : vector<256x128xf32>
    %35 = arith.mulf %34, %34 : vector<256x128xf32>
    %cst_13 = arith.constant dense<0.000000e+00> : vector<128xf32>
    %36 = vector.multi_reduction <add>, %35, %cst_13 [0] : vector<256x128xf32> to vector<128xf32>
    %37 = vector.shape_cast %36 : vector<128xf32> to vector<1x128xf32>
    %cst_14 = arith.constant 5.000000e-03 : f32
    %38 = vector.broadcast %cst_14 : f32 to vector<1x128xf32>
    %39 = arith.mulf %37, %38 : vector<1x128xf32>
    %cst_15 = arith.constant 9.99999974E-6 : f32
    %40 = vector.broadcast %cst_15 : f32 to vector<1x128xf32>
    %41 = arith.addf %39, %40 : vector<1x128xf32>
    %42 = math.rsqrt %41 : vector<1x128xf32>
    %43 = vector.broadcast %30 : vector<1x128xf32> to vector<256x128xf32>
    %44 = arith.subf %24, %43 : vector<256x128xf32>
    %c0_16 = arith.constant 0 : index
    %c0_17 = arith.constant 0 : index
    %45 = vector.load %arg5[%c0_16, %c0_17] : memref<1x128xf32, #tpu.memory_space<vmem>>, vector<1x128xf32>
    %46 = arith.mulf %42, %45 : vector<1x128xf32>
    %47 = vector.broadcast %46 : vector<1x128xf32> to vector<256x128xf32>
    %48 = arith.mulf %44, %47 : vector<256x128xf32>
    %c0_18 = arith.constant 0 : index
    %c0_19 = arith.constant 0 : index
    %49 = vector.load %arg6[%c0_18, %c0_19] : memref<1x128xf32, #tpu.memory_space<vmem>>, vector<1x128xf32>
    %50 = vector.broadcast %49 : vector<1x128xf32> to vector<256x128xf32>
    %51 = arith.addf %48, %50 : vector<256x128xf32>
    %cst_20 = arith.constant 0.000000e+00 : f32
    %52 = vector.broadcast %cst_20 : f32 to vector<256x128xf32>
    %53 = arith.maximumf %51, %52 : vector<256x128xf32>
    %54 = arith.truncf %53 : vector<256x128xf32> to vector<256x128xbf16>
    %cst_21 = arith.constant dense<0.000000e+00> : vector<256x128xf32>
    %55 = tpu.matmul %7, %54, %cst_21 {dimension_numbers = #tpu.dot_dimension_numbers<[1], [0], [0], [1], [0, 0, 1, 1], [], []>} : vector<256x256xbf16>, vector<256x128xbf16>, vector<256x128xf32> -> vector<256x128xf32>
    %56 = vector.broadcast %6 : vector<256x1xf32> to vector<256x128xf32>
    %57 = arith.mulf %55, %56 : vector<256x128xf32>
    %58 = arith.truncf %57 : vector<256x128xf32> to vector<256x128xbf16>
    %59 = tpu.concatenate %58, %54 in 1 : vector<256x128xbf16>, vector<256x128xbf16> -> vector<256x256xbf16>
    %c0_22 = arith.constant 0 : index
    %c0_23 = arith.constant 0 : index
    %60 = vector.load %arg7[%c0_22, %c0_23] : memref<256x128xbf16, #tpu.memory_space<vmem>>, vector<256x128xbf16>
    %cst_24 = arith.constant dense<0.000000e+00> : vector<256x128xf32>
    %61 = tpu.matmul %59, %60, %cst_24 {dimension_numbers = #tpu.dot_dimension_numbers<[1], [0], [0], [1], [0, 0, 1, 1], [], []>} : vector<256x256xbf16>, vector<256x128xbf16>, vector<256x128xf32> -> vector<256x128xf32>
    %c0_25 = arith.constant 0 : index
    %c0_26 = arith.constant 0 : index
    %62 = vector.load %arg8[%c0_25, %c0_26] : memref<1x128xf32, #tpu.memory_space<vmem>>, vector<1x128xf32>
    %63 = vector.broadcast %62 : vector<1x128xf32> to vector<256x128xf32>
    %64 = arith.addf %61, %63 : vector<256x128xf32>
    %65 = vector.broadcast %12 : vector<256x1xf32> to vector<256x128xf32>
    %66 = arith.mulf %64, %65 : vector<256x128xf32>
    %cst_27 = arith.constant dense<0.000000e+00> : vector<128xf32>
    %67 = vector.multi_reduction <add>, %66, %cst_27 [0] : vector<256x128xf32> to vector<128xf32>
    %68 = vector.shape_cast %67 : vector<128xf32> to vector<1x128xf32>
    %cst_28 = arith.constant 5.000000e-03 : f32
    %69 = vector.broadcast %cst_28 : f32 to vector<1x128xf32>
    %70 = arith.mulf %68, %69 : vector<1x128xf32>
    %71 = vector.broadcast %70 : vector<1x128xf32> to vector<256x128xf32>
    %72 = arith.subf %64, %71 : vector<256x128xf32>
    %73 = vector.broadcast %12 : vector<256x1xf32> to vector<256x128xf32>
    %74 = arith.mulf %72, %73 : vector<256x128xf32>
    %75 = arith.mulf %74, %74 : vector<256x128xf32>
    %cst_29 = arith.constant dense<0.000000e+00> : vector<128xf32>
    %76 = vector.multi_reduction <add>, %75, %cst_29 [0] : vector<256x128xf32> to vector<128xf32>
    %77 = vector.shape_cast %76 : vector<128xf32> to vector<1x128xf32>
    %cst_30 = arith.constant 5.000000e-03 : f32
    %78 = vector.broadcast %cst_30 : f32 to vector<1x128xf32>
    %79 = arith.mulf %77, %78 : vector<1x128xf32>
    %cst_31 = arith.constant 9.99999974E-6 : f32
    %80 = vector.broadcast %cst_31 : f32 to vector<1x128xf32>
    %81 = arith.addf %79, %80 : vector<1x128xf32>
    %82 = math.rsqrt %81 : vector<1x128xf32>
    %83 = vector.broadcast %70 : vector<1x128xf32> to vector<256x128xf32>
    %84 = arith.subf %64, %83 : vector<256x128xf32>
    %c0_32 = arith.constant 0 : index
    %c0_33 = arith.constant 0 : index
    %85 = vector.load %arg9[%c0_32, %c0_33] : memref<1x128xf32, #tpu.memory_space<vmem>>, vector<1x128xf32>
    %86 = arith.mulf %82, %85 : vector<1x128xf32>
    %87 = vector.broadcast %86 : vector<1x128xf32> to vector<256x128xf32>
    %88 = arith.mulf %84, %87 : vector<256x128xf32>
    %c0_34 = arith.constant 0 : index
    %c0_35 = arith.constant 0 : index
    %89 = vector.load %arg10[%c0_34, %c0_35] : memref<1x128xf32, #tpu.memory_space<vmem>>, vector<1x128xf32>
    %90 = vector.broadcast %89 : vector<1x128xf32> to vector<256x128xf32>
    %91 = arith.addf %88, %90 : vector<256x128xf32>
    %cst_36 = arith.constant 0.000000e+00 : f32
    %92 = vector.broadcast %cst_36 : f32 to vector<256x128xf32>
    %93 = arith.maximumf %91, %92 : vector<256x128xf32>
    %94 = arith.truncf %93 : vector<256x128xf32> to vector<256x128xbf16>
    %cst_37 = arith.constant dense<0.000000e+00> : vector<256x128xf32>
    %95 = tpu.matmul %7, %94, %cst_37 {dimension_numbers = #tpu.dot_dimension_numbers<[1], [0], [0], [1], [0, 0, 1, 1], [], []>} : vector<256x256xbf16>, vector<256x128xbf16>, vector<256x128xf32> -> vector<256x128xf32>
    %96 = vector.broadcast %6 : vector<256x1xf32> to vector<256x128xf32>
    %97 = arith.mulf %95, %96 : vector<256x128xf32>
    %98 = arith.truncf %97 : vector<256x128xf32> to vector<256x128xbf16>
    %99 = tpu.concatenate %98, %94 in 1 : vector<256x128xbf16>, vector<256x128xbf16> -> vector<256x256xbf16>
    %c0_38 = arith.constant 0 : index
    %c0_39 = arith.constant 0 : index
    %100 = vector.load %arg11[%c0_38, %c0_39] : memref<256x128xbf16, #tpu.memory_space<vmem>>, vector<256x128xbf16>
    %cst_40 = arith.constant dense<0.000000e+00> : vector<256x128xf32>
    %101 = tpu.matmul %99, %100, %cst_40 {dimension_numbers = #tpu.dot_dimension_numbers<[1], [0], [0], [1], [0, 0, 1, 1], [], []>} : vector<256x256xbf16>, vector<256x128xbf16>, vector<256x128xf32> -> vector<256x128xf32>
    %c0_41 = arith.constant 0 : index
    %c0_42 = arith.constant 0 : index
    %102 = vector.load %arg12[%c0_41, %c0_42] : memref<1x128xf32, #tpu.memory_space<vmem>>, vector<1x128xf32>
    %103 = vector.broadcast %102 : vector<1x128xf32> to vector<256x128xf32>
    %104 = arith.addf %101, %103 : vector<256x128xf32>
    %105 = tpu.iota {dimensions = array<i32: 1>} : vector<256x128xi32>
    %c8_i32 = arith.constant 8 : i32
    %106 = vector.broadcast %c8_i32 : i32 to vector<256x128xi32>
    %107 = arith.cmpi slt, %105, %106 : vector<256x128xi32>
    %cst_43 = arith.constant -1.000000e+30 : f32
    %108 = vector.broadcast %cst_43 : f32 to vector<256x128xf32>
    %109 = arith.select %107, %104, %108 : vector<256x128xi1>, vector<256x128xf32>
    %cst_44 = arith.constant dense<0xFF800000> : vector<256xf32>
    %110 = vector.multi_reduction <maximumf>, %109, %cst_44 [1] : vector<256x128xf32> to vector<256xf32>
    %111 = vector.shape_cast %110 : vector<256xf32> to vector<256x1xf32>
    %112 = vector.broadcast %111 : vector<256x1xf32> to vector<256x128xf32>
    %113 = arith.subf %109, %112 : vector<256x128xf32>
    %114 = math.exp %113 : vector<256x128xf32>
    %cst_45 = arith.constant dense<0.000000e+00> : vector<256xf32>
    %115 = vector.multi_reduction <add>, %114, %cst_45 [1] : vector<256x128xf32> to vector<256xf32>
    %116 = vector.shape_cast %115 : vector<256xf32> to vector<256x1xf32>
    %117 = math.log %116 : vector<256x1xf32>
    %c8_i32_46 = arith.constant 8 : i32
    %118 = vector.broadcast %c8_i32_46 : i32 to vector<256x128xi32>
    %119 = arith.cmpi slt, %105, %118 : vector<256x128xi32>
    %120 = vector.broadcast %117 : vector<256x1xf32> to vector<256x128xf32>
    %121 = arith.subf %113, %120 : vector<256x128xf32>
    %cst_47 = arith.constant 0.000000e+00 : f32
    %122 = vector.broadcast %cst_47 : f32 to vector<256x128xf32>
    %123 = arith.select %119, %121, %122 : vector<256x128xi1>, vector<256x128xf32>
    %c0_48 = arith.constant 0 : index
    %c0_49 = arith.constant 0 : index
    %124 = vector.load %arg13[%c0_48, %c0_49] : memref<256x128xf32, #tpu.memory_space<vmem>>, vector<256x128xf32>
    tpu.vector_store %arg13[%c0_48, %c0_49], %123 {strides = array<i32>} : memref<256x128xf32, #tpu.memory_space<vmem>>, vector<256x128xf32>,
    return
  }
  func.func @transform_0(%arg0: i32) -> (i32, i32) {
    %c0_i32 = arith.constant 0 : i32
    %c0_i32_0 = arith.constant 0 : i32
    %c0_i32_1 = arith.constant 0 : i32
    return %c0_i32, %c0_i32_0 : i32, i32
  }
  func.func @transform_1(%arg0: i32) -> (i32, i32) {
    %c0_i32 = arith.constant 0 : i32
    %c0_i32_0 = arith.constant 0 : i32
    %c0_i32_1 = arith.constant 0 : i32
    return %c0_i32, %c0_i32_0 : i32, i32
  }
  func.func @transform_2(%arg0: i32) -> (i32, i32) {
    %c0_i32 = arith.constant 0 : i32
    %c0_i32_0 = arith.constant 0 : i32
    %c0_i32_1 = arith.constant 0 : i32
    return %c0_i32, %c0_i32_0 : i32, i32
  }
  func.func @transform_3(%arg0: i32) -> (i32, i32) {
    %c0_i32 = arith.constant 0 : i32
    %c0_i32_0 = arith.constant 0 : i32
    %c0_i32_1 = arith.constant 0 : i32
    return %c0_i32, %c0_i32_0 : i32, i32
  }
  func.func @transform_4(%arg0: i32) -> (i32, i32) {
    %c0_i32 = arith.constant 0 : i32
    %c0_i32_0 = arith.constant 0 : i32
    %c0_i32_1 = arith.constant 0 : i32
    return %c0_i32, %c0_i32_0 : i32, i32
  }
  func.func @transform_5(%arg0: i32) -> (i32, i32) {
    %c0_i32 = arith.constant 0 : i32
    %c0_i32_0 = arith.constant 0 : i32
    %c0_i32_1 = arith.constant 0 : i32
    return %c0_i32, %c0_i32_0 : i32, i32
  }
  func.func @transform_6(%arg0: i32) -> (i32, i32) {
    %c0_i32 = arith.constant 0 : i32
    %c0_i32_0 = arith.constant 0 : i32
    %c0_i32_1 = arith.constant 0 : i32
    return %c0_i32, %c0_i32_0 : i32, i32
  }
  func.func @transform_7(%arg0: i32) -> (i32, i32) {
    %c0_i32 = arith.constant 0 : i32
    %c0_i32_0 = arith.constant 0 : i32
    %c0_i32_1 = arith.constant 0 : i32
    return %c0_i32, %c0_i32_0 : i32, i32
  }
  func.func @transform_8(%arg0: i32) -> (i32, i32) {
    %c0_i32 = arith.constant 0 : i32
    %c0_i32_0 = arith.constant 0 : i32
    %c0_i32_1 = arith.constant 0 : i32
    return %c0_i32, %c0_i32_0 : i32, i32
  }
  func.func @transform_9(%arg0: i32) -> (i32, i32) {
    %c0_i32 = arith.constant 0 : i32
    %c0_i32_0 = arith.constant 0 : i32
    %c0_i32_1 = arith.constant 0 : i32
    return %c0_i32, %c0_i32_0 : i32, i32
  }
  func.func @transform_10(%arg0: i32) -> (i32, i32) {
    %c0_i32 = arith.constant 0 : i32
    %c0_i32_0 = arith.constant 0 : i32
    %c0_i32_1 = arith.constant 0 : i32
    return %c0_i32, %c0_i32_0 : i32, i32
  }
  func.func @transform_11(%arg0: i32) -> (i32, i32) {
    %c0_i32 = arith.constant 0 : i32
    %c0_i32_0 = arith.constant 0 : i32
    %c0_i32_1 = arith.constant 0 : i32
    return %c0_i32, %c0_i32_0 : i32, i32
  }
  func.func @transform_12(%arg0: i32) -> (i32, i32) {
    %c0_i32 = arith.constant 0 : i32
    %c0_i32_0 = arith.constant 0 : i32
    %c0_i32_1 = arith.constant 0 : i32
    return %c0_i32, %c0_i32_0 : i32, i32
  }
}

</mosaic_0001>

<bundles_post_ra>
// kernel: sage_forward.1
= control target key start
LH: loop header
LB: loop body
LE: loop exit
PB: predicated region body
PF: predicated region fallthrough
CT: control target
= control target key end

     0   :  { %17 = vsyncpa [#allocation3], 0  ;;  %s6385_s0 = inlined_call_operand.hbm [shape: f32[256,256], index: 0, kind: input, shape index: {}]   ;;  %s6386_s1 = inlined_call_operand.hbm [shape: f32[256,128], index: 1, kind: input, shape index: {}]   ;;  %s6387_s2 = inlined_call_operand.hbm [shape: bf16[256,128], index: 2, kind: input, shape index: {}]   ;;  %s6388_s3 = inlined_call_operand.vmem [shape: f32[1,128], index: 3, kind: input, shape index: {}]   ;;  %s6389_s4 = inlined_call_operand.vmem [shape: f32[1,128], index: 4, kind: input, shape index: {}]   ;;  %s6390_s5 = inlined_call_operand.vmem [shape: f32[1,128], index: 5, kind: input, shape index: {}]   ;;  %s6391_s6 = inlined_call_operand.hbm [shape: bf16[256,128], index: 6, kind: input, shape index: {}]   ;;  %s6392_s7 = inlined_call_operand.vmem [shape: f32[1,128], index: 7, kind: input, shape index: {}]   ;;  %s6393_s8 = inlined_call_operand.vmem [shape: f32[1,128], index: 8, kind: input, shape index: {}]   ;;  %s6394_s9 = inlined_call_operand.vmem [shape: f32[1,128], index: 9, kind: input, shape index: {}]   ;;  %s6395_s10 = inlined_call_operand.hbm [shape: bf16[256,128], index: 10, kind: input, shape index: {}]   ;;  %s6396_s11 = inlined_call_operand.vmem [shape: f32[1,128], index: 11, kind: input, shape index: {}]   ;;  %s6397_s12 = inlined_call_operand.hbm [shape: f32[256,128], index: 12, kind: output, shape index: {}]  }
   0x1   :  { %18 = vsyncpa [#allocation6], 0 }
   0x2   :  { %19 = vsyncpa [#allocation9], 0 }
   0x3   :  { %20 = vsyncpa [#allocation4], 0  ;;  %s4300_s21 = smov [#allocation5]  }
   0x4   :  { %s38_s22 = sshll.u32 %s4300_s21, 4  ;;  %s39_s22 = int_to_ptr.vmem [resolvable:$true] %s38_s22 }
   0x5   :  { %s4180_s23 = scalar_lea.vmem %s39_s22, 4096  ;;  %p4185_p1 = scmp.lt.s32.totalorder %s39_s22, %s39_s22 }
   0x6   :  { %p4181_p0 = scmp.ne.s32.totalorder %s39_s22, %s4180_s23  ;;  %p4186_p2 = scmp.lt.s32.totalorder %s4180_s23, %s4180_s23 }
   0x8   :  { %p4187_p3 = por %p4186_p2, %p4185_p1 }
   0xa   :  { %p4188_p4 = pnand %p4187_p3, %p4181_p0 }
   0xc   :  { %4191 = shalt.err (!%p4188_p4)
}
   0xd   :  { %s4301_s24 = smov 128   ;;  %s4302_s25 = smov 8  }
   0xe   :  { %44 = dma.hbm_to_vmem [thread:$0]  %s6386_s1, 4096, %s39_s22, [#allocation6], %s4301_s24, %s4301_s24, %s4302_s25  }
   0xf   :  { %s4303_s28 = smov [#allocation8]   ;;  %s4304_s30 = smov [#allocation2]  }
  0x10   :  { %s68_s29 = sshll.u32 %s4303_s28, 4  ;;  %s26_s13 = sshll.u32 %s4304_s30, 4  ;;  %s69_s29 = int_to_ptr.vmem [resolvable:$true] %s68_s29  ;;  %s27_s13 = int_to_ptr.vmem [resolvable:$true] %s26_s13 }
  0x11   :  { %s4200_s14 = scalar_lea.vmem %s69_s29, 2048  ;;  %p4205_p6 = scmp.lt.s32.totalorder %s69_s29, %s69_s29 }
  0x12   :  { %p4201_p5 = scmp.ne.s32.totalorder %s69_s29, %s4200_s14  ;;  %p4206_p7 = scmp.lt.s32.totalorder %s4200_s14, %s4200_s14 }
  0x14   :  { %p4207_p8 = por %p4206_p7, %p4205_p6 }
  0x16   :  { %p4208_p9 = pnand %p4207_p8, %p4201_p5 }
  0x18   :  { %4211 = shalt.err (!%p4208_p9)
}
  0x19   :  { %s4305_s15 = smov 64   ;;  %s4306_s16 = smov 4  }
  0x1a   :  { %74 = dma.hbm_to_vmem [thread:$0]  %s6391_s6, 2048, %s69_s29, [#allocation9], %s4305_s15, %s4305_s15, %s4306_s16  }
  0x1b   :  { %s4220_s1 = scalar_lea.vmem %s27_s13, 8192  ;;  %p4225_p11 = scmp.lt.s32.totalorder %s27_s13, %s27_s13 }
  0x1c   :  { %p4221_p10 = scmp.ne.s32.totalorder %s27_s13, %s4220_s1  ;;  %p4226_p12 = scmp.lt.s32.totalorder %s4220_s1, %s4220_s1 }
  0x1e   :  { %p4227_p13 = por %p4226_p12, %p4225_p11 }
  0x20   :  { %p4228_p0 = pnand %p4227_p13, %p4221_p10 }
  0x22   :  { %4231 = shalt.err (!%p4228_p0)
}
  0x23   :  { %s4307_s19 = smov 256   ;;  %s4308_s20 = smov 16  }
  0x24   :  { %32 = dma.hbm_to_vmem [thread:$0]  %s6385_s0, 8192, %s27_s13, [#allocation3], %s4307_s19, %s4307_s19, %s4308_s20  }
  0x25   :  { %s4309_s23 = smov [#allocation7]   ;;  %s4310_s27 = smov [#allocation10]  }
  0x26   :  { %s50_s26 = sshll.u32 %s4309_s23, 4  ;;  %s86_s28 = sshll.u32 %s4310_s27, 4  ;;  %s51_s26 = int_to_ptr.vmem [resolvable:$true] %s50_s26  ;;  %s87_s28 = int_to_ptr.vmem [resolvable:$true] %s86_s28 }
  0x27   :  { %s4240_s6 = scalar_lea.vmem %s51_s26, 2048  ;;  %p4245_p2 = scmp.lt.s32.totalorder %s51_s26, %s51_s26 }
  0x28   :  { %p4241_p1 = scmp.ne.s32.totalorder %s51_s26, %s4240_s6  ;;  %p4246_p3 = scmp.lt.s32.totalorder %s4240_s6, %s4240_s6 }
  0x2a   :  { %p4247_p4 = por %p4246_p3, %p4245_p2 }
  0x2c   :  { %p4248_p5 = pnand %p4247_p4, %p4241_p1 }
  0x2e   :  { %4251 = shalt.err (!%p4248_p5)
}
  0x2f   :  { %56 = dma.hbm_to_vmem [thread:$0]  %s6387_s2, 2048, %s51_s26, [#allocation6], %s4305_s15, %s4305_s15, %s4306_s16  }
  0x30   :  { %s4260_s0 = scalar_lea.vmem %s87_s28, 2048  ;;  %p4265_p7 = scmp.lt.s32.totalorder %s87_s28, %s87_s28 }
  0x31   :  { %p4261_p6 = scmp.ne.s32.totalorder %s87_s28, %s4260_s0  ;;  %p4266_p8 = scmp.lt.s32.totalorder %s4260_s0, %s4260_s0 }
  0x33   :  { %p4267_p9 = por %p4266_p8, %p4265_p7 }
  0x35   :  { %p4268_p10 = pnand %p4267_p9, %p4261_p6 }
  0x37   :  { %4271 = shalt.err (!%p4268_p10)
}
  0x38   :  { %92 = dma.hbm_to_vmem [thread:$0]  %s6395_s10, 2048, %s87_s28, [#allocation9], %s4305_s15, %s4305_s15, %s4306_s16  }
  0x39   :  { %4292 = dma.done.wait [#allocation3], 8192  }
  0x3a   :  { %4293 = vsyncadd [#allocation3], 4294959104 }
  0x3b   :  { %4294 = dma.done.wait [#allocation6], 6144  }
  0x3c   :  { %4295 = vsyncadd [#allocation6], 4294961152 }
  0x3d   :  { %4296 = dma.done.wait [#allocation9], 4096  }
  0x3e   :  { %4297 = vsyncadd [#allocation9], 4294963200  ;;  %v558_v0 = vld [vmem:[#allocation5 + $0xf0] sm:$0xff]  ;;  %v559_v1 = vld [vmem:[#allocation5 + $0xf8] sm:$0xff] }
  0x3f   :  { %v542_v2 = vld [vmem:[#allocation5 + $0x70] sm:$0xff]  ;;  %v4404_v3 = vpack.c.bf16 %v559_v1, %v558_v0  ;;  %v543_v4 = vld [vmem:[#allocation5 + $0x78] sm:$0xff]  ;;  %v556_v5 = vld [vmem:[#allocation5 + $0xe0] sm:$0xff] }
  0x40   :  { %v557_v6 = vld [vmem:[#allocation5 + $0xe8] sm:$0xff]  ;;  %v4406_v7 = vpack.c.bf16 %v543_v4, %v542_v2  ;;  %v540_v9 = vld [vmem:[#allocation5 + $0x60] sm:$0xff]  ;;  %v554_v11 = vld [vmem:[#allocation5 + $0xd0] sm:$0xff] }
  0x41   :  { %6533 = vst [vmem:[#allocation16_spill] sm:$0xff] %v4404_v3  ;;  %v4408_v8 = vpack.c.bf16 %v557_v6, %v556_v5  ;;  %v541_v10 = vld [vmem:[#allocation5 + $0x68] sm:$0xff]  ;;  %3244 = vmatprep.subr.bf16.mxu0 %v4404_v3  ;;  %v555_v12 = vld [vmem:[#allocation5 + $0xd8] sm:$0xff]  ;;  %v538_v15 = vld [vmem:[#allocation5 + $0x50] sm:$0xff] }
  0x42   :  { %6534 = vst [vmem:[#allocation17_spill] sm:$0xff] %v4406_v7  ;;  %3245 = vmatpush3.bf16.msra.mxu0 %v4406_v7  ;;  %v4412_v13 = vpack.c.bf16 %v541_v10, %v540_v9  ;;  %v4415_v14 = vpack.c.bf16 %v555_v12, %v554_v11  ;;  %v539_v16 = vld [vmem:[#allocation5 + $0x58] sm:$0xff]  ;;  %v552_v17 = vld [vmem:[#allocation5 + $0xc0] sm:$0xff]  ;;  %v553_v18 = vld [vmem:[#allocation5 + $0xc8] sm:$0xff] }
  0x43   :  { %6535 = vst [vmem:[#allocation18_spill] sm:$0xff] %v4408_v8  ;;  %3246 = vmatprep.subr.bf16.mxu0 %v4408_v8  ;;  %v4418_v19 = vpack.c.bf16 %v539_v16, %v538_v15  ;;  %v536_v20 = vld [vmem:[#allocation5 + $0x40] sm:$0xff]  ;;  %v4421_v21 = vpack.c.bf16 %v553_v18, %v552_v17  ;;  %v537_v22 = vld [vmem:[#allocation5 + $0x48] sm:$0xff]  ;;  %v550_v23 = vld [vmem:[#allocation5 + $0xb0] sm:$0xff] }
  0x44   :  { %6536 = vst [vmem:[#allocation19_spill] sm:$0xff] %v4412_v13  ;;  %6537 = vst [vmem:[#allocation20_spill] sm:$0xff] %v4415_v14  ;;  %v551_v24 = vld [vmem:[#allocation5 + $0xb8] sm:$0xff]  ;;  %v528_v25 = vld [vmem:[#allocation5] sm:$0xff]  ;;  %v4428_v31 = vpack.c.bf16 %v537_v22, %v536_v20 }
  0x45   :  { %6538 = vst [vmem:[#allocation21_spill] sm:$0xff] %v4418_v19  ;;  %6539 = vst [vmem:[#allocation22_spill] sm:$0xff] %v4421_v21  ;;  %v529_v26 = vld [vmem:[#allocation5 + $0x8] sm:$0xff]  ;;  %v114_v29 = vld [vmem:[#allocation2 + $0x18] sm:$0xff]  ;;  %v4438_v37 = vpack.c.bf16 %v551_v24, %v550_v23 }
  0x46   :  { %3247 = vmatpush3.bf16.msra.mxu0 %v4412_v13  ;;  %v112_v27 = vld [vmem:[#allocation2 + $0x8] sm:$0xff]  ;;  %v4423_v28 = vpack.c.bf16 %v529_v26, %v528_v25  ;;  %v4425_v30 = vld [vmem:[#allocation2] sm:$0xff]  ;;  %6540 = vst [vmem:[#allocation23_spill] sm:$0xff] %v4428_v31  ;;  %v534_v32 = vld [vmem:[#allocation5 + $0x30] sm:$0xff] }
  0x47   :  { %3248 = vmatprep.subr.bf16.mxu0 %v4415_v14  ;;  %v4430_v33 = vpack.c.bf16 %v114_v29, %v112_v27  ;;  %v4432_v34 = vld [vmem:[#allocation2 + $0x28] sm:$0xff]  ;;  %v4434_v35 = vld [vmem:[#allocation2 + $0x20] sm:$0xff]  ;;  %v175_v36 = vadd.f32 %v112_v27, %v4425_v30  ;;  %6542 = vst [vmem:[#allocation25_spill] sm:$0xff] %v4438_v37  ;;  %v535_v38 = vld [vmem:[#allocation5 + $0x38] sm:$0xff] }
  0x48   :  { %v548_v39 = vld [vmem:[#allocation5 + $0xa0] sm:$0xff]  ;;  %v4440_v40 = vld [vmem:[#allocation2 + $0x10] sm:$0xff]  ;;  %v181_v41 = vadd.f32 %v4432_v34, %v4434_v35  ;;  %952 = vmatprep.mubr.bf16.mxu1 %v4423_v28  ;;  %v549_v42 = vld [vmem:[#allocation5 + $0xa8] sm:$0xff]  ;;  %v4454_v47 = vpack.c.bf16 %v535_v38, %v534_v32 }
  0x49   :  { %6541 = vst [vmem:[#allocation24_spill] sm:$0xff] %v4430_v33  ;;  %608 = vmatprep.mubr.bf16.mxu0 %v4430_v33  ;;  %v4446_v43 = vld [vmem:[#allocation2 + $0x38] sm:$0xff]  ;;  %v4448_v44 = vld [vmem:[#allocation2 + $0x30] sm:$0xff]  ;;  %176 = vadd.xlane.f32.xlu0 %v175_v36  ;;  %v178_v45 = vadd.f32 %v114_v29, %v4440_v40  ;;  %v532_v48 = vld [vmem:[#allocation5 + $0x20] sm:$0xff]  ;;  %v4457_v50 = vpack.c.bf16 %v549_v42, %v548_v39 }
  0x4a   :  { %3249 = vmatpush3.bf16.msra.mxu0 %v4418_v19  ;;  %182 = vadd.xlane.f32.xlu1 %v181_v41  ;;  %v184_v46 = vadd.f32 %v4446_v43, %v4448_v44  ;;  %6543 = vst [vmem:[#allocation26_spill] sm:$0xff] %v4454_v47  ;;  %v533_v49 = vld [vmem:[#allocation5 + $0x28] sm:$0xff]  ;;  %v546_v51 = vld [vmem:[#allocation5 + $0x90] sm:$0xff]  ;;  %v4461_v53 = vld [vmem:[#allocation2 + $0x40] sm:$0xff] }
  0x4b   :  { %3250 = vmatprep.subr.bf16.mxu0 %v4421_v21  ;;  %6544 = vst [vmem:[#allocation27_spill] sm:$0xff] %v4457_v50  ;;  %v4459_v52 = vld [vmem:[#allocation2 + $0x48] sm:$0xff]  ;;  %v547_v54 = vld [vmem:[#allocation5 + $0x98] sm:$0xff]  ;;  %v4465_v56 = vld [vmem:[#allocation2 + $0x50] sm:$0xff]  ;;  %v4472_v59 = vpack.c.bf16 %v533_v49, %v532_v48 }
  0x4c   :  { %v4463_v55 = vld [vmem:[#allocation2 + $0x58] sm:$0xff]  ;;  %v187_v57 = vadd.f32 %v4459_v52, %v4461_v53  ;;  %v530_v60 = vld [vmem:[#allocation5 + $0x10] sm:$0xff]  ;;  %v4475_v62 = vpack.c.bf16 %v547_v54, %v546_v51  ;;  %v544_v63 = vld [vmem:[#allocation5 + $0x80] sm:$0xff] }
  0x4d   :  { %179 = vadd.xlane.f32.xlu0 %v178_v45  ;;  %v190_v58 = vadd.f32 %v4463_v55, %v4465_v56  ;;  %6545 = vst [vmem:[#allocation28_spill] sm:$0xff] %v4472_v59  ;;  %v531_v61 = vld [vmem:[#allocation5 + $0x18] sm:$0xff]  ;;  %v4477_v0 = vld [vmem:[#allocation2 + $0x68] sm:$0xff]  ;;  %v4479_v1 = vld [vmem:[#allocation2 + $0x60] sm:$0xff] }
  0x4e   :  { %3251 = vmatpush3.bf16.msra.mxu0 %v4428_v31  ;;  %185 = vadd.xlane.f32.xlu1 %v184_v46  ;;  %6546 = vst [vmem:[#allocation29_spill] sm:$0xff] %v4475_v62  ;;  %v545_v2 = vld [vmem:[#allocation5 + $0x88] sm:$0xff]  ;;  %v4481_v4 = vld [vmem:[#allocation2 + $0x78] sm:$0xff]  ;;  %v4483_v5 = vld [vmem:[#allocation2 + $0x70] sm:$0xff]  ;;  %v193_v6 = vadd.f32 %v4477_v0, %v4479_v1  ;;  %v4490_v10 = vpack.c.bf16 %v531_v61, %v530_v60 }
  0x4f   :  { %3252 = vmatprep.subr.bf16.mxu0 %v4438_v37  ;;  %v196_v9 = vadd.f32 %v4481_v4, %v4483_v5  ;;  %v4493_v11 = vpack.c.bf16 %v545_v2, %v544_v63  ;;  %v4495_v12 = vld [vmem:[#allocation2 + $0x88] sm:$0xff]  ;;  %v4497_v15 = vld [vmem:[#allocation2 + $0x98] sm:$0xff]  ;;  %v4499_v16 = vld [vmem:[#allocation2 + $0x80] sm:$0xff]  ;;  %v4567_v63 = vpack.c.bf16 %v4440_v40, %v4425_v30  ;;  %v4588_v30 = vpack.c.bf16 %v4446_v43, %v4432_v34 }
  0x50   :  { %6547 = vst [vmem:[#allocation30_spill] sm:$0xff] %v4490_v10  ;;  %v4501_v17 = vld [vmem:[#allocation2 + $0x90] sm:$0xff]  ;;  %v199_v18 = vadd.f32 %v4495_v12, %v4499_v16  ;;  %v4505_v20 = vld [vmem:[#allocation2 + $0x160] sm:$0xff]  ;;  %v4509_v23 = vld [vmem:[#allocation2 + $0xa8] sm:$0xff] }
  0x51   :  { %188 = vadd.xlane.f32.xlu0 %v187_v57  ;;  %6548 = vst [vmem:[#allocation31_spill] sm:$0xff] %v4493_v11  ;;  %v4507_v22 = vld [vmem:[#allocation2 + $0x170] sm:$0xff]  ;;  %v4511_v24 = vld [vmem:[#allocation2 + $0xa0] sm:$0xff]  ;;  %v202_v25 = vadd.f32 %v4497_v15, %v4501_v17  ;;  %v4524_v32 = vld [vmem:[#allocation2 + $0xb8] sm:$0xff] }
  0x52   :  { %3253 = vmatpush3.bf16.msra.mxu0 %v4454_v47  ;;  %191 = vadd.xlane.f32.xlu1 %v190_v58  ;;  %v4517_v26 = vpack.c.bf16 %v4507_v22, %v4505_v20  ;;  %v4519_v27 = vld [vmem:[#allocation2 + $0x180] sm:$0xff]  ;;  %v4521_v29 = vld [vmem:[#allocation2 + $0x190] sm:$0xff]  ;;  %v4532_v39 = vld [vmem:[#allocation2 + $0x1a8] sm:$0xff]  ;;  %v205_v51 = vadd.f32 %v4509_v23, %v4511_v24  ;;  %6554 = vst [vmem:[#allocation37_spill] sm:$0xff] %v4567_v63 }
  0x53   :  { %3254 = vmatprep.subr.bf16.mxu0 %v4457_v50  ;;  %v4526_v36 = vld [vmem:[#allocation2 + $0xb0] sm:$0xff]  ;;  %v4530_v38 = vpack.c.bf16 %v4521_v29, %v4519_v27  ;;  %v4534_v41 = vld [vmem:[#allocation2 + $0x1b8] sm:$0xff]  ;;  %v4536_v42 = vld [vmem:[#allocation2 + $0x1a0] sm:$0xff]  ;;  %6556 = vst [vmem:[#allocation39_spill] sm:$0xff] %v4588_v30 }
  0x54   :  { %6549 = vst [vmem:[#allocation32_spill] sm:$0xff] %v4517_v26  ;;  %v4541_v45 = vpack.c.bf16 %v4534_v41, %v4532_v39  ;;  %v4543_v46 = vld [vmem:[#allocation2 + $0x1b0] sm:$0xff]  ;;  %v4545_v48 = vld [vmem:[#allocation2 + $0x1c8] sm:$0xff]  ;;  %v4547_v49 = vld [vmem:[#allocation2 + $0x1d8] sm:$0xff] }
  0x55   :  { %194 = vadd.xlane.f32.xlu0 %v193_v6  ;;  %6550 = vst [vmem:[#allocation33_spill] sm:$0xff] %v4530_v38  ;;  %v4553_v54 = vpack.c.bf16 %v4543_v46, %v4536_v42  ;;  %v4557_v57 = vpack.c.bf16 %v4547_v49, %v4545_v48  ;;  %v4559_v58 = vld [vmem:[#allocation2 + $0x1c0] sm:$0xff]  ;;  %v4561_v60 = vld [vmem:[#allocation2 + $0x1d0] sm:$0xff]  ;;  %v4563_v61 = vld [vmem:[#allocation2 + $0x1e8] sm:$0xff] }
  0x56   :  { %3255 = vmatpush3.bf16.msra.mxu0 %v4472_v59  ;;  %197 = vadd.xlane.f32.xlu1 %v196_v9  ;;  %6551 = vst [vmem:[#allocation34_spill] sm:$0xff] %v4541_v45  ;;  %v4569_v2 = vld [vmem:[#allocation2 + $0xc8] sm:$0xff]  ;;  %v4571_v6 = vld [vmem:[#allocation2 + $0xc0] sm:$0xff]  ;;  %v208_v9 = vadd.f32 %v4524_v32, %v4526_v36  ;;  %v4579_v3 = vld [vmem:[#allocation2 + $0x1f8] sm:$0xff] }
  0x57   :  { %3256 = vmatprep.subr.bf16.mxu0 %v4475_v62  ;;  %6552 = vst [vmem:[#allocation35_spill] sm:$0xff] %v4553_v54  ;;  %6553 = vst [vmem:[#allocation36_spill] sm:$0xff] %v4557_v57  ;;  %v4581_v8 = vld [vmem:[#allocation2 + $0x1e0] sm:$0xff]  ;;  %v4583_v14 = vld [vmem:[#allocation2 + $0x1f0] sm:$0xff]  ;;  %v4596_v21 = vpack.c.bf16 %v4579_v3, %v4563_v61 }
  0x58   :  { %v4590_v40 = vld [vmem:[#allocation2 + $0xd8] sm:$0xff]  ;;  %v4600_v37 = vpack.c.bf16 %v4583_v14, %v4581_v8  ;;  %v3930_v34 = vld [vmem:[#allocation7 + $0x70] sm:$0xff]   ;;  %v4605_v43 = vld [vmem:[#allocation2 + $0xe8] sm:$0xff] }
  0x59   :  { %200 = vadd.xlane.f32.xlu0 %v199_v18  ;;  %v4577_v18 = vpack.c.bf16 %v4561_v60, %v4559_v58  ;;  %6557 = vst [vmem:[#allocation40_spill] sm:$0xff] %v4596_v21  ;;  %v3928_v50 = vld [vmem:[#allocation7 + $0x78] sm:$0xff]   ;;  %v3932_v19 = vld [vmem:[#allocation7 + $0x68] sm:$0xff]   ;;  %v4624_v47 = vld [vmem:[#allocation2 + $0x100] sm:$0xff] }
  0x5a   :  { %3257 = vmatpush3.bf16.msra.mxu0 %v4490_v10  ;;  %203 = vadd.xlane.f32.xlu1 %v202_v25  ;;  %v4592_v25 = vld [vmem:[#allocation2 + $0xd0] sm:$0xff]  ;;  %6558 = vst [vmem:[#allocation41_spill] sm:$0xff] %v4600_v37  ;;  %v3929_v62 = vld [vmem:[#allocation7 + $0x38] sm:$0xff]   ;;  %v4622_v31 = vld [vmem:[#allocation2 + $0x108] sm:$0xff] }
  0x5b   :  { %3258 = vmatprep.subr.bf16.mxu0 %v4493_v11  ;;  %6555 = vst [vmem:[#allocation38_spill] sm:$0xff] %v4577_v18  ;;  %3356 = vmatprep.subr.bf16.mxu1 %v3928_v50  ;;  %v4607_v11 = vld [vmem:[#allocation2 + $0xe0] sm:$0xff]  ;;  %v214_v7 = vadd.f32 %v4590_v40, %v4592_v25  ;;  %v4612_v13 = vld [vmem:[#allocation2 + $0xf8] sm:$0xff]  ;;  %v4614_v50 = vld [vmem:[#allocation2 + $0xf0] sm:$0xff] }
  0x5c   :  { %3357 = vmatpush3.bf16.msra.mxu1 %v3929_v62  ;;  %v220_v62 = vadd.f32 %v4612_v13, %v4614_v50  ;;  %v3933_v59 = vld [vmem:[#allocation7 + $0x28] sm:$0xff]   ;;  %v4641_v33 = vld [vmem:[#allocation2 + $0x120] sm:$0xff] }
  0x5d   :  { %206 = vadd.xlane.f32.xlu0 %v205_v51  ;;  %v3931_v51 = vld [vmem:[#allocation7 + $0x30] sm:$0xff]   ;;  %3358 = vmatprep.subr.bf16.mxu1 %v3930_v34  ;;  %v4630_v34 = vpack.c.bf16 %v4463_v55, %v4459_v52  ;;  %v4639_v10 = vld [vmem:[#allocation2 + $0x128] sm:$0xff]  ;;  %v3936_v55 = vld [vmem:[#allocation7 + $0x58] sm:$0xff]  }
  0x5e   :  { %3259 = vmatpush3.bf16.msra.mxu0 %v4423_v28  ;;  %v211_v28 = vadd.f32 %v4569_v2, %v4571_v6  ;;  %209 = vadd.xlane.f32.xlu1 %v208_v9  ;;  %v4620_v9 = vpack.c.bf16 %v4448_v44, %v4434_v35  ;;  %v3934_v35 = vld [vmem:[#allocation7 + $0x60] sm:$0xff]   ;;  %v223_v44 = vadd.f32 %v4622_v31, %v4624_v47  ;;  %v4656_v37 = vld [vmem:[#allocation2 + $0x148] sm:$0xff] }
  0x5f   :  { %6560 = vst [vmem:[#allocation43_spill] sm:$0xff] %v4630_v34  ;;  %v4658_v21 = vld [vmem:[#allocation2 + $0x140] sm:$0xff] }
  0x60   :  { %6559 = vst [vmem:[#allocation42_spill] sm:$0xff] %v4620_v9  ;;  %3359 = vmatpush3.bf16.msra.mxu1 %v3931_v51  ;;  %v229_v51 = vadd.f32 %v4639_v10, %v4641_v33 }
  0x61   :  { %609 = vmatmul.mubr.bf16.vlgmr.msra.gmra.mxu0 %v4567_v63  ;;  %212 = vadd.xlane.f32.xlu0 %v211_v28  ;;  %v217_v63 = vadd.f32 %v4605_v43, %v4607_v11  ;;  %v4632_v28 = vld [vmem:[#allocation2 + $0x118] sm:$0xff] }
  0x62   :  { %616 = vmatprep.mubr.bf16.mxu0 %v4588_v30  ;;  %215 = vadd.xlane.f32.xlu1 %v214_v7  ;;  %v4634_v30 = vld [vmem:[#allocation2 + $0x110] sm:$0xff]  ;;  %v3935_v7 = vld [vmem:[#allocation7 + $0x20] sm:$0xff]  }
  0x63   :  { %3360 = vmatprep.subr.bf16.mxu1 %v3932_v19  ;;  %v226_v52 = vadd.f32 %v4632_v28, %v4634_v30  ;;  %v4646_v19 = vld [vmem:[#allocation2 + $0x138] sm:$0xff] }
  0x64   :  { %3361 = vmatpush3.bf16.msra.mxu1 %v3933_v59  ;;  %v4664_v59 = vpack.c.bf16 %v4481_v4, %v4477_v0  ;;  %v4678_v0 = vld [vmem:[#allocation2 + $0x178] sm:$0xff] }
  0x65   :  { %218 = vadd.xlane.f32.xlu0 %v217_v63  ;;  %v4648_v63 = vld [vmem:[#allocation2 + $0x130] sm:$0xff]  ;;  %3362 = vmatprep.subr.bf16.mxu1 %v3934_v35  ;;  %v4666_v35 = vld [vmem:[#allocation2 + $0x158] sm:$0xff] }
  0x66   :  { %221 = vadd.xlane.f32.xlu1 %v220_v62  ;;  %v4654_v62 = vpack.c.bf16 %v4465_v56, %v4461_v53  ;;  %6561 = vst [vmem:[#allocation44_spill] sm:$0xff] %v4664_v59  ;;  %v235_v53 = vadd.f32 %v4656_v37, %v4658_v21  ;;  %v4673_v56 = vld [vmem:[#allocation2 + $0x168] sm:$0xff] }
  0x67   :  { %v241_v4 = vadd.f32 %v4673_v56, %v4505_v20  ;;  %v4709_v20 = vpack.c.bf16 %v4524_v32, %v4509_v23  ;;  %v268_v23 = vadd.f32 %v4579_v3, %v4583_v14  ;;  %v4743_v3 = vpack.c.bf16 %v4614_v50, %v4607_v11  ;;  %v3939_v11 = vld [vmem:[#allocation7 + $0x10] sm:$0xff]  }
  0x68   :  { %3363 = vmatpush3.bf16.msra.mxu1 %v3935_v7  ;;  %v4684_v7 = vpack.c.bf16 %v4483_v5, %v4479_v1  ;;  %v253_v5 = vadd.f32 %v4532_v39, %v4536_v42  ;;  %v4747_v14 = vpack.c.bf16 %v4632_v28, %v4622_v31  ;;  %v4757_v32 = vpack.c.bf16 %v4646_v19, %v4639_v10  ;;  %v3940_v31 = vld [vmem:[#allocation7 + $0x48] sm:$0xff]   ;;  %v3942_v10 = vld [vmem:[#allocation7 + $0x40] sm:$0xff]  }
  0x69   :  { %617 = vmatmul.mubr.bf16.gmra.mxu0 %v4620_v9  ;;  %224 = vadd.xlane.f32.xlu0 %v223_v44  ;;  %v3937_v9 = vld [vmem:[#allocation7 + $0x18] sm:$0xff]   ;;  %v4668_v44 = vld [vmem:[#allocation2 + $0x150] sm:$0xff]  ;;  %6565 = vst [vmem:[#allocation48_spill] sm:$0xff] %v4709_v20  ;;  %6570 = vst [vmem:[#allocation53_spill] sm:$0xff] %v4743_v3  ;;  %v4763_v39 = vpack.c.bf16 %v4648_v63, %v4641_v33  ;;  %v4777_v33 = vpack.c.bf16 %v4678_v0, %v4673_v56 }
  0x6a   :  { %624 = vmatprep.mubr.bf16.mxu0 %v4630_v34  ;;  %227 = vadd.xlane.f32.xlu1 %v226_v52  ;;  %v232_v34 = vadd.f32 %v4646_v19, %v4648_v63  ;;  %v238_v52 = vadd.f32 %v4666_v35, %v4668_v44  ;;  %6562 = vst [vmem:[#allocation45_spill] sm:$0xff] %v4684_v7  ;;  %6571 = vst [vmem:[#allocation54_spill] sm:$0xff] %v4747_v14  ;;  %v3943_v42 = vld [vmem:[#allocation7] sm:$0xff]  }
  0x6b   :  { %3364 = vmatprep.subr.bf16.mxu1 %v3936_v55  ;;  %v4686_v55 = vld [vmem:[#allocation2 + $0x188] sm:$0xff]  ;;  %6573 = vst [vmem:[#allocation56_spill] sm:$0xff] %v4757_v32  ;;  %6574 = vst [vmem:[#allocation57_spill] sm:$0xff] %v4763_v39 }
  0x6c   :  { %3365 = vmatpush3.bf16.msra.mxu1 %v3937_v9  ;;  %v247_v9 = vadd.f32 %v4686_v55, %v4519_v27  ;;  %v262_v27 = vadd.f32 %v4547_v49, %v4561_v60  ;;  %6577 = vst [vmem:[#allocation60_spill] sm:$0xff] %v4777_v33  ;;  %v6581_v49 = vld [vmem:[#allocation24_spill] sm:$0xff] }
  0x6d   :  { %230 = vadd.xlane.f32.xlu0 %v229_v51  ;;  %v4692_v51 = vpack.c.bf16 %v4497_v15, %v4495_v12  ;;  %v4703_v12 = vpack.c.bf16 %v4501_v17, %v4499_v16  ;;  %v256_v15 = vadd.f32 %v4534_v41, %v4543_v46  ;;  %v265_v16 = vadd.f32 %v4563_v61, %v4581_v8  ;;  %v3941_v41 = vld [vmem:[#allocation7 + $0x8] sm:$0xff]  }
  0x6e   :  { %233 = vadd.xlane.f32.xlu1 %v232_v34  ;;  %v244_v34 = vadd.f32 %v4678_v0, %v4507_v22  ;;  %v259_v22 = vadd.f32 %v4545_v48, %v4559_v58  ;;  %v4721_v17 = vpack.c.bf16 %v4526_v36, %v4511_v24  ;;  %v4733_v8 = vpack.c.bf16 %v4592_v25, %v4571_v6  ;;  %v3938_v36 = vld [vmem:[#allocation7 + $0x50] sm:$0xff]   ;;  %v6580_v48 = vld [vmem:[#allocation41_spill] sm:$0xff] }
  0x6f   :  { %6563 = vst [vmem:[#allocation46_spill] sm:$0xff] %v4692_v51  ;;  %6564 = vst [vmem:[#allocation47_spill] sm:$0xff] %v4703_v12  ;;  %v4737_v24 = vpack.c.bf16 %v4612_v13, %v4605_v43  ;;  %v4753_v13 = vpack.c.bf16 %v4634_v30, %v4624_v47  ;;  %3366 = vmatprep.subr.bf16.mxu1 %v3938_v36  ;;  %v4767_v47 = vpack.c.bf16 %v4666_v35, %v4656_v37 }
  0x70   :  { %6566 = vst [vmem:[#allocation49_spill] sm:$0xff] %v4721_v17  ;;  %6568 = vst [vmem:[#allocation51_spill] sm:$0xff] %v4733_v8  ;;  %3367 = vmatpush3.bf16.msra.mxu1 %v3939_v11  ;;  %v4773_v46 = vpack.c.bf16 %v4668_v44, %v4658_v21  ;;  %v6579_v21 = vld [vmem:[#allocation40_spill] sm:$0xff] }
  0x71   :  { %625 = vmatmul.mubr.bf16.gmra.mxu0 %v4654_v62  ;;  %236 = vadd.xlane.f32.xlu0 %v235_v53  ;;  %6569 = vst [vmem:[#allocation52_spill] sm:$0xff] %v4737_v24  ;;  %6572 = vst [vmem:[#allocation55_spill] sm:$0xff] %v4753_v13 }
  0x72   :  { %632 = vmatprep.mubr.bf16.mxu0 %v4664_v59  ;;  %239 = vadd.xlane.f32.xlu1 %v238_v52  ;;  %v162_v59 = vld [vmem:[#allocation2 + $0x198] sm:$0xff]  ;;  %6575 = vst [vmem:[#allocation58_spill] sm:$0xff] %v4767_v47  ;;  %6576 = vst [vmem:[#allocation59_spill] sm:$0xff] %v4773_v46 }
  0x73   :  { %v250_v1 = vadd.f32 %v162_v59, %v4521_v29  ;;  %v4727_v29 = vpack.c.bf16 %v4590_v40, %v4569_v2  ;;  %3368 = vmatprep.subr.bf16.mxu1 %v3940_v31  ;;  %v4782_v37 = vpack.c.bf16 %v162_v59, %v4686_v55 }
  0x74   :  { %3369 = vmatpush3.bf16.msra.mxu1 %v3941_v41  ;;  %v6586_v41 = vld [vmem:[#allocation30_spill] sm:$0xff] }
  0x75   :  { %242 = vadd.xlane.f32.xlu0 %v241_v4  ;;  %6567 = vst [vmem:[#allocation50_spill] sm:$0xff] %v4727_v29  ;;  %3370 = vmatprep.subr.bf16.mxu1 %v3942_v10  ;;  %6578 = vst [vmem:[#allocation61_spill] sm:$0xff] %v4782_v37 }
  0x76   :  { %245 = vadd.xlane.f32.xlu1 %v244_v34 }
  0x78   :  { %3371 = vmatpush3.bf16.msra.mxu1 %v3943_v42 }
  0x79   :  { %633 = vmatmul.mubr.bf16.gmra.mxu0 %v4684_v7  ;;  %248 = vadd.xlane.f32.xlu0 %v247_v9 }
  0x7a   :  { %640 = vmatprep.mubr.bf16.mxu0 %v4692_v51  ;;  %251 = vadd.xlane.f32.xlu1 %v250_v1 }
  0x7d   :  { %254 = vadd.xlane.f32.xlu0 %v253_v5 }
  0x7e   :  { %257 = vadd.xlane.f32.xlu1 %v256_v15 }
  0x81   :  { %641 = vmatmul.mubr.bf16.gmra.mxu0 %v4703_v12  ;;  %260 = vadd.xlane.f32.xlu0 %v259_v22 }
  0x82   :  { %648 = vmatprep.mubr.bf16.mxu0 %v4709_v20  ;;  %263 = vadd.xlane.f32.xlu1 %v262_v27 }
  0x85   :  { %266 = vadd.xlane.f32.xlu0 %v265_v16 }
  0x86   :  { %269 = vadd.xlane.f32.xlu1 %v268_v23 }
  0x89   :  { %649 = vmatmul.mubr.bf16.gmra.mxu0 %v4721_v17 }
  0x8a   :  { %656 = vmatprep.mubr.bf16.mxu0 %v4727_v29 }
  0x91   :  { %657 = vmatmul.mubr.bf16.gmra.mxu0 %v4733_v8 }
  0x92   :  { %664 = vmatprep.mubr.bf16.mxu0 %v4737_v24 }
  0x99   :  { %665 = vmatmul.mubr.bf16.gmra.mxu0 %v4743_v3 }
  0x9a   :  { %672 = vmatprep.mubr.bf16.mxu0 %v4747_v14 }
  0xa1   :  { %673 = vmatmul.mubr.bf16.gmra.mxu0 %v4753_v13 }
  0xa2   :  { %680 = vmatprep.mubr.bf16.mxu0 %v4757_v32 }
  0xa9   :  { %681 = vmatmul.mubr.bf16.gmra.mxu0 %v4763_v39 }
  0xaa   :  { %688 = vmatprep.mubr.bf16.mxu0 %v4767_v47 }
  0xb1   :  { %689 = vmatmul.mubr.bf16.gmra.mxu0 %v4773_v46 }
  0xb2   :  { %696 = vmatprep.mubr.bf16.mxu0 %v4777_v33 }
  0xb9   :  { %697 = vmatmul.mubr.bf16.gmra.mxu0 %v4517_v26 }
  0xba   :  { %704 = vmatprep.mubr.bf16.mxu0 %v4782_v37 }
  0xc1   :  { %705 = vmatmul.mubr.bf16.gmra.mxu0 %v4530_v38 }
  0xc2   :  { %712 = vmatprep.mubr.bf16.mxu0 %v4541_v45 }
  0xc9   :  { %713 = vmatmul.mubr.bf16.gmra.mxu0 %v4553_v54 }
  0xca   :  { %720 = vmatprep.mubr.bf16.mxu0 %v4557_v57 }
  0xd1   :  { %721 = vmatmul.mubr.bf16.gmra.mxu0 %v4577_v18 }
  0xd2   :  { %728 = vmatprep.mubr.bf16.mxu0 %v6579_v21  ;;  %v177_v58 = vpop.xlane.xlu0 %176 }
  0xd3   :  { %v271_v61 = vmax.f32 %v177_v58, 1.0  ;;  %v183_v2 = vpop.xlane.xlu1 %182 }
  0xd4   :  { %v273_v40 = vmax.f32 %v183_v2, 1.0 }
  0xd5   :  { %3976 = vrcp.f32 %v271_v61 }
  0xd6   :  { %v180_v60 = vpop.xlane.xlu0 %179 }
  0xd7   :  { %v272_v6 = vmax.f32 %v180_v60, 1.0  ;;  %v186_v30 = vpop.xlane.xlu1 %185 }
  0xd8   :  { %v274_v25 = vmax.f32 %v186_v30, 1.0 }
  0xd9   :  { %729 = vmatmul.mubr.bf16.gmra.mxu0 %v6580_v48  ;;  %3978 = vrcp.f32 %v272_v6 }
  0xda   :  { %1444 = vmatprep.mubr.bf16.mxu0 %v6581_v49  ;;  %3980 = vrcp.f32 %v273_v40  ;;  %v189_v50 = vpop.xlane.xlu0 %188 }
  0xdb   :  { %3982 = vrcp.f32 %v274_v25  ;;  %v192_v19 = vpop.xlane.xlu1 %191  ;;  %v275_v59 = vmax.f32 %v189_v50, 1.0 }
  0xdc   :  { %v276_v53 = vmax.f32 %v192_v19, 1.0 }
  0xdd   :  { %3984 = vrcp.f32 %v275_v59  ;;  %v6589_v59 = vld [vmem:[#allocation28_spill] sm:$0xff] }
  0xde   :  { %3986 = vrcp.f32 %v276_v53  ;;  %v195_v9 = vpop.xlane.xlu0 %194 }
  0xdf   :  { %v198_v5 = vpop.xlane.xlu1 %197  ;;  %v277_v27 = vmax.f32 %v195_v9, 1.0 }
  0xe0   :  { %v278_v36 = vmax.f32 %v198_v5, 1.0 }
  0xe1   :  { %3988 = vrcp.f32 %v277_v27 }
  0xe2   :  { %v4794_v35 = vpop.eup %3976  ;;  %3990 = vrcp.f32 %v278_v36  ;;  %v201_v61 = vpop.xlane.xlu0 %200 }
  0xe3   :  { %6582 = vst [vmem:[#allocation62_spill] sm:$0xff] %v4794_v35  ;;  %v204_v6 = vpop.xlane.xlu1 %203  ;;  %v279_v25 = vmax.f32 %v201_v61, 1.0 }
  0xe5   :  { %3992 = vrcp.f32 %v279_v25 }
  0xe6   :  { %v4796_v56 = vpop.eup %3978 }
  0xe7   :  { %6583 = vst [vmem:[#allocation63_spill] sm:$0xff] %v4796_v56  ;;  %v4800_v16 = vpop.eup %3980 }
  0xe8   :  { %6584 = vst [vmem:[#allocation64_spill] sm:$0xff] %v4800_v16  ;;  %v4802_v11 = vpop.eup %3982 }
  0xe9   :  { %6585 = vst [vmem:[#allocation65_spill] sm:$0xff] %v4802_v11 }
 0x121   :  { %v3260_v43 = vpop.f32.mrf.mxu0 }
 0x123   :  { %v3261_v28 = vpop.f32.mrf.mxu0 }
 0x124   :  { %v3262_v44 = vadd.f32 %v3261_v28, %v3260_v43  ;;  %v4807_v43 = vpop.eup %3984  ;;  %v280_v28 = vmax.f32 %v204_v6, 1.0 }
 0x125   :  { %v3263_v63 = vpop.f32.mrf.mxu0  ;;  %6587 = vst [vmem:[#allocation30_spill] sm:$0xff] %v4807_v43  ;;  %v4809_v19 = vpop.eup %3986 }
 0x126   :  { %v737_v55 = vmul.f32 %v4794_v35, %v3262_v44  ;;  %6588 = vst [vmem:[#allocation66_spill] sm:$0xff] %v4809_v19  ;;  %3994 = vrcp.f32 %v280_v28 }
 0x127   :  { %v3264_v52 = vpop.f32.mrf.mxu0 }
 0x128   :  { %v3265_v0 = vadd.f32 %v3264_v52, %v3263_v63 }
 0x129   :  { %v3266_v4 = vpop.f32.mrf.mxu0 }
 0x12a   :  { %v738_v34 = vmul.f32 %v4796_v56, %v3265_v0  ;;  %v4908_v56 = vld [vmem:[%s6388_s3] ss:$0 sm:$0xff] }
 0x12b   :  { %v3267_v1 = vpop.f32.mrf.mxu0 }
 0x12c   :  { %v769_v15 = vpack.c.bf16 %v738_v34, %v737_v55  ;;  %v3268_v23 = vadd.f32 %v3267_v1, %v3266_v4  ;;  %v207_v4 = vpop.xlane.xlu0 %206  ;;  %v210_v34 = vpop.xlane.xlu1 %209 }
 0x12d   :  { %v3269_v22 = vpop.f32.mrf.mxu0  ;;  %v281_v5 = vmax.f32 %v207_v4, 1.0  ;;  %v282_v27 = vmax.f32 %v210_v34, 1.0 }
 0x12e   :  { %953 = vmatmul.mubr.bf16.vlgmr.msra.gmra.mxu1 %v769_v15  ;;  %v739_v58 = vmul.f32 %v4800_v16, %v3268_v23  ;;  %v4814_v15 = vpop.eup %3988 }
 0x12f   :  { %v3270_v31 = vpop.f32.mrf.mxu0  ;;  %960 = vmatprep.mubr.bf16.mxu1 %v6586_v41  ;;  %6590 = vst [vmem:[#allocation28_spill] sm:$0xff] %v4814_v15  ;;  %v4816_v23 = vpop.eup %3990  ;;  %3996 = vrcp.f32 %v281_v5 }
 0x130   :  { %v3271_v10 = vadd.f32 %v3270_v31, %v3269_v22  ;;  %6591 = vst [vmem:[#allocation67_spill] sm:$0xff] %v4816_v23  ;;  %v6592_v31 = vld [vmem:[#allocation26_spill] sm:$0xff]  ;;  %3998 = vrcp.f32 %v282_v27  ;;  %v4821_v25 = vpop.eup %3992 }
 0x131   :  { %v3272_v42 = vpop.f32.mrf.mxu0  ;;  %6593 = vst [vmem:[#allocation26_spill] sm:$0xff] %v4821_v25 }
 0x132   :  { %v740_v60 = vmul.f32 %v4802_v11, %v3271_v10 }
 0x133   :  { %v3273_v2 = vpop.f32.mrf.mxu0 }
 0x134   :  { %v770_v30 = vpack.c.bf16 %v740_v60, %v739_v58  ;;  %v3274_v50 = vadd.f32 %v3273_v2, %v3272_v42  ;;  %v213_v60 = vpop.xlane.xlu0 %212  ;;  %v216_v2 = vpop.xlane.xlu1 %215 }
 0x135   :  { %v3275_v40 = vpop.f32.mrf.mxu0  ;;  %v284_v28 = vmax.f32 %v216_v2, 1.0 }
 0x136   :  { %961 = vmatmul.mubr.bf16.gmra.mxu1 %v770_v30  ;;  %v741_v52 = vmul.f32 %v4807_v43, %v3274_v50 }
 0x137   :  { %v3276_v63 = vpop.f32.mrf.mxu0  ;;  %968 = vmatprep.mubr.bf16.mxu1 %v6589_v59 }
 0x138   :  { %v3277_v44 = vadd.f32 %v3276_v63, %v3275_v40  ;;  %v283_v40 = vmax.f32 %v213_v60, 1.0  ;;  %v4823_v63 = vpop.eup %3994 }
 0x139   :  { %v3278_v53 = vpop.f32.mrf.mxu0  ;;  %6594 = vst [vmem:[#allocation68_spill] sm:$0xff] %v4823_v63 }
 0x13a   :  { %v742_v0 = vmul.f32 %v4809_v19, %v3277_v44  ;;  %v6595_v44 = vld [vmem:[#allocation23_spill] sm:$0xff]  ;;  %4000 = vrcp.f32 %v283_v40 }
 0x13b   :  { %v3279_v55 = vpop.f32.mrf.mxu0  ;;  %4002 = vrcp.f32 %v284_v28 }
 0x13c   :  { %v771_v9 = vpack.c.bf16 %v742_v0, %v741_v52  ;;  %v3280_v22 = vadd.f32 %v3279_v55, %v3278_v53  ;;  %v219_v55 = vpop.xlane.xlu0 %218  ;;  %v4828_v27 = vpop.eup %3996 }
 0x13d   :  { %v3281_v1 = vpop.f32.mrf.mxu0  ;;  %6596 = vst [vmem:[#allocation23_spill] sm:$0xff] %v4828_v27 }
 0x13e   :  { %969 = vmatmul.mubr.bf16.gmra.mxu1 %v771_v9  ;;  %v743_v42 = vmul.f32 %v4814_v15, %v3280_v22  ;;  %v222_v9 = vpop.xlane.xlu1 %221  ;;  %v285_v22 = vmax.f32 %v219_v55, 1.0  ;;  %v6601_v55 = vld [vmem:[#allocation19_spill] sm:$0xff] }
 0x13f   :  { %v3282_v36 = vpop.f32.mrf.mxu0  ;;  %976 = vmatprep.mubr.bf16.mxu1 %v6592_v31  ;;  %v286_v31 = vmax.f32 %v222_v9, 1.0 }
 0x140   :  { %v3283_v41 = vadd.f32 %v3282_v36, %v3281_v1  ;;  %4004 = vrcp.f32 %v285_v22 }
 0x141   :  { %v3284_v10 = vpop.f32.mrf.mxu0  ;;  %4006 = vrcp.f32 %v286_v31 }
 0x142   :  { %v744_v58 = vmul.f32 %v4816_v23, %v3283_v41  ;;  %v4830_v41 = vpop.eup %3998  ;;  %v228_v40 = vpop.xlane.xlu1 %227 }
 0x143   :  { %v3285_v61 = vpop.f32.mrf.mxu0  ;;  %6597 = vst [vmem:[#allocation69_spill] sm:$0xff] %v4830_v41 }
 0x144   :  { %v772_v6 = vpack.c.bf16 %v744_v58, %v743_v42  ;;  %v3286_v50 = vadd.f32 %v3285_v61, %v3284_v10  ;;  %v6598_v42 = vld [vmem:[#allocation21_spill] sm:$0xff] }
 0x145   :  { %v3287_v30 = vpop.f32.mrf.mxu0 }
 0x146   :  { %977 = vmatmul.mubr.bf16.gmra.mxu1 %v772_v6  ;;  %v745_v0 = vmul.f32 %v4821_v25, %v3286_v50  ;;  %v225_v6 = vpop.xlane.xlu0 %224  ;;  %v234_v31 = vpop.xlane.xlu1 %233 }
 0x147   :  { %v3288_v59 = vpop.f32.mrf.mxu0  ;;  %984 = vmatprep.mubr.bf16.mxu1 %v6595_v44  ;;  %v4835_v44 = vpop.eup %4000 }
 0x148   :  { %v3289_v53 = vadd.f32 %v3288_v59, %v3287_v30  ;;  %v287_v59 = vmax.f32 %v225_v6, 1.0  ;;  %6599 = vst [vmem:[#allocation21_spill] sm:$0xff] %v4835_v44 }
 0x149   :  { %v3290_v52 = vpop.f32.mrf.mxu0 }
 0x14a   :  { %v746_v4 = vmul.f32 %v4823_v63, %v3289_v53  ;;  %4008 = vrcp.f32 %v287_v59  ;;  %v231_v22 = vpop.xlane.xlu0 %230 }
 0x14b   :  { %v3291_v34 = vpop.f32.mrf.mxu0 }
 0x14c   :  { %v773_v1 = vpack.c.bf16 %v746_v4, %v745_v0  ;;  %v3292_v36 = vadd.f32 %v3291_v34, %v3290_v52  ;;  %v288_v52 = vmax.f32 %v228_v40, 1.0  ;;  %v4837_v0 = vpop.eup %4002  ;;  %v6604_v40 = vld [vmem:[#allocation17_spill] sm:$0xff] }
 0x14d   :  { %v3293_v5 = vpop.f32.mrf.mxu0  ;;  %6600 = vst [vmem:[#allocation70_spill] sm:$0xff] %v4837_v0 }
 0x14e   :  { %985 = vmatmul.mubr.bf16.gmra.mxu1 %v773_v1  ;;  %v747_v61 = vmul.f32 %v4828_v27, %v3292_v36  ;;  %4010 = vrcp.f32 %v288_v52  ;;  %v237_v52 = vpop.xlane.xlu0 %236 }
 0x14f   :  { %v3294_v10 = vpop.f32.mrf.mxu0  ;;  %992 = vmatprep.mubr.bf16.mxu1 %v6598_v42 }
 0x150   :  { %v3295_v58 = vadd.f32 %v3294_v10, %v3293_v5 }
 0x151   :  { %v3296_v60 = vpop.f32.mrf.mxu0 }
 0x152   :  { %v748_v2 = vmul.f32 %v4830_v41, %v3295_v58  ;;  %v289_v58 = vmax.f32 %v231_v22, 1.0 }
 0x153   :  { %v3297_v30 = vpop.f32.mrf.mxu0 }
 0x154   :  { %v774_v50 = vpack.c.bf16 %v748_v2, %v747_v61  ;;  %v3298_v53 = vadd.f32 %v3297_v30, %v3296_v60  ;;  %v4842_v60 = vpop.eup %4004  ;;  %v290_v2 = vmax.f32 %v234_v31, 1.0  ;;  %4012 = vrcp.f32 %v289_v58 }
 0x155   :  { %v3299_v28 = vpop.f32.mrf.mxu0  ;;  %6602 = vst [vmem:[#allocation19_spill] sm:$0xff] %v4842_v60  ;;  %v4844_v6 = vpop.eup %4006 }
 0x156   :  { %993 = vmatmul.mubr.bf16.gmra.mxu1 %v774_v50  ;;  %v749_v1 = vmul.f32 %v4835_v44, %v3298_v53  ;;  %6603 = vst [vmem:[#allocation71_spill] sm:$0xff] %v4844_v6  ;;  %4014 = vrcp.f32 %v290_v2 }
 0x157   :  { %v3300_v4 = vpop.f32.mrf.mxu0  ;;  %1000 = vmatprep.mubr.bf16.mxu1 %v6601_v55  ;;  %v240_v55 = vpop.xlane.xlu1 %239 }
 0x158   :  { %v3301_v34 = vadd.f32 %v3300_v4, %v3299_v28 }
 0x159   :  { %v3302_v9 = vpop.f32.mrf.mxu0 }
 0x15a   :  { %v750_v5 = vmul.f32 %v4837_v0, %v3301_v34 }
 0x15b   :  { %v3303_v36 = vpop.f32.mrf.mxu0 }
 0x15c   :  { %v775_v10 = vpack.c.bf16 %v750_v5, %v749_v1  ;;  %v3304_v61 = vadd.f32 %v3303_v36, %v3302_v9  ;;  %v291_v1 = vmax.f32 %v237_v52, 1.0  ;;  %v4849_v5 = vpop.eup %4008  ;;  %v292_v36 = vmax.f32 %v240_v55, 1.0 }
 0x15d   :  { %v3305_v42 = vpop.f32.mrf.mxu0  ;;  %6605 = vst [vmem:[#allocation17_spill] sm:$0xff] %v4849_v5  ;;  %v4851_v31 = vpop.eup %4010 }
 0x15e   :  { %1001 = vmatmul.mubr.bf16.gmra.mxu1 %v775_v10  ;;  %v751_v59 = vmul.f32 %v4842_v60, %v3304_v61  ;;  %6606 = vst [vmem:[#allocation72_spill] sm:$0xff] %v4851_v31  ;;  %4016 = vrcp.f32 %v291_v1  ;;  %v6610_v1 = vld [vmem:[#allocation29_spill] sm:$0xff] }
 0x15f   :  { %v3306_v30 = vpop.f32.mrf.mxu0  ;;  %1008 = vmatprep.mubr.bf16.mxu1 %v6604_v40  ;;  %4018 = vrcp.f32 %v292_v36  ;;  %v243_v40 = vpop.xlane.xlu0 %242 }
 0x160   :  { %v3307_v50 = vadd.f32 %v3306_v30, %v3305_v42  ;;  %v6607_v42 = vld [vmem:[#allocation31_spill] sm:$0xff]  ;;  %v293_v52 = vmax.f32 %v243_v40, 1.0 }
 0x161   :  { %v3308_v28 = vpop.f32.mrf.mxu0 }
 0x162   :  { %v752_v53 = vmul.f32 %v4844_v6, %v3307_v50  ;;  %4020 = vrcp.f32 %v293_v52  ;;  %v6613_v52 = vld [vmem:[#allocation27_spill] sm:$0xff] }
 0x163   :  { %v3309_v4 = vpop.f32.mrf.mxu0 }
 0x164   :  { %v776_v34 = vpack.c.bf16 %v752_v53, %v751_v59  ;;  %v3310_v22 = vadd.f32 %v3309_v4, %v3308_v28  ;;  %v246_v59 = vpop.xlane.xlu1 %245  ;;  %v4856_v4 = vpop.eup %4012 }
 0x165   :  { %v3311_v9 = vpop.f32.mrf.mxu0  ;;  %6608 = vst [vmem:[#allocation31_spill] sm:$0xff] %v4856_v4 }
 0x166   :  { %1009 = vmatmul.mubr.bf16.gmra.mxu1 %v776_v34  ;;  %v753_v2 = vmul.f32 %v4849_v5, %v3310_v22  ;;  %v294_v34 = vmax.f32 %v246_v59, 1.0 }
 0x167   :  { %v3312_v10 = vpop.f32.mrf.mxu0  ;;  %1016 = vmatprep.mubr.bf16.mxu1 %v6607_v42  ;;  %v4858_v42 = vpop.eup %4014 }
 0x168   :  { %v3313_v58 = vadd.f32 %v3312_v10, %v3311_v9  ;;  %6609 = vst [vmem:[#allocation73_spill] sm:$0xff] %v4858_v42  ;;  %4022 = vrcp.f32 %v294_v34  ;;  %v252_v40 = vpop.xlane.xlu1 %251 }
 0x169   :  { %v3314_v61 = vpop.f32.mrf.mxu0  ;;  %v296_v5 = vmax.f32 %v252_v40, 1.0 }
 0x16a   :  { %v754_v30 = vmul.f32 %v4851_v31, %v3313_v58 }
 0x16b   :  { %v3315_v50 = vpop.f32.mrf.mxu0  ;;  %v4863_v59 = vpop.eup %4016 }
 0x16c   :  { %v777_v53 = vpack.c.bf16 %v754_v30, %v753_v2  ;;  %v3316_v55 = vadd.f32 %v3315_v50, %v3314_v61  ;;  %v249_v2 = vpop.xlane.xlu0 %248  ;;  %6611 = vst [vmem:[#allocation29_spill] sm:$0xff] %v4863_v59 }
 0x16d   :  { %v3317_v28 = vpop.f32.mrf.mxu0  ;;  %v295_v50 = vmax.f32 %v249_v2, 1.0  ;;  %v258_v2 = vpop.xlane.xlu1 %257 }
 0x16e   :  { %1017 = vmatmul.mubr.bf16.gmra.mxu1 %v777_v53  ;;  %v755_v36 = vmul.f32 %v4856_v4, %v3316_v55  ;;  %v298_v4 = vmax.f32 %v258_v2, 1.0 }
 0x16f   :  { %v3318_v9 = vpop.f32.mrf.mxu0  ;;  %1024 = vmatprep.mubr.bf16.mxu1 %v6610_v1  ;;  %v4865_v1 = vpop.eup %4018  ;;  %4024 = vrcp.f32 %v295_v50  ;;  %v6616_v50 = vld [vmem:[#allocation25_spill] sm:$0xff] }
 0x170   :  { %v3319_v22 = vadd.f32 %v3318_v9, %v3317_v28  ;;  %6612 = vst [vmem:[#allocation74_spill] sm:$0xff] %v4865_v1  ;;  %4026 = vrcp.f32 %v296_v5 }
 0x171   :  { %v3320_v10 = vpop.f32.mrf.mxu0 }
 0x172   :  { %v756_v58 = vmul.f32 %v4858_v42, %v3319_v22 }
 0x173   :  { %v3321_v30 = vpop.f32.mrf.mxu0 }
 0x174   :  { %v778_v31 = vpack.c.bf16 %v756_v58, %v755_v36  ;;  %v3322_v53 = vadd.f32 %v3321_v30, %v3320_v10  ;;  %v255_v36 = vpop.xlane.xlu0 %254  ;;  %v4870_v30 = vpop.eup %4020 }
 0x175   :  { %v3323_v61 = vpop.f32.mrf.mxu0  ;;  %6614 = vst [vmem:[#allocation27_spill] sm:$0xff] %v4870_v30 }
 0x176   :  { %1025 = vmatmul.mubr.bf16.gmra.mxu1 %v778_v31  ;;  %v757_v34 = vmul.f32 %v4863_v59, %v3322_v53  ;;  %v297_v31 = vmax.f32 %v255_v36, 1.0  ;;  %v264_v36 = vpop.xlane.xlu1 %263 }
 0x177   :  { %v3324_v28 = vpop.f32.mrf.mxu0  ;;  %1032 = vmatprep.mubr.bf16.mxu1 %v6613_v52  ;;  %v4872_v52 = vpop.eup %4022  ;;  %v300_v59 = vmax.f32 %v264_v36, 1.0 }
 0x178   :  { %v3325_v55 = vadd.f32 %v3324_v28, %v3323_v61  ;;  %6615 = vst [vmem:[#allocation75_spill] sm:$0xff] %v4872_v52  ;;  %4028 = vrcp.f32 %v297_v31  ;;  %v6619_v31 = vld [vmem:[#allocation22_spill] sm:$0xff] }
 0x179   :  { %v3326_v9 = vpop.f32.mrf.mxu0  ;;  %4030 = vrcp.f32 %v298_v4 }
 0x17a   :  { %v758_v22 = vmul.f32 %v4865_v1, %v3325_v55 }
 0x17b   :  { %v3327_v58 = vpop.f32.mrf.mxu0 }
 0x17c   :  { %v779_v42 = vpack.c.bf16 %v758_v22, %v757_v34  ;;  %v3328_v40 = vadd.f32 %v3327_v58, %v3326_v9  ;;  %v261_v34 = vpop.xlane.xlu0 %260  ;;  %v4877_v58 = vpop.eup %4024 }
 0x17d   :  { %v3329_v10 = vpop.f32.mrf.mxu0  ;;  %6617 = vst [vmem:[#allocation25_spill] sm:$0xff] %v4877_v58 }
 0x17e   :  { %1033 = vmatmul.mubr.bf16.gmra.mxu1 %v779_v42  ;;  %v759_v5 = vmul.f32 %v4870_v30, %v3328_v40  ;;  %v299_v42 = vmax.f32 %v261_v34, 1.0  ;;  %v270_v34 = vpop.xlane.xlu1 %269 }
 0x17f   :  { %v3330_v61 = vpop.f32.mrf.mxu0  ;;  %1040 = vmatprep.mubr.bf16.mxu1 %v6616_v50  ;;  %v4879_v50 = vpop.eup %4026  ;;  %v302_v30 = vmax.f32 %v270_v34, 1.0  ;;  %v6625_v34 = vld [vmem:[#allocation18_spill] sm:$0xff] }
 0x180   :  { %v3331_v53 = vadd.f32 %v3330_v61, %v3329_v10  ;;  %6618 = vst [vmem:[#allocation76_spill] sm:$0xff] %v4879_v50  ;;  %4032 = vrcp.f32 %v299_v42  ;;  %v6622_v42 = vld [vmem:[#allocation20_spill] sm:$0xff] }
 0x181   :  { %v3332_v28 = vpop.f32.mrf.mxu0  ;;  %4034 = vrcp.f32 %v300_v59 }
 0x182   :  { %v760_v55 = vmul.f32 %v4872_v52, %v3331_v53 }
 0x183   :  { %v3333_v22 = vpop.f32.mrf.mxu0 }
 0x184   :  { %v780_v1 = vpack.c.bf16 %v760_v55, %v759_v5  ;;  %v3334_v2 = vadd.f32 %v3333_v22, %v3332_v28  ;;  %v267_v5 = vpop.xlane.xlu0 %266 }
 0x185   :  { %v3335_v9 = vpop.f32.mrf.mxu0  ;;  %v4884_v22 = vpop.eup %4028 }
 0x186   :  { %1041 = vmatmul.mubr.bf16.gmra.mxu1 %v780_v1  ;;  %v761_v4 = vmul.f32 %v4877_v58, %v3334_v2  ;;  %v301_v1 = vmax.f32 %v267_v5, 1.0  ;;  %6620 = vst [vmem:[#allocation22_spill] sm:$0xff] %v4884_v22 }
 0x187   :  { %v3336_v10 = vpop.f32.mrf.mxu0  ;;  %1048 = vmatprep.mubr.bf16.mxu1 %v6619_v31  ;;  %v4886_v31 = vpop.eup %4030 }
 0x188   :  { %v3337_v40 = vadd.f32 %v3336_v10, %v3335_v9  ;;  %6621 = vst [vmem:[#allocation77_spill] sm:$0xff] %v4886_v31  ;;  %4036 = vrcp.f32 %v301_v1 }
 0x189   :  { %v3338_v61 = vpop.f32.mrf.mxu0  ;;  %4038 = vrcp.f32 %v302_v30 }
 0x18a   :  { %v762_v53 = vmul.f32 %v4879_v50, %v3337_v40 }
 0x18b   :  { %v3339_v55 = vpop.f32.mrf.mxu0 }
 0x18c   :  { %v781_v52 = vpack.c.bf16 %v762_v53, %v761_v4  ;;  %v3340_v36 = vadd.f32 %v3339_v55, %v3338_v61 }
 0x18d   :  { %v3341_v28 = vpop.f32.mrf.mxu0  ;;  %v4891_v50 = vpop.eup %4032 }
 0x18e   :  { %1049 = vmatmul.mubr.bf16.gmra.mxu1 %v781_v52  ;;  %v763_v59 = vmul.f32 %v4884_v22, %v3340_v36  ;;  %6623 = vst [vmem:[#allocation20_spill] sm:$0xff] %v4891_v50  ;;  %v4893_v61 = vpop.eup %4034 }
 0x18f   :  { %v3342_v9 = vpop.f32.mrf.mxu0  ;;  %1056 = vmatprep.mubr.bf16.mxu1 %v6622_v42  ;;  %6624 = vst [vmem:[#allocation78_spill] sm:$0xff] %v4893_v61 }
 0x190   :  { %v3343_v2 = vadd.f32 %v3342_v9, %v3341_v28 }
 0x191   :  { %v3344_v10 = vpop.f32.mrf.mxu0 }
 0x192   :  { %v764_v40 = vmul.f32 %v4886_v31, %v3343_v2 }
 0x193   :  { %v3345_v4 = vpop.f32.mrf.mxu0 }
 0x194   :  { %v782_v53 = vpack.c.bf16 %v764_v40, %v763_v59  ;;  %v3346_v52 = vadd.f32 %v3345_v4, %v3344_v10 }
 0x195   :  { %v3347_v5 = vpop.f32.mrf.mxu0  ;;  %v4898_v59 = vpop.eup %4036 }
 0x196   :  { %1057 = vmatmul.mubr.bf16.gmra.mxu1 %v782_v53  ;;  %v765_v9 = vmul.f32 %v4891_v50, %v3346_v52  ;;  %6626 = vst [vmem:[#allocation18_spill] sm:$0xff] %v4898_v59  ;;  %v4900_v10 = vpop.eup %4038  ;;  %v6628_v53 = vld [vmem:[#allocation16_spill] sm:$0xff] }
 0x197   :  { %v3348_v55 = vpop.f32.mrf.mxu0  ;;  %1064 = vmatprep.mubr.bf16.mxu1 %v6625_v34  ;;  %6627 = vst [vmem:[#allocation79_spill] sm:$0xff] %v4900_v10 }
 0x198   :  { %v3349_v28 = vadd.f32 %v3348_v55, %v3347_v5 }
 0x199   :  { %v3350_v1 = vpop.f32.mrf.mxu0 }
 0x19a   :  { %v766_v36 = vmul.f32 %v4893_v61, %v3349_v28 }
 0x19b   :  { %v3351_v42 = vpop.f32.mrf.mxu0 }
 0x19c   :  { %v783_v30 = vpack.c.bf16 %v766_v36, %v765_v9  ;;  %v3352_v40 = vadd.f32 %v3351_v42, %v3350_v1 }
 0x19d   :  { %v3353_v2 = vpop.f32.mrf.mxu0 }
 0x19e   :  { %1065 = vmatmul.mubr.bf16.gmra.mxu1 %v783_v30  ;;  %v767_v5 = vmul.f32 %v4898_v59, %v3352_v40 }
 0x19f   :  { %v3354_v4 = vpop.f32.mrf.mxu0  ;;  %1072 = vmatprep.mubr.bf16.mxu1 %v6628_v53 }
 0x1a0   :  { %v3355_v31 = vadd.f32 %v3354_v4, %v3353_v2 }
 0x1a2   :  { %v768_v55 = vmul.f32 %v4900_v10, %v3355_v31 }
 0x1a4   :  { %v784_v52 = vpack.c.bf16 %v768_v55, %v767_v5 }
 0x1a6   :  { %1073 = vmatmul.mubr.bf16.gmra.mxu1 %v784_v52 }
 0x1ee   :  { %v3372_v34 = vpop.f32.mrf.mxu1 }
 0x1f0   :  { %v3373_v28 = vpop.f32.mrf.mxu1 }
 0x1f1   :  { %v3374_v9 = vadd.f32 %v3373_v28, %v3372_v34 }
 0x1f2   :  { %v3375_v36 = vpop.f32.mrf.mxu1 }
 0x1f3   :  { %v4914_v18 = vadd.f32 %v3374_v9, %v4908_v56 }
 0x1f4   :  { %v3376_v61 = vpop.f32.mrf.mxu1 }
 0x1f5   :  { %v3377_v43 = vadd.f32 %v3376_v61, %v3375_v36 }
 0x1f6   :  { %v3378_v50 = vpop.f32.mrf.mxu1 }
 0x1f7   :  { %v4911_v49 = vadd.f32 %v3377_v43, %v4908_v56 }
 0x1f8   :  { %v3379_v1 = vpop.f32.mrf.mxu1 }
 0x1f9   :  { %v3380_v16 = vadd.f32 %v3379_v1, %v3378_v50  ;;  %v1113_v50 = vadd.f32 %v4911_v49, %v4914_v18 }
 0x1fa   :  { %v3381_v42 = vpop.f32.mrf.mxu1 }
 0x1fb   :  { %v4917_v57 = vadd.f32 %v3380_v16, %v4908_v56 }
 0x1fc   :  { %v3382_v30 = vpop.f32.mrf.mxu1 }
 0x1fd   :  { %v3383_v48 = vadd.f32 %v3382_v30, %v3381_v42  ;;  %v1114_v43 = vadd.f32 %v1113_v50, %v4917_v57 }
 0x1fe   :  { %v3384_v22 = vpop.f32.mrf.mxu1 }
 0x1ff   :  { %v4922_v1 = vadd.f32 %v3383_v48, %v4908_v56 }
 0x200   :  { %v3385_v58 = vpop.f32.mrf.mxu1 }
 0x201   :  { %v3386_v61 = vadd.f32 %v3385_v58, %v3384_v22  ;;  %v1115_v16 = vadd.f32 %v1114_v43, %v4922_v1 }
 0x202   :  { %v3387_v6 = vpop.f32.mrf.mxu1 }
 0x203   :  { %v4926_v42 = vadd.f32 %v3386_v61, %v4908_v56 }
 0x204   :  { %v3388_v53 = vpop.f32.mrf.mxu1 }
 0x205   :  { %v3389_v54 = vadd.f32 %v3388_v53, %v3387_v6  ;;  %v1116_v37 = vadd.f32 %v1115_v16, %v4926_v42 }
 0x206   :  { %v3390_v2 = vpop.f32.mrf.mxu1 }
 0x207   :  { %v4930_v58 = vadd.f32 %v3389_v54, %v4908_v56 }
 0x208   :  { %v3391_v4 = vpop.f32.mrf.mxu1 }
 0x209   :  { %v3392_v9 = vadd.f32 %v3391_v4, %v3390_v2  ;;  %v1117_v50 = vadd.f32 %v1116_v37, %v4930_v58 }
 0x20a   :  { %v3393_v40 = vpop.f32.mrf.mxu1 }
 0x20b   :  { %v4934_v48 = vadd.f32 %v3392_v9, %v4908_v56 }
 0x20c   :  { %v3394_v59 = vpop.f32.mrf.mxu1 }
 0x20d   :  { %v3395_v22 = vadd.f32 %v3394_v59, %v3393_v40  ;;  %v1118_v43 = vadd.f32 %v1117_v50, %v4934_v48 }
 0x20e   :  { %v3396_v31 = vpop.f32.mrf.mxu1 }
 0x20f   :  { %v4938_v61 = vadd.f32 %v3395_v22, %v4908_v56 }
 0x210   :  { %v3397_v5 = vpop.f32.mrf.mxu1 }
 0x211   :  { %v3398_v6 = vadd.f32 %v3397_v5, %v3396_v31  ;;  %v1119_v16 = vadd.f32 %v1118_v43, %v4938_v61 }
 0x212   :  { %v3399_v55 = vpop.f32.mrf.mxu1 }
 0x213   :  { %v4942_v54 = vadd.f32 %v3398_v6, %v4908_v56 }
 0x214   :  { %v3400_v52 = vpop.f32.mrf.mxu1 }
 0x215   :  { %v3401_v2 = vadd.f32 %v3400_v52, %v3399_v55  ;;  %v1120_v37 = vadd.f32 %v1119_v16, %v4942_v54 }
 0x216   :  { %v3402_v10 = vpop.f32.mrf.mxu1 }
 0x217   :  { %v4946_v9 = vadd.f32 %v3401_v2, %v4908_v56 }
 0x218   :  { %v3403_v34 = vpop.f32.mrf.mxu1 }
 0x219   :  { %v3404_v59 = vadd.f32 %v3403_v34, %v3402_v10  ;;  %v1121_v50 = vadd.f32 %v1120_v37, %v4946_v9 }
 0x21a   :  { %v3405_v28 = vpop.f32.mrf.mxu1 }
 0x21b   :  { %v4950_v22 = vadd.f32 %v3404_v59, %v4908_v56 }
 0x21c   :  { %v3406_v60 = vpop.f32.mrf.mxu1 }
 0x21d   :  { %v3407_v31 = vadd.f32 %v3406_v60, %v3405_v28  ;;  %v1122_v43 = vadd.f32 %v1121_v50, %v4950_v22 }
 0x21e   :  { %v3408_v0 = vpop.f32.mrf.mxu1 }
 0x21f   :  { %v4954_v6 = vadd.f32 %v3407_v31, %v4908_v56 }
 0x220   :  { %v3409_v44 = vpop.f32.mrf.mxu1 }
 0x221   :  { %v3410_v55 = vadd.f32 %v3409_v44, %v3408_v0  ;;  %v1123_v16 = vadd.f32 %v1122_v43, %v4954_v6 }
 0x222   :  { %v3411_v41 = vpop.f32.mrf.mxu1 }
 0x223   :  { %v4958_v2 = vadd.f32 %v3410_v55, %v4908_v56 }
 0x224   :  { %v3412_v27 = vpop.f32.mrf.mxu1 }
 0x225   :  { %v3413_v10 = vadd.f32 %v3412_v27, %v3411_v41  ;;  %v1124_v37 = vadd.f32 %v1123_v16, %v4958_v2 }
 0x226   :  { %v3414_v63 = vpop.f32.mrf.mxu1 }
 0x227   :  { %v4962_v59 = vadd.f32 %v3413_v10, %v4908_v56 }
 0x228   :  { %v3415_v25 = vpop.f32.mrf.mxu1 }
 0x229   :  { %v3416_v60 = vadd.f32 %v3415_v25, %v3414_v63  ;;  %v1125_v50 = vadd.f32 %v1124_v37, %v4962_v59 }
 0x22a   :  { %v3417_v23 = vpop.f32.mrf.mxu1 }
 0x22b   :  { %v4966_v31 = vadd.f32 %v3416_v60, %v4908_v56 }
 0x22c   :  { %v3418_v15 = vpop.f32.mrf.mxu1 }
 0x22d   :  { %v3419_v44 = vadd.f32 %v3418_v15, %v3417_v23  ;;  %v1126_v43 = vadd.f32 %v1125_v50, %v4966_v31 }
 0x22e   :  { %v3420_v19 = vpop.f32.mrf.mxu1 }
 0x22f   :  { %v4970_v55 = vadd.f32 %v3419_v44, %v4908_v56 }
 0x230   :  { %v3421_v11 = vpop.f32.mrf.mxu1 }
 0x231   :  { %v3422_v27 = vadd.f32 %v3421_v11, %v3420_v19  ;;  %v1127_v16 = vadd.f32 %v1126_v43, %v4970_v55 }
 0x232   :  { %v3423_v35 = vpop.f32.mrf.mxu1 }
 0x233   :  { %v4974_v10 = vadd.f32 %v3422_v27, %v4908_v56 }
 0x234   :  { %v3424_v21 = vpop.f32.mrf.mxu1 }
 0x235   :  { %v3425_v25 = vadd.f32 %v3424_v21, %v3423_v35  ;;  %v1128_v37 = vadd.f32 %v1127_v16, %v4974_v10 }
 0x236   :  { %v3426_v36 = vpop.f32.mrf.mxu1 }
 0x237   :  { %v4978_v60 = vadd.f32 %v3425_v25, %v4908_v56 }
 0x238   :  { %v3427_v45 = vpop.f32.mrf.mxu1 }
 0x239   :  { %v3428_v15 = vadd.f32 %v3427_v45, %v3426_v36  ;;  %v1129_v50 = vadd.f32 %v1128_v37, %v4978_v60 }
 0x23a   :  { %v3429_v30 = vpop.f32.mrf.mxu1 }
 0x23b   :  { %v4982_v44 = vadd.f32 %v3428_v15, %v4908_v56 }
 0x23c   :  { %v3430_v38 = vpop.f32.mrf.mxu1 }
 0x23d   :  { %v3431_v11 = vadd.f32 %v3430_v38, %v3429_v30  ;;  %v1130_v43 = vadd.f32 %v1129_v50, %v4982_v44 }
 0x23e   :  { %v3432_v53 = vpop.f32.mrf.mxu1 }
 0x23f   :  { %v4986_v27 = vadd.f32 %v3431_v11, %v4908_v56 }
 0x240   :  { %v3433_v4 = vpop.f32.mrf.mxu1 }
 0x241   :  { %v3434_v21 = vadd.f32 %v3433_v4, %v3432_v53  ;;  %v1131_v16 = vadd.f32 %v1130_v43, %v4986_v27 }
 0x242   :  { %v3435_v40 = vpop.f32.mrf.mxu1 }
 0x243   :  { %v4990_v25 = vadd.f32 %v3434_v21, %v4908_v56 }
 0x244   :  { %v3436_v5 = vpop.f32.mrf.mxu1 }
 0x245   :  { %v3437_v45 = vadd.f32 %v3436_v5, %v3435_v40  ;;  %v1132_v11 = vadd.f32 %v1131_v16, %v4990_v25 }
 0x246   :  { %v3438_v52 = vpop.f32.mrf.mxu1 }
 0x247   :  { %v4994_v15 = vadd.f32 %v3437_v45, %v4908_v56 }
 0x248   :  { %v3439_v34 = vpop.f32.mrf.mxu1 }
 0x249   :  { %v3440_v38 = vadd.f32 %v3439_v34, %v3438_v52  ;;  %v1133_v21 = vadd.f32 %v1132_v11, %v4994_v15 }
 0x24a   :  { %v3441_v28 = vpop.f32.mrf.mxu1 }
 0x24b   :  { %v4998_v40 = vadd.f32 %v3440_v38, %v4908_v56 }
 0x24c   :  { %v3442_v0 = vpop.f32.mrf.mxu1 }
 0x24d   :  { %v3443_v53 = vadd.f32 %v3442_v0, %v3441_v28  ;;  %v1134_v0 = vadd.f32 %v1133_v21, %v4998_v40 }
 0x24e   :  { %v3444_v41 = vpop.f32.mrf.mxu1 }
 0x24f   :  { %v5002_v52 = vadd.f32 %v3443_v53, %v4908_v56 }
 0x250   :  { %v3445_v63 = vpop.f32.mrf.mxu1 }
 0x251   :  { %v3446_v5 = vadd.f32 %v3445_v63, %v3444_v41 }
 0x252   :  { %v3447_v23 = vpop.f32.mrf.mxu1 }
 0x254   :  { %v3448_v19 = vpop.f32.mrf.mxu1 }
 0x255   :  { %v3449_v4 = vadd.f32 %v3448_v19, %v3447_v23  ;;  %v5009_v23 = vadd.f32 %v3446_v5, %v4908_v56 }
 0x256   :  { %v3450_v35 = vpop.f32.mrf.mxu1 }
 0x257   :  { %v5005_v34 = vadd.f32 %v3449_v4, %v4908_v56 }
 0x258   :  { %v3451_v36 = vpop.f32.mrf.mxu1 }
 0x259   :  { %v3452_v50 = vadd.f32 %v3451_v36, %v3450_v35  ;;  %v1135_v35 = vadd.f32 %v1134_v0, %v5002_v52  ;;  %v1106_v36 = vmul.f32 0.0, %v5005_v34 }
 0x25a   :  { %v3453_v30 = vpop.f32.mrf.mxu1 }
 0x25b   :  { %v5012_v19 = vadd.f32 %v3452_v50, %v4908_v56 }
 0x25c   :  { %v3454_v37 = vpop.f32.mrf.mxu1 }
 0x25d   :  { %v3455_v45 = vadd.f32 %v3454_v37, %v3453_v30  ;;  %v1136_v30 = vadd.f32 %v1135_v35, %v5009_v23  ;;  %v1107_v16 = vmul.f32 0.0, %v5012_v19 }
 0x25e   :  { %v3456_v26 = vpop.f32.mrf.mxu1 }
 0x25f   :  { %v5017_v43 = vadd.f32 %v3455_v45, %v4908_v56  ;;  %v1137_v11 = vadd.f32 %v1136_v30, %v1106_v36 }
 0x260   :  { %v3457_v28 = vpop.f32.mrf.mxu1 }
 0x261   :  { %v3458_v41 = vadd.f32 %v3457_v28, %v3456_v26  ;;  %v1108_v26 = vmul.f32 0.0, %v5017_v43  ;;  %v1138_v21 = vadd.f32 %v1137_v11, %v1107_v16 }
 0x262   :  { %v3459_v63 = vpop.f32.mrf.mxu1 }
 0x263   :  { %v5022_v53 = vadd.f32 %v3458_v41, %v4908_v56  ;;  %v1139_v35 = vadd.f32 %v1138_v21, %v1108_v26 }
 0x264   :  { %v3460_v38 = vpop.f32.mrf.mxu1 }
 0x265   :  { %v3461_v4 = vadd.f32 %v3460_v38, %v3459_v63  ;;  %v1109_v45 = vmul.f32 0.0, %v5022_v53 }
 0x266   :  { %v3462_v37 = vpop.f32.mrf.mxu1 }
 0x267   :  { %v5026_v5 = vadd.f32 %v3461_v4, %v4908_v56  ;;  %v1140_v38 = vadd.f32 %v1139_v35, %v1109_v45 }
 0x268   :  { %v3463_v50 = vpop.f32.mrf.mxu1 }
 0x269   :  { %v3464_v28 = vadd.f32 %v3463_v50, %v3462_v37  ;;  %v1110_v33 = vmul.f32 0.0, %v5026_v5 }
 0x26a   :  { %v3465_v0 = vpop.f32.mrf.mxu1 }
 0x26b   :  { %v5031_v41 = vadd.f32 %v3464_v28, %v4908_v56  ;;  %v1141_v46 = vadd.f32 %v1140_v38, %v1110_v33 }
 0x26c   :  { %v3466_v63 = vpop.f32.mrf.mxu1 }
 0x26d   :  { %v1111_v36 = vmul.f32 0.0, %v5031_v41  ;;  %v3467_v30 = vadd.f32 %v3466_v63, %v3465_v0 }
 0x26f   :  { %v5035_v4 = vadd.f32 %v3467_v30, %v4908_v56  ;;  %v1142_v16 = vadd.f32 %v1141_v46, %v1111_v36 }
 0x271   :  { %v1112_v11 = vmul.f32 0.0, %v5035_v4 }
 0x273   :  { %v1143_v37 = vadd.f32 %v1142_v16, %v1112_v11 }
 0x275   :  { %v1144_v50 = vrot.slane %v1143_v37, 4 }
 0x277   :  { %v1145_v26 = vadd.f32 %v1144_v50, %v1143_v37 }
 0x279   :  { %v1146_v21 = vrot.slane %v1145_v26, 2 }
 0x27b   :  { %v1147_v47 = vadd.f32 %v1146_v21, %v1145_v26 }
 0x27d   :  { %v1148_v39 = vrot.slane %v1147_v47, 1 }
 0x27f   :  { %v1149_v28 = vadd.f32 %v1148_v39, %v1147_v47 }
 0x281   :  { %v5038_v32 = vmul.f32 0.005, %v1149_v28 }
 0x283   :  { %v5042_v45 = vsub.f32 %v4914_v18, %v5038_v32  ;;  %v5046_v33 = vsub.f32 %v4911_v49, %v5038_v32  ;;  %v5050_v46 = vsub.f32 %v4917_v57, %v5038_v32  ;;  %v5058_v47 = vsub.f32 %v4922_v1, %v5038_v32 }
 0x284   :  { %v5062_v18 = vsub.f32 %v4926_v42, %v5038_v32  ;;  %v5068_v57 = vsub.f32 %v4930_v58, %v5038_v32  ;;  %v5074_v1 = vsub.f32 %v4934_v48, %v5038_v32  ;;  %v5080_v36 = vsub.f32 %v4938_v61, %v5038_v32 }
 0x285   :  { %v1215_v56 = vmul.f32 %v5042_v45, %v5042_v45  ;;  %v1216_v39 = vmul.f32 %v5046_v33, %v5046_v33  ;;  %v1217_v49 = vmul.f32 %v5050_v46, %v5050_v46  ;;  %v1218_v35 = vmul.f32 %v5058_v47, %v5058_v47 }
 0x286   :  { %v1219_v42 = vmul.f32 %v5062_v18, %v5062_v18  ;;  %v1220_v58 = vmul.f32 %v5068_v57, %v5068_v57  ;;  %v5086_v16 = vsub.f32 %v4942_v54, %v5038_v32  ;;  %v1221_v48 = vmul.f32 %v5074_v1, %v5074_v1 }
 0x287   :  { %v1247_v0 = vadd.f32 %v1216_v39, %v1215_v56  ;;  %v5092_v37 = vsub.f32 %v4946_v9, %v5038_v32  ;;  %v1222_v61 = vmul.f32 %v5080_v36, %v5080_v36  ;;  %v5098_v26 = vsub.f32 %v4950_v22, %v5038_v32 }
 0x288   :  { %v1223_v54 = vmul.f32 %v5086_v16, %v5086_v16  ;;  %v5104_v28 = vsub.f32 %v4954_v6, %v5038_v32  ;;  %v5110_v39 = vsub.f32 %v4958_v2, %v5038_v32 }
 0x289   :  { %v1248_v63 = vadd.f32 %v1247_v0, %v1217_v49  ;;  %v1224_v9 = vmul.f32 %v5092_v37, %v5092_v37  ;;  %v1225_v22 = vmul.f32 %v5098_v26, %v5098_v26  ;;  %v5116_v0 = vsub.f32 %v4962_v59, %v5038_v32 }
 0x28a   :  { %v1226_v6 = vmul.f32 %v5104_v28, %v5104_v28  ;;  %v1227_v2 = vmul.f32 %v5110_v39, %v5110_v39 }
 0x28b   :  { %v1249_v38 = vadd.f32 %v1248_v63, %v1218_v35  ;;  %v5122_v63 = vsub.f32 %v4966_v31, %v5038_v32  ;;  %v1228_v59 = vmul.f32 %v5116_v0, %v5116_v0 }
 0x28d   :  { %v1250_v30 = vadd.f32 %v1249_v38, %v1219_v42  ;;  %v5128_v38 = vsub.f32 %v4970_v55, %v5038_v32  ;;  %v1229_v31 = vmul.f32 %v5122_v63, %v5122_v63 }
 0x28f   :  { %v1251_v11 = vadd.f32 %v1250_v30, %v1220_v58  ;;  %v5134_v30 = vsub.f32 %v4974_v10, %v5038_v32  ;;  %v1230_v55 = vmul.f32 %v5128_v38, %v5128_v38 }
 0x291   :  { %v1252_v50 = vadd.f32 %v1251_v11, %v1221_v48  ;;  %v5140_v11 = vsub.f32 %v4978_v60, %v5038_v32  ;;  %v1231_v10 = vmul.f32 %v5134_v30, %v5134_v30 }
 0x293   :  { %v1253_v21 = vadd.f32 %v1252_v50, %v1222_v61  ;;  %v5146_v50 = vsub.f32 %v4982_v44, %v5038_v32  ;;  %v1232_v60 = vmul.f32 %v5140_v11, %v5140_v11 }
 0x295   :  { %v1254_v56 = vadd.f32 %v1253_v21, %v1223_v54  ;;  %v5152_v21 = vsub.f32 %v4986_v27, %v5038_v32  ;;  %v1233_v44 = vmul.f32 %v5146_v50, %v5146_v50 }
 0x297   :  { %v1255_v49 = vadd.f32 %v1254_v56, %v1224_v9  ;;  %v5158_v56 = vsub.f32 %v4990_v25, %v5038_v32  ;;  %v1234_v27 = vmul.f32 %v5152_v21, %v5152_v21 }
 0x299   :  { %v1256_v35 = vadd.f32 %v1255_v49, %v1225_v22  ;;  %v5164_v49 = vsub.f32 %v4994_v15, %v5038_v32  ;;  %v1235_v25 = vmul.f32 %v5158_v56, %v5158_v56  ;;  %v1176_v15 = vsub.f32 %v5005_v34, %v5038_v32 }
 0x29b   :  { %v1257_v42 = vadd.f32 %v1256_v35, %v1226_v6  ;;  %v5170_v35 = vsub.f32 %v4998_v40, %v5038_v32  ;;  %v1177_v40 = vsub.f32 %v5012_v19, %v5038_v32  ;;  %v1180_v19 = vsub.f32 %v5026_v5, %v5038_v32 }
 0x29d   :  { %v1258_v58 = vadd.f32 %v1257_v42, %v1227_v2  ;;  %v5176_v42 = vsub.f32 %v5002_v52, %v5038_v32  ;;  %v1178_v52 = vsub.f32 %v5017_v43, %v5038_v32  ;;  %v1181_v43 = vsub.f32 %v5031_v41, %v5038_v32 }
 0x29f   :  { %v1259_v48 = vadd.f32 %v1258_v58, %v1228_v59  ;;  %v1236_v59 = vmul.f32 %v5164_v49, %v5164_v49  ;;  %v1238_v34 = vmul.f32 %v5176_v42, %v5176_v42 }
 0x2a1   :  { %v1260_v61 = vadd.f32 %v1259_v48, %v1229_v31  ;;  %v1175_v31 = vsub.f32 %v5009_v23, %v5038_v32  ;;  %v1237_v48 = vmul.f32 %v5170_v35, %v5170_v35 }
 0x2a3   :  { %v1261_v54 = vadd.f32 %v1260_v61, %v1230_v55  ;;  %v1208_v61 = vmul.f32 0.0, %v1176_v15  ;;  %v1239_v23 = vmul.f32 %v1175_v31, %v1175_v31 }
 0x2a5   :  { %v1262_v9 = vadd.f32 %v1261_v54, %v1231_v10  ;;  %v1179_v54 = vsub.f32 %v5022_v53, %v5038_v32 }
 0x2a7   :  { %v1263_v22 = vadd.f32 %v1262_v9, %v1232_v60  ;;  %v1209_v60 = vmul.f32 0.0, %v1177_v40 }
 0x2a9   :  { %v1264_v6 = vadd.f32 %v1263_v22, %v1233_v44  ;;  %v1210_v44 = vmul.f32 0.0, %v1178_v52  ;;  %v1240_v22 = vmul.f32 %v1208_v61, %v1208_v61 }
 0x2ab   :  { %v1265_v2 = vadd.f32 %v1264_v6, %v1234_v27  ;;  %v1211_v6 = vmul.f32 0.0, %v1179_v54  ;;  %v1242_v53 = vmul.f32 %v1210_v44, %v1210_v44 }
 0x2ad   :  { %v1266_v58 = vadd.f32 %v1265_v2, %v1235_v25  ;;  %v1241_v25 = vmul.f32 %v1209_v60, %v1209_v60 }
 0x2af   :  { %v1267_v55 = vadd.f32 %v1266_v58, %v1236_v59  ;;  %v1182_v59 = vsub.f32 %v5035_v4, %v5038_v32  ;;  %v1212_v58 = vmul.f32 0.0, %v1180_v19 }
 0x2b1   :  { %v1268_v10 = vadd.f32 %v1267_v55, %v1237_v48  ;;  %v1213_v55 = vmul.f32 0.0, %v1181_v43  ;;  %v1214_v13 = vmul.f32 0.0, %v1182_v59  ;;  %v1244_v5 = vmul.f32 %v1212_v58, %v1212_v58 }
 0x2b3   :  { %v1269_v9 = vadd.f32 %v1268_v10, %v1238_v34  ;;  %v1243_v34 = vmul.f32 %v1211_v6, %v1211_v6  ;;  %v1245_v61 = vmul.f32 %v1213_v55, %v1213_v55 }
 0x2b5   :  { %v1270_v27 = vadd.f32 %v1269_v9, %v1239_v23  ;;  %v1246_v9 = vmul.f32 %v1214_v13, %v1214_v13 }
 0x2b7   :  { %v1271_v2 = vadd.f32 %v1270_v27, %v1240_v22 }
 0x2b9   :  { %v1272_v48 = vadd.f32 %v1271_v2, %v1241_v25  ;;  %v6525_v25 = vlaneseq }
 0x2bb   :  { %v1273_v10 = vadd.f32 %v1272_v48, %v1242_v53  ;;  %v5201_v6 = vshrl.u32 %v6525_v25, 7 }
 0x2bd   :  { %v1274_v14 = vadd.f32 %v1273_v10, %v1243_v34  ;;  %v6526_v13 = vsub.s32 0, %v5201_v6 }
 0x2bf   :  { %v1275_v23 = vadd.f32 %v1274_v14, %v1244_v5  ;;  %v1287_v14 = vld [vmem:[%s6389_s4] sm:$0x1] }
 0x2c0   :  { %v5224_v5 = vld [vmem:[%s6390_s5] ss:$0 sm:$0xff] }
 0x2c1   :  { %v1276_v3 = vadd.f32 %v1275_v23, %v1245_v61 }
 0x2c3   :  { %v1277_v41 = vadd.f32 %v1276_v3, %v1246_v9 }
 0x2c5   :  { %v1278_v24 = vrot.slane %v1277_v41, 4 }
 0x2c7   :  { %v1279_v60 = vadd.f32 %v1278_v24, %v1277_v41 }
 0x2c9   :  { %v1280_v22 = vrot.slane %v1279_v60, 2 }
 0x2cb   :  { %v1281_v27 = vadd.f32 %v1280_v22, %v1279_v60 }
 0x2cd   :  { %v1282_v8 = vrot.slane %v1281_v27, 1 }
 0x2cf   :  { %v1283_v32 = vadd.f32 %v1282_v8, %v1281_v27 }
 0x2d1   :  { %v1284_v4 = vmul.f32 0.005, %v1283_v32 }
 0x2d3   :  { %v1285_v44 = vadd.f32 1e-05, %v1284_v4 }
 0x2d5   :  { %4040 = vrsqrt.f32 %v1285_v44 }
 0x2e2   :  { %v4041_v3 = vpop.eup %4040 }
 0x2e3   :  { %v1288_v2 = vmul.f32 %v4041_v3, %v1287_v14 }
 0x2e5   :  { %v5209_v24 = vrot.slane %v1288_v2, %v6526_v13 }
 0x2e7   :  { %v1324_v8 = vmul.f32 %v5209_v24, %v1182_v59  ;;  %v1305_v58 = vmul.f32 %v5209_v24, %v5110_v39  ;;  %v1307_v53 = vmul.f32 %v5209_v24, %v5122_v63  ;;  %v1308_v48 = vmul.f32 %v5209_v24, %v5128_v38 }
 0x2e8   :  { %v1317_v55 = vmul.f32 %v5209_v24, %v1175_v31  ;;  %v1318_v34 = vmul.f32 %v5209_v24, %v1176_v15  ;;  %v1319_v10 = vmul.f32 %v5209_v24, %v1177_v40  ;;  %v1320_v59 = vmul.f32 %v5209_v24, %v1178_v52 }
 0x2e9   :  { %v1321_v39 = vmul.f32 %v5209_v24, %v1179_v54  ;;  %v1322_v63 = vmul.f32 %v5209_v24, %v1180_v19  ;;  %v1323_v61 = vmul.f32 %v5209_v24, %v1181_v43  ;;  %v1303_v38 = vmul.f32 %v5209_v24, %v5098_v26 }
 0x2ea   :  { %v1304_v15 = vmul.f32 %v5209_v24, %v5104_v28  ;;  %v1306_v31 = vmul.f32 %v5209_v24, %v5116_v0  ;;  %v1293_v40 = vmul.f32 %v5209_v24, %v5042_v45  ;;  %v1294_v52 = vmul.f32 %v5209_v24, %v5046_v33 }
 0x2eb   :  { %v1299_v54 = vmul.f32 %v5209_v24, %v5074_v1  ;;  %v1344_v19 = vadd.f32 %v5224_v5, %v1305_v58  ;;  %v1346_v43 = vadd.f32 %v5224_v5, %v1307_v53  ;;  %v1347_v26 = vadd.f32 %v5224_v5, %v1308_v48 }
 0x2ec   :  { %v1362_v28 = vadd.f32 %v5224_v5, %v1323_v61  ;;  %v1363_v23 = vadd.f32 %v5224_v5, %v1324_v8  ;;  %v1301_v0 = vmul.f32 %v5209_v24, %v5086_v16  ;;  %v1302_v45 = vmul.f32 %v5209_v24, %v5092_v37 }
 0x2ed   :  { %v1315_v33 = vmul.f32 %v5209_v24, %v5170_v35  ;;  %v1342_v1 = vadd.f32 %v5224_v5, %v1303_v38  ;;  %v1343_v9 = vadd.f32 %v5224_v5, %v1304_v15  ;;  %v1345_v41 = vadd.f32 %v5224_v5, %v1306_v31 }
 0x2ee   :  { %v1378_v60 = vmax.f32 %v1346_v43, 0.0  ;;  %v1394_v22 = vmax.f32 %v1362_v28, 0.0  ;;  %v1395_v27 = vmax.f32 %v1363_v23, 0.0  ;;  %v1332_v32 = vadd.f32 %v5224_v5, %v1293_v40 }
 0x2ef   :  { %v1333_v4 = vadd.f32 %v5224_v5, %v1294_v52  ;;  %v1379_v16 = vmax.f32 %v1347_v26, 0.0  ;;  %v1376_v44 = vmax.f32 %v1344_v19, 0.0  ;;  %v1360_v37 = vadd.f32 %v5224_v5, %v1321_v39 }
 0x2f0   :  { %v1361_v14 = vadd.f32 %v5224_v5, %v1322_v63  ;;  %v1358_v35 = vadd.f32 %v5224_v5, %v1319_v10  ;;  %v5261_v3 = vpack.c.bf16 %v1395_v27, %v1394_v22  ;;  %v1364_v2 = vmax.f32 %v1332_v32, 0.0 }
 0x2f1   :  { %v1365_v8 = vmax.f32 %v1333_v4, 0.0  ;;  %v5263_v58 = vpack.c.bf16 %v1379_v16, %v1378_v60  ;;  %v1392_v53 = vmax.f32 %v1360_v37, 0.0  ;;  %v1377_v61 = vmax.f32 %v1345_v41, 0.0 }
 0x2f2   :  { %v1393_v48 = vmax.f32 %v1361_v14, 0.0  ;;  %v1359_v38 = vadd.f32 %v5224_v5, %v1320_v59  ;;  %v1316_v15 = vmul.f32 %v5209_v24, %v5176_v42  ;;  %3468 = vmatprep.subr.bf16.mxu0 %v5261_v3  ;;  %v1390_v63 = vmax.f32 %v1358_v35, 0.0 }
 0x2f3   :  { %v5269_v39 = vpack.c.bf16 %v1365_v8, %v1364_v2  ;;  %v1356_v10 = vadd.f32 %v5224_v5, %v1317_v55  ;;  %v1300_v31 = vmul.f32 %v5209_v24, %v5080_v36  ;;  %3469 = vmatpush3.bf16.msra.mxu0 %v5263_v58  ;;  %v1357_v59 = vadd.f32 %v5224_v5, %v1318_v34 }
 0x2f4   :  { %v5275_v40 = vpack.c.bf16 %v1393_v48, %v1392_v53  ;;  %v1391_v52 = vmax.f32 %v1359_v38, 0.0  ;;  %v1340_v19 = vadd.f32 %v5224_v5, %v1301_v0  ;;  %v1341_v42 = vadd.f32 %v5224_v5, %v1302_v45 }
 0x2f5   :  { %v1374_v43 = vmax.f32 %v1342_v1, 0.0  ;;  %1788 = vmatprep.mubr.bf16.mxu1 %v5269_v39  ;;  %v1388_v26 = vmax.f32 %v1356_v10, 0.0  ;;  %v5282_v55 = vpack.c.bf16 %v1377_v61, %v1376_v44  ;;  %v1375_v28 = vmax.f32 %v1343_v9, 0.0 }
 0x2f6   :  { %3470 = vmatprep.subr.bf16.mxu0 %v5275_v40  ;;  %v5284_v36 = vpack.c.bf16 %v1391_v52, %v1390_v63  ;;  %v1389_v23 = vmax.f32 %v1357_v59, 0.0  ;;  %v1313_v41 = vmul.f32 %v5209_v24, %v5158_v56  ;;  %v1314_v34 = vmul.f32 %v5209_v24, %v5164_v49 }
 0x2f7   :  { %v1354_v0 = vadd.f32 %v5224_v5, %v1315_v33  ;;  %v1355_v45 = vadd.f32 %v5224_v5, %v1316_v15  ;;  %v1297_v1 = vmul.f32 %v5209_v24, %v5062_v18  ;;  %3471 = vmatpush3.bf16.msra.mxu0 %v5282_v55  ;;  %v1298_v9 = vmul.f32 %v5209_v24, %v5068_v57 }
 0x2f8   :  { %v5295_v60 = vpack.c.bf16 %v1389_v23, %v1388_v26  ;;  %v1311_v56 = vmul.f32 %v5209_v24, %v5146_v50  ;;  %v1312_v49 = vmul.f32 %v5209_v24, %v5152_v21  ;;  %v1338_v33 = vadd.f32 %v5224_v5, %v1299_v54  ;;  %3472 = vmatprep.subr.bf16.mxu0 %v5284_v36 }
 0x2f9   :  { %v1339_v22 = vadd.f32 %v5224_v5, %v1300_v31  ;;  %v1372_v18 = vmax.f32 %v1340_v19, 0.0  ;;  %v5306_v27 = vpack.c.bf16 %v1375_v28, %v1374_v43  ;;  %v1373_v32 = vmax.f32 %v1341_v42, 0.0 }
 0x2fa   :  { %v1386_v4 = vmax.f32 %v1354_v0, 0.0  ;;  %v1387_v16 = vmax.f32 %v1355_v45, 0.0  ;;  %v1352_v57 = vadd.f32 %v5224_v5, %v1313_v41  ;;  %v1353_v44 = vadd.f32 %v5224_v5, %v1314_v34  ;;  %v3945_v45 = vld [vmem:[#allocation8 + $0x38] sm:$0xff]  }
 0x2fb   :  { %v1295_v50 = vmul.f32 %v5209_v24, %v5050_v46  ;;  %v1296_v21 = vmul.f32 %v5209_v24, %v5058_v47  ;;  %3473 = vmatpush3.bf16.msra.mxu0 %v5306_v27  ;;  %v1309_v54 = vmul.f32 %v5209_v24, %v5134_v30  ;;  %v1310_v37 = vmul.f32 %v5209_v24, %v5140_v11 }
 0x2fc   :  { %v1336_v14 = vadd.f32 %v5224_v5, %v1297_v1  ;;  %v1337_v35 = vadd.f32 %v5224_v5, %v1298_v9  ;;  %3474 = vmatprep.subr.bf16.mxu0 %v5295_v60  ;;  %v1370_v2 = vmax.f32 %v1338_v33, 0.0  ;;  %v5322_v8 = vpack.c.bf16 %v1373_v32, %v1372_v18  ;;  %v3946_v1 = vld [vmem:[#allocation8 + $0x70] sm:$0xff]   ;;  %v6629_v33 = vld [vmem:[#allocation37_spill] sm:$0xff]  ;;  %v6630_v18 = vld [vmem:[#allocation39_spill] sm:$0xff] }
 0x2fd   :  { %v1371_v46 = vmax.f32 %v1339_v22, 0.0  ;;  %v1350_v47 = vadd.f32 %v5224_v5, %v1311_v56  ;;  %v5325_v53 = vpack.c.bf16 %v1387_v16, %v1386_v4  ;;  %v1384_v48 = vmax.f32 %v1352_v57, 0.0  ;;  %v3947_v9 = vld [vmem:[#allocation8 + $0x30] sm:$0xff]   ;;  %v3948_v56 = vld [vmem:[#allocation8 + $0x68] sm:$0xff]   ;;  %v3950_v22 = vld [vmem:[#allocation8 + $0x60] sm:$0xff]  }
 0x2fe   :  { %v1385_v61 = vmax.f32 %v1353_v44, 0.0  ;;  %v1351_v30 = vadd.f32 %v5224_v5, %v1312_v49  ;;  %v1334_v11 = vadd.f32 %v5224_v5, %v1295_v50  ;;  %v1335_v24 = vadd.f32 %v5224_v5, %v1296_v21  ;;  %v3949_v49 = vld [vmem:[#allocation8 + $0x28] sm:$0xff]   ;;  %v3951_v32 = vld [vmem:[#allocation8 + $0x20] sm:$0xff]   ;;  %v3952_v4 = vld [vmem:[#allocation8 + $0x58] sm:$0xff]  }
 0x2ff   :  { %3475 = vmatpush3.bf16.msra.mxu0 %v5322_v8  ;;  %v1368_v38 = vmax.f32 %v1336_v14, 0.0  ;;  %v5332_v15 = vpack.c.bf16 %v1371_v46, %v1370_v2  ;;  %v1369_v63 = vmax.f32 %v1337_v35, 0.0  ;;  %v1382_v10 = vmax.f32 %v1350_v47, 0.0  ;;  %v3953_v16 = vld [vmem:[#allocation8 + $0x18] sm:$0xff]   ;;  %v6631_v57 = vld [vmem:[#allocation42_spill] sm:$0xff]  ;;  %v6635_v21 = vld [vmem:[#allocation52_spill] sm:$0xff] }
 0x300   :  { %3476 = vmatprep.subr.bf16.mxu0 %v5325_v53  ;;  %v5334_v31 = vpack.c.bf16 %v1385_v61, %v1384_v48  ;;  %v1383_v52 = vmax.f32 %v1351_v30, 0.0  ;;  %v1348_v59 = vadd.f32 %v5224_v5, %v1309_v54  ;;  %v1349_v19 = vadd.f32 %v5224_v5, %v1310_v37  ;;  %v3944_v5 = vld [vmem:[#allocation8 + $0x78] sm:$0xff]   ;;  %v6636_v54 = vld [vmem:[#allocation53_spill] sm:$0xff]  ;;  %v6637_v37 = vld [vmem:[#allocation54_spill] sm:$0xff] }
 0x301   :  { %v1366_v42 = vmax.f32 %v1334_v11, 0.0  ;;  %v5340_v43 = vpack.c.bf16 %v1369_v63, %v1368_v38  ;;  %v1367_v26 = vmax.f32 %v1335_v24, 0.0  ;;  %3580 = vmatprep.subr.bf16.mxu1 %v3944_v5  ;;  %v6632_v44 = vld [vmem:[#allocation43_spill] sm:$0xff]  ;;  %v3954_v35 = vld [vmem:[#allocation8 + $0x50] sm:$0xff]   ;;  %v6639_v2 = vld [vmem:[#allocation56_spill] sm:$0xff] }
 0x302   :  { %v5342_v28 = vpack.c.bf16 %v1383_v52, %v1382_v10  ;;  %v1380_v23 = vmax.f32 %v1348_v59, 0.0  ;;  %v1381_v41 = vmax.f32 %v1349_v19, 0.0  ;;  %3581 = vmatpush3.bf16.msra.mxu1 %v3945_v45  ;;  %v6634_v50 = vld [vmem:[#allocation51_spill] sm:$0xff]  ;;  %v3955_v46 = vld [vmem:[#allocation8 + $0x10] sm:$0xff]   ;;  %v3956_v47 = vld [vmem:[#allocation8 + $0x48] sm:$0xff]  }
 0x303   :  { %3477 = vmatpush3.bf16.msra.mxu0 %v5332_v15  ;;  %v5346_v34 = vpack.c.bf16 %v1367_v26, %v1366_v42  ;;  %3582 = vmatprep.subr.bf16.mxu1 %v3946_v1  ;;  %v6638_v14 = vld [vmem:[#allocation55_spill] sm:$0xff]  ;;  %v6640_v48 = vld [vmem:[#allocation57_spill] sm:$0xff]  ;;  %v6641_v61 = vld [vmem:[#allocation58_spill] sm:$0xff] }
 0x304   :  { %3478 = vmatprep.subr.bf16.mxu0 %v5334_v31  ;;  %v5348_v0 = vpack.c.bf16 %v1381_v41, %v1380_v23  ;;  %v3957_v30 = vld [vmem:[#allocation8 + $0x8] sm:$0xff]   ;;  %v3958_v11 = vld [vmem:[#allocation8 + $0x40] sm:$0xff]   ;;  %v6642_v38 = vld [vmem:[#allocation59_spill] sm:$0xff] }
 0x305   :  { %v3959_v24 = vld [vmem:[#allocation8] sm:$0xff]   ;;  %v6645_v52 = vld [vmem:[#allocation61_spill] sm:$0xff]  ;;  %v6647_v19 = vld [vmem:[#allocation34_spill] sm:$0xff] }
 0x306   :  { %3583 = vmatpush3.bf16.msra.mxu1 %v3947_v9  ;;  %v6643_v63 = vld [vmem:[#allocation60_spill] sm:$0xff]  ;;  %v6646_v59 = vld [vmem:[#allocation33_spill] sm:$0xff]  ;;  %v6648_v42 = vld [vmem:[#allocation35_spill] sm:$0xff] }
 0x307   :  { %3479 = vmatpush3.bf16.msra.mxu0 %v5340_v43  ;;  %3584 = vmatprep.subr.bf16.mxu1 %v3948_v56  ;;  %v6644_v10 = vld [vmem:[#allocation32_spill] sm:$0xff]  ;;  %v6650_v23 = vld [vmem:[#allocation38_spill] sm:$0xff]  ;;  %v6652_v5 = vld [vmem:[#allocation41_spill] sm:$0xff] }
 0x308   :  { %3480 = vmatprep.subr.bf16.mxu0 %v5342_v28  ;;  %v6649_v26 = vld [vmem:[#allocation36_spill] sm:$0xff] }
 0x309   :  { %v6651_v41 = vld [vmem:[#allocation40_spill] sm:$0xff] }
 0x30a   :  { %3585 = vmatpush3.bf16.msra.mxu1 %v3949_v49  ;;  %v6653_v45 = vld [vmem:[#allocation24_spill] sm:$0xff] }
 0x30b   :  { %3481 = vmatpush3.bf16.msra.mxu0 %v5346_v34  ;;  %3586 = vmatprep.subr.bf16.mxu1 %v3950_v22 }
 0x30c   :  { %3482 = vmatprep.subr.bf16.mxu0 %v5348_v0 }
 0x30e   :  { %3587 = vmatpush3.bf16.msra.mxu1 %v3951_v32 }
 0x30f   :  { %3483 = vmatpush3.bf16.msra.mxu0 %v5269_v39  ;;  %3588 = vmatprep.subr.bf16.mxu1 %v3952_v4  ;;  %v6633_v39 = vld [vmem:[#allocation44_spill] sm:$0xff] }
 0x312   :  { %1445 = vmatmul.mubr.bf16.vlgmr.msra.gmra.mxu0 %v6629_v33  ;;  %3589 = vmatpush3.bf16.msra.mxu1 %v3953_v16  ;;  %v6654_v16 = vld [vmem:[#allocation62_spill] sm:$0xff] }
 0x313   :  { %1452 = vmatprep.mubr.bf16.mxu0 %v6630_v18  ;;  %3590 = vmatprep.subr.bf16.mxu1 %v3954_v35 }
 0x316   :  { %3591 = vmatpush3.bf16.msra.mxu1 %v3955_v46  ;;  %v6655_v46 = vld [vmem:[#allocation63_spill] sm:$0xff] }
 0x317   :  { %3592 = vmatprep.subr.bf16.mxu1 %v3956_v47 }
 0x31a   :  { %1453 = vmatmul.mubr.bf16.gmra.mxu0 %v6631_v57  ;;  %3593 = vmatpush3.bf16.msra.mxu1 %v3957_v30 }
 0x31b   :  { %1460 = vmatprep.mubr.bf16.mxu0 %v6632_v44  ;;  %3594 = vmatprep.subr.bf16.mxu1 %v3958_v11 }
 0x31e   :  { %3595 = vmatpush3.bf16.msra.mxu1 %v3959_v24 }
 0x322   :  { %1461 = vmatmul.mubr.bf16.gmra.mxu0 %v4654_v62 }
 0x323   :  { %1468 = vmatprep.mubr.bf16.mxu0 %v6633_v39 }
 0x32a   :  { %1469 = vmatmul.mubr.bf16.gmra.mxu0 %v4684_v7 }
 0x32b   :  { %1476 = vmatprep.mubr.bf16.mxu0 %v4692_v51 }
 0x332   :  { %1477 = vmatmul.mubr.bf16.gmra.mxu0 %v4703_v12 }
 0x333   :  { %1484 = vmatprep.mubr.bf16.mxu0 %v4709_v20 }
 0x33a   :  { %1485 = vmatmul.mubr.bf16.gmra.mxu0 %v4721_v17 }
 0x33b   :  { %1492 = vmatprep.mubr.bf16.mxu0 %v4727_v29 }
 0x342   :  { %1493 = vmatmul.mubr.bf16.gmra.mxu0 %v6634_v50 }
 0x343   :  { %1500 = vmatprep.mubr.bf16.mxu0 %v6635_v21 }
 0x34a   :  { %1501 = vmatmul.mubr.bf16.gmra.mxu0 %v6636_v54 }
 0x34b   :  { %1508 = vmatprep.mubr.bf16.mxu0 %v6637_v37 }
 0x352   :  { %1509 = vmatmul.mubr.bf16.gmra.mxu0 %v6638_v14 }
 0x353   :  { %1516 = vmatprep.mubr.bf16.mxu0 %v6639_v2 }
 0x35a   :  { %1517 = vmatmul.mubr.bf16.gmra.mxu0 %v6640_v48 }
 0x35b   :  { %1524 = vmatprep.mubr.bf16.mxu0 %v6641_v61 }
 0x362   :  { %1525 = vmatmul.mubr.bf16.gmra.mxu0 %v6642_v38 }
 0x363   :  { %1532 = vmatprep.mubr.bf16.mxu0 %v6643_v63 }
 0x36a   :  { %1533 = vmatmul.mubr.bf16.gmra.mxu0 %v6644_v10 }
 0x36b   :  { %1540 = vmatprep.mubr.bf16.mxu0 %v6645_v52 }
 0x372   :  { %1541 = vmatmul.mubr.bf16.gmra.mxu0 %v6646_v59 }
 0x373   :  { %1548 = vmatprep.mubr.bf16.mxu0 %v6647_v19 }
 0x37a   :  { %1549 = vmatmul.mubr.bf16.gmra.mxu0 %v6648_v42 }
 0x37b   :  { %1556 = vmatprep.mubr.bf16.mxu0 %v6649_v26 }
 0x382   :  { %1557 = vmatmul.mubr.bf16.gmra.mxu0 %v6650_v23 }
 0x383   :  { %1564 = vmatprep.mubr.bf16.mxu0 %v6651_v41  ;;  %v6656_v41 = vld [vmem:[#allocation64_spill] sm:$0xff] }
 0x38a   :  { %1565 = vmatmul.mubr.bf16.gmra.mxu0 %v6652_v5 }
 0x38b   :  { %2280 = vmatprep.mubr.bf16.mxu0 %v6653_v45 }
 0x3d2   :  { %v3484_v1 = vpop.f32.mrf.mxu0 }
 0x3d4   :  { %v3485_v9 = vpop.f32.mrf.mxu0 }
 0x3d5   :  { %v3486_v49 = vadd.f32 %v3485_v9, %v3484_v1  ;;  %v6657_v1 = vld [vmem:[#allocation65_spill] sm:$0xff] }
 0x3d6   :  { %v3487_v56 = vpop.f32.mrf.mxu0 }
 0x3d7   :  { %v1573_v35 = vmul.f32 %v6654_v16, %v3486_v49  ;;  %v5435_v16 = vld [vmem:[%s6392_s7] ss:$0 sm:$0xff] }
 0x3d8   :  { %v3488_v22 = vpop.f32.mrf.mxu0 }
 0x3d9   :  { %v3489_v32 = vadd.f32 %v3488_v22, %v3487_v56 }
 0x3da   :  { %v3490_v4 = vpop.f32.mrf.mxu0 }
 0x3db   :  { %v1574_v47 = vmul.f32 %v6655_v46, %v3489_v32 }
 0x3dc   :  { %v3491_v30 = vpop.f32.mrf.mxu0 }
 0x3dd   :  { %v1605_v11 = vpack.c.bf16 %v1574_v47, %v1573_v35  ;;  %v3492_v25 = vadd.f32 %v3491_v30, %v3490_v4  ;;  %v6658_v47 = vld [vmem:[#allocation30_spill] sm:$0xff] }
 0x3de   :  { %v3493_v24 = vpop.f32.mrf.mxu0 }
 0x3df   :  { %1789 = vmatmul.mubr.bf16.vlgmr.msra.gmra.mxu1 %v1605_v11  ;;  %v1575_v23 = vmul.f32 %v6656_v41, %v3492_v25  ;;  %v6659_v11 = vld [vmem:[#allocation66_spill] sm:$0xff] }
 0x3e0   :  { %v3494_v13 = vpop.f32.mrf.mxu0  ;;  %1796 = vmatprep.mubr.bf16.mxu1 %v5346_v34 }
 0x3e1   :  { %v3495_v45 = vadd.f32 %v3494_v13, %v3493_v24 }
 0x3e2   :  { %v3496_v5 = vpop.f32.mrf.mxu0 }
 0x3e3   :  { %v1576_v9 = vmul.f32 %v6657_v1, %v3495_v45 }
 0x3e4   :  { %v3497_v56 = vpop.f32.mrf.mxu0 }
 0x3e5   :  { %v1606_v22 = vpack.c.bf16 %v1576_v9, %v1575_v23  ;;  %v3498_v49 = vadd.f32 %v3497_v56, %v3496_v5  ;;  %v6660_v9 = vld [vmem:[#allocation28_spill] sm:$0xff] }
 0x3e6   :  { %v3499_v26 = vpop.f32.mrf.mxu0 }
 0x3e7   :  { %1797 = vmatmul.mubr.bf16.gmra.mxu1 %v1606_v22  ;;  %v1577_v30 = vmul.f32 %v6658_v47, %v3498_v49  ;;  %v6661_v22 = vld [vmem:[#allocation67_spill] sm:$0xff] }
 0x3e8   :  { %v3500_v32 = vpop.f32.mrf.mxu0  ;;  %1804 = vmatprep.mubr.bf16.mxu1 %v5340_v43 }
 0x3e9   :  { %v3501_v35 = vadd.f32 %v3500_v32, %v3499_v26 }
 0x3ea   :  { %v3502_v4 = vpop.f32.mrf.mxu0 }
 0x3eb   :  { %v1578_v34 = vmul.f32 %v6659_v11, %v3501_v35 }
 0x3ec   :  { %v3503_v13 = vpop.f32.mrf.mxu0 }
 0x3ed   :  { %v1607_v24 = vpack.c.bf16 %v1578_v34, %v1577_v30  ;;  %v3504_v25 = vadd.f32 %v3503_v13, %v3502_v4  ;;  %v6662_v34 = vld [vmem:[#allocation26_spill] sm:$0xff] }
 0x3ee   :  { %v3505_v46 = vpop.f32.mrf.mxu0 }
 0x3ef   :  { %1805 = vmatmul.mubr.bf16.gmra.mxu1 %v1607_v24  ;;  %v1579_v56 = vmul.f32 %v6660_v9, %v3504_v25  ;;  %v6663_v24 = vld [vmem:[#allocation68_spill] sm:$0xff] }
 0x3f0   :  { %v3506_v45 = vpop.f32.mrf.mxu0  ;;  %1812 = vmatprep.mubr.bf16.mxu1 %v5332_v15 }
 0x3f1   :  { %v3507_v23 = vadd.f32 %v3506_v45, %v3505_v46 }
 0x3f2   :  { %v3508_v5 = vpop.f32.mrf.mxu0 }
 0x3f3   :  { %v1580_v43 = vmul.f32 %v6661_v22, %v3507_v23 }
 0x3f4   :  { %v3509_v26 = vpop.f32.mrf.mxu0 }
 0x3f5   :  { %v1608_v32 = vpack.c.bf16 %v1580_v43, %v1579_v56  ;;  %v3510_v49 = vadd.f32 %v3509_v26, %v3508_v5  ;;  %v6664_v43 = vld [vmem:[#allocation23_spill] sm:$0xff] }
 0x3f6   :  { %v3511_v1 = vpop.f32.mrf.mxu0 }
 0x3f7   :  { %1813 = vmatmul.mubr.bf16.gmra.mxu1 %v1608_v32  ;;  %v1581_v13 = vmul.f32 %v6662_v34, %v3510_v49  ;;  %v6665_v32 = vld [vmem:[#allocation69_spill] sm:$0xff] }
 0x3f8   :  { %v3512_v35 = vpop.f32.mrf.mxu0  ;;  %1820 = vmatprep.mubr.bf16.mxu1 %v5322_v8 }
 0x3f9   :  { %v3513_v30 = vadd.f32 %v3512_v35, %v3511_v1 }
 0x3fa   :  { %v3514_v4 = vpop.f32.mrf.mxu0 }
 0x3fb   :  { %v1582_v15 = vmul.f32 %v6663_v24, %v3513_v30 }
 0x3fc   :  { %v3515_v46 = vpop.f32.mrf.mxu0 }
 0x3fd   :  { %v1609_v45 = vpack.c.bf16 %v1582_v15, %v1581_v13  ;;  %v3516_v25 = vadd.f32 %v3515_v46, %v3514_v4  ;;  %v6666_v15 = vld [vmem:[#allocation21_spill] sm:$0xff] }
 0x3fe   :  { %v3517_v11 = vpop.f32.mrf.mxu0 }
 0x3ff   :  { %1821 = vmatmul.mubr.bf16.gmra.mxu1 %v1609_v45  ;;  %v1583_v26 = vmul.f32 %v6664_v43, %v3516_v25  ;;  %v6667_v45 = vld [vmem:[#allocation70_spill] sm:$0xff] }
 0x400   :  { %v3518_v23 = vpop.f32.mrf.mxu0  ;;  %1828 = vmatprep.mubr.bf16.mxu1 %v5306_v27 }
 0x401   :  { %v3519_v56 = vadd.f32 %v3518_v23, %v3517_v11 }
 0x402   :  { %v3520_v5 = vpop.f32.mrf.mxu0 }
 0x403   :  { %v1584_v8 = vmul.f32 %v6665_v32, %v3519_v56 }
 0x404   :  { %v3521_v1 = vpop.f32.mrf.mxu0 }
 0x405   :  { %v1610_v35 = vpack.c.bf16 %v1584_v8, %v1583_v26  ;;  %v3522_v49 = vadd.f32 %v3521_v1, %v3520_v5  ;;  %v6668_v8 = vld [vmem:[#allocation19_spill] sm:$0xff] }
 0x406   :  { %v3523_v22 = vpop.f32.mrf.mxu0 }
 0x407   :  { %1829 = vmatmul.mubr.bf16.gmra.mxu1 %v1610_v35  ;;  %v1585_v46 = vmul.f32 %v6666_v15, %v3522_v49  ;;  %v6669_v35 = vld [vmem:[#allocation71_spill] sm:$0xff] }
 0x408   :  { %v3524_v30 = vpop.f32.mrf.mxu0  ;;  %1836 = vmatprep.mubr.bf16.mxu1 %v5282_v55 }
 0x409   :  { %v3525_v13 = vadd.f32 %v3524_v30, %v3523_v22 }
 0x40a   :  { %v3526_v4 = vpop.f32.mrf.mxu0 }
 0x40b   :  { %v1586_v27 = vmul.f32 %v6667_v45, %v3525_v13 }
 0x40c   :  { %v3527_v11 = vpop.f32.mrf.mxu0 }
 0x40d   :  { %v1611_v23 = vpack.c.bf16 %v1586_v27, %v1585_v46  ;;  %v3528_v25 = vadd.f32 %v3527_v11, %v3526_v4  ;;  %v6670_v27 = vld [vmem:[#allocation17_spill] sm:$0xff] }
 0x40e   :  { %v3529_v24 = vpop.f32.mrf.mxu0 }
 0x40f   :  { %1837 = vmatmul.mubr.bf16.gmra.mxu1 %v1611_v23  ;;  %v1587_v1 = vmul.f32 %v6668_v8, %v3528_v25  ;;  %v6671_v23 = vld [vmem:[#allocation72_spill] sm:$0xff] }
 0x410   :  { %v3530_v56 = vpop.f32.mrf.mxu0  ;;  %1844 = vmatprep.mubr.bf16.mxu1 %v5263_v58 }
 0x411   :  { %v3531_v26 = vadd.f32 %v3530_v56, %v3529_v24 }
 0x412   :  { %v3532_v5 = vpop.f32.mrf.mxu0 }
 0x413   :  { %v1588_v55 = vmul.f32 %v6669_v35, %v3531_v26 }
 0x414   :  { %v3533_v22 = vpop.f32.mrf.mxu0 }
 0x415   :  { %v1612_v30 = vpack.c.bf16 %v1588_v55, %v1587_v1  ;;  %v3534_v49 = vadd.f32 %v3533_v22, %v3532_v5  ;;  %v6672_v55 = vld [vmem:[#allocation31_spill] sm:$0xff] }
 0x416   :  { %v3535_v32 = vpop.f32.mrf.mxu0 }
 0x417   :  { %1845 = vmatmul.mubr.bf16.gmra.mxu1 %v1612_v30  ;;  %v1589_v11 = vmul.f32 %v6670_v27, %v3534_v49  ;;  %v6673_v30 = vld [vmem:[#allocation73_spill] sm:$0xff] }
 0x418   :  { %v3536_v13 = vpop.f32.mrf.mxu0  ;;  %1852 = vmatprep.mubr.bf16.mxu1 %v5348_v0 }
 0x419   :  { %v3537_v46 = vadd.f32 %v3536_v13, %v3535_v32 }
 0x41a   :  { %v3538_v4 = vpop.f32.mrf.mxu0 }
 0x41b   :  { %v1590_v58 = vmul.f32 %v6671_v23, %v3537_v46 }
 0x41c   :  { %v3539_v24 = vpop.f32.mrf.mxu0 }
 0x41d   :  { %v1613_v56 = vpack.c.bf16 %v1590_v58, %v1589_v11  ;;  %v3540_v25 = vadd.f32 %v3539_v24, %v3538_v4  ;;  %v6674_v58 = vld [vmem:[#allocation29_spill] sm:$0xff] }
 0x41e   :  { %v3541_v45 = vpop.f32.mrf.mxu0 }
 0x41f   :  { %1853 = vmatmul.mubr.bf16.gmra.mxu1 %v1613_v56  ;;  %v1591_v22 = vmul.f32 %v6672_v55, %v3540_v25  ;;  %v6675_v56 = vld [vmem:[#allocation74_spill] sm:$0xff] }
 0x420   :  { %v3542_v26 = vpop.f32.mrf.mxu0  ;;  %1860 = vmatprep.mubr.bf16.mxu1 %v5342_v28 }
 0x421   :  { %v3543_v1 = vadd.f32 %v3542_v26, %v3541_v45 }
 0x422   :  { %v3544_v5 = vpop.f32.mrf.mxu0 }
 0x423   :  { %v1592_v0 = vmul.f32 %v6673_v30, %v3543_v1 }
 0x424   :  { %v3545_v32 = vpop.f32.mrf.mxu0 }
 0x425   :  { %v1614_v13 = vpack.c.bf16 %v1592_v0, %v1591_v22  ;;  %v3546_v49 = vadd.f32 %v3545_v32, %v3544_v5  ;;  %v6676_v0 = vld [vmem:[#allocation27_spill] sm:$0xff] }
 0x426   :  { %v3547_v35 = vpop.f32.mrf.mxu0 }
 0x427   :  { %1861 = vmatmul.mubr.bf16.gmra.mxu1 %v1614_v13  ;;  %v1593_v24 = vmul.f32 %v6674_v58, %v3546_v49  ;;  %v6677_v13 = vld [vmem:[#allocation75_spill] sm:$0xff] }
 0x428   :  { %v3548_v46 = vpop.f32.mrf.mxu0  ;;  %1868 = vmatprep.mubr.bf16.mxu1 %v5334_v31 }
 0x429   :  { %v3549_v11 = vadd.f32 %v3548_v46, %v3547_v35 }
 0x42a   :  { %v3550_v4 = vpop.f32.mrf.mxu0 }
 0x42b   :  { %v1594_v28 = vmul.f32 %v6675_v56, %v3549_v11 }
 0x42c   :  { %v3551_v45 = vpop.f32.mrf.mxu0 }
 0x42d   :  { %v1615_v26 = vpack.c.bf16 %v1594_v28, %v1593_v24  ;;  %v3552_v25 = vadd.f32 %v3551_v45, %v3550_v4  ;;  %v6678_v28 = vld [vmem:[#allocation25_spill] sm:$0xff] }
 0x42e   :  { %v3553_v23 = vpop.f32.mrf.mxu0 }
 0x42f   :  { %1869 = vmatmul.mubr.bf16.gmra.mxu1 %v1615_v26  ;;  %v1595_v32 = vmul.f32 %v6676_v0, %v3552_v25  ;;  %v6679_v26 = vld [vmem:[#allocation76_spill] sm:$0xff] }
 0x430   :  { %v3554_v1 = vpop.f32.mrf.mxu0  ;;  %1876 = vmatprep.mubr.bf16.mxu1 %v5325_v53 }
 0x431   :  { %v3555_v22 = vadd.f32 %v3554_v1, %v3553_v23 }
 0x432   :  { %v3556_v5 = vpop.f32.mrf.mxu0 }
 0x433   :  { %v1596_v31 = vmul.f32 %v6677_v13, %v3555_v22 }
 0x434   :  { %v3557_v35 = vpop.f32.mrf.mxu0 }
 0x435   :  { %v1616_v46 = vpack.c.bf16 %v1596_v31, %v1595_v32  ;;  %v3558_v49 = vadd.f32 %v3557_v35, %v3556_v5  ;;  %v6680_v31 = vld [vmem:[#allocation22_spill] sm:$0xff] }
 0x436   :  { %v3559_v30 = vpop.f32.mrf.mxu0 }
 0x437   :  { %1877 = vmatmul.mubr.bf16.gmra.mxu1 %v1616_v46  ;;  %v1597_v45 = vmul.f32 %v6678_v28, %v3558_v49  ;;  %v6681_v46 = vld [vmem:[#allocation77_spill] sm:$0xff] }
 0x438   :  { %v3560_v11 = vpop.f32.mrf.mxu0  ;;  %1884 = vmatprep.mubr.bf16.mxu1 %v5295_v60 }
 0x439   :  { %v3561_v24 = vadd.f32 %v3560_v11, %v3559_v30 }
 0x43a   :  { %v3562_v4 = vpop.f32.mrf.mxu0 }
 0x43b   :  { %v1598_v53 = vmul.f32 %v6679_v26, %v3561_v24 }
 0x43c   :  { %v3563_v23 = vpop.f32.mrf.mxu0 }
 0x43d   :  { %v1617_v1 = vpack.c.bf16 %v1598_v53, %v1597_v45  ;;  %v3564_v25 = vadd.f32 %v3563_v23, %v3562_v4  ;;  %v6682_v53 = vld [vmem:[#allocation20_spill] sm:$0xff] }
 0x43e   :  { %v3565_v56 = vpop.f32.mrf.mxu0 }
 0x43f   :  { %1885 = vmatmul.mubr.bf16.gmra.mxu1 %v1617_v1  ;;  %v1599_v35 = vmul.f32 %v6680_v31, %v3564_v25  ;;  %v6683_v1 = vld [vmem:[#allocation78_spill] sm:$0xff] }
 0x440   :  { %v3566_v22 = vpop.f32.mrf.mxu0  ;;  %1892 = vmatprep.mubr.bf16.mxu1 %v5284_v36 }
 0x441   :  { %v3567_v32 = vadd.f32 %v3566_v22, %v3565_v56 }
 0x442   :  { %v3568_v5 = vpop.f32.mrf.mxu0 }
 0x443   :  { %v1600_v60 = vmul.f32 %v6681_v46, %v3567_v32 }
 0x444   :  { %v3569_v30 = vpop.f32.mrf.mxu0 }
 0x445   :  { %v1618_v11 = vpack.c.bf16 %v1600_v60, %v1599_v35  ;;  %v3570_v49 = vadd.f32 %v3569_v30, %v3568_v5  ;;  %v6684_v5 = vld [vmem:[#allocation18_spill] sm:$0xff]  ;;  %v6685_v30 = vld [vmem:[#allocation79_spill] sm:$0xff] }
 0x446   :  { %v3571_v13 = vpop.f32.mrf.mxu0 }
 0x447   :  { %1893 = vmatmul.mubr.bf16.gmra.mxu1 %v1618_v11  ;;  %v1601_v23 = vmul.f32 %v6682_v53, %v3570_v49 }
 0x448   :  { %v3572_v24 = vpop.f32.mrf.mxu0  ;;  %1900 = vmatprep.mubr.bf16.mxu1 %v5275_v40 }
 0x449   :  { %v3573_v45 = vadd.f32 %v3572_v24, %v3571_v13 }
 0x44a   :  { %v3574_v4 = vpop.f32.mrf.mxu0 }
 0x44b   :  { %v1602_v36 = vmul.f32 %v6683_v1, %v3573_v45 }
 0x44c   :  { %v3575_v56 = vpop.f32.mrf.mxu0 }
 0x44d   :  { %v1619_v22 = vpack.c.bf16 %v1602_v36, %v1601_v23  ;;  %v3576_v25 = vadd.f32 %v3575_v56, %v3574_v4 }
 0x44e   :  { %v3577_v26 = vpop.f32.mrf.mxu0 }
 0x44f   :  { %1901 = vmatmul.mubr.bf16.gmra.mxu1 %v1619_v22  ;;  %v1603_v60 = vmul.f32 %v6684_v5, %v3576_v25 }
 0x450   :  { %v3578_v32 = vpop.f32.mrf.mxu0  ;;  %1908 = vmatprep.mubr.bf16.mxu1 %v5261_v3 }
 0x451   :  { %v3579_v35 = vadd.f32 %v3578_v32, %v3577_v26 }
 0x453   :  { %v1604_v11 = vmul.f32 %v6685_v30, %v3579_v35 }
 0x455   :  { %v1620_v40 = vpack.c.bf16 %v1604_v11, %v1603_v60 }
 0x457   :  { %1909 = vmatmul.mubr.bf16.gmra.mxu1 %v1620_v40 }
 0x49f   :  { %v3596_v13 = vpop.f32.mrf.mxu1 }
 0x4a1   :  { %v3597_v24 = vpop.f32.mrf.mxu1 }
 0x4a2   :  { %v3598_v49 = vadd.f32 %v3597_v24, %v3596_v13 }
 0x4a3   :  { %v3599_v53 = vpop.f32.mrf.mxu1 }
 0x4a4   :  { %v5441_v10 = vadd.f32 %v3598_v49, %v5435_v16 }
 0x4a5   :  { %v3600_v45 = vpop.f32.mrf.mxu1 }
 0x4a6   :  { %v3601_v9 = vadd.f32 %v3600_v45, %v3599_v53 }
 0x4a7   :  { %v3602_v1 = vpop.f32.mrf.mxu1 }
 0x4a8   :  { %v5438_v19 = vadd.f32 %v3601_v9, %v5435_v16 }
 0x4a9   :  { %v3603_v23 = vpop.f32.mrf.mxu1 }
 0x4aa   :  { %v3604_v41 = vadd.f32 %v3603_v23, %v3602_v1  ;;  %v1949_v1 = vadd.f32 %v5438_v19, %v5441_v10 }
 0x4ab   :  { %v3605_v36 = vpop.f32.mrf.mxu1 }
 0x4ac   :  { %v5444_v63 = vadd.f32 %v3604_v41, %v5435_v16 }
 0x4ad   :  { %v3606_v4 = vpop.f32.mrf.mxu1 }
 0x4ae   :  { %v3607_v59 = vadd.f32 %v3606_v4, %v3605_v36  ;;  %v1950_v9 = vadd.f32 %v1949_v1, %v5444_v63 }
 0x4af   :  { %v3608_v56 = vpop.f32.mrf.mxu1 }
 0x4b0   :  { %v5449_v23 = vadd.f32 %v3607_v59, %v5435_v16 }
 0x4b1   :  { %v3609_v22 = vpop.f32.mrf.mxu1 }
 0x4b2   :  { %v3610_v53 = vadd.f32 %v3609_v22, %v3608_v56  ;;  %v1951_v41 = vadd.f32 %v1950_v9, %v5449_v23 }
 0x4b3   :  { %v3611_v46 = vpop.f32.mrf.mxu1 }
 0x4b4   :  { %v5453_v36 = vadd.f32 %v3610_v53, %v5435_v16 }
 0x4b5   :  { %v3612_v3 = vpop.f32.mrf.mxu1 }
 0x4b6   :  { %v3613_v38 = vadd.f32 %v3612_v3, %v3611_v46  ;;  %v1952_v2 = vadd.f32 %v1951_v41, %v5453_v36 }
 0x4b7   :  { %v3614_v26 = vpop.f32.mrf.mxu1 }
 0x4b8   :  { %v5457_v56 = vadd.f32 %v3613_v38, %v5435_v16 }
 0x4b9   :  { %v3615_v32 = vpop.f32.mrf.mxu1 }
 0x4ba   :  { %v3616_v49 = vadd.f32 %v3615_v32, %v3614_v26  ;;  %v1953_v1 = vadd.f32 %v1952_v2, %v5457_v56 }
 0x4bb   :  { %v3617_v25 = vpop.f32.mrf.mxu1 }
 0x4bc   :  { %v5461_v59 = vadd.f32 %v3616_v49, %v5435_v16 }
 0x4bd   :  { %v3618_v5 = vpop.f32.mrf.mxu1 }
 0x4be   :  { %v3619_v22 = vadd.f32 %v3618_v5, %v3617_v25  ;;  %v1954_v9 = vadd.f32 %v1953_v1, %v5461_v59 }
 0x4bf   :  { %v3620_v35 = vpop.f32.mrf.mxu1 }
 0x4c0   :  { %v5465_v53 = vadd.f32 %v3619_v22, %v5435_v16 }
 0x4c1   :  { %v3621_v60 = vpop.f32.mrf.mxu1 }
 0x4c2   :  { %v3622_v46 = vadd.f32 %v3621_v60, %v3620_v35  ;;  %v1955_v41 = vadd.f32 %v1954_v9, %v5465_v53 }
 0x4c3   :  { %v3623_v11 = vpop.f32.mrf.mxu1 }
 0x4c4   :  { %v5469_v38 = vadd.f32 %v3622_v46, %v5435_v16 }
 0x4c5   :  { %v3624_v40 = vpop.f32.mrf.mxu1 }
 0x4c6   :  { %v3625_v26 = vadd.f32 %v3624_v40, %v3623_v11  ;;  %v1956_v2 = vadd.f32 %v1955_v41, %v5469_v38 }
 0x4c7   :  { %v3626_v30 = vpop.f32.mrf.mxu1 }
 0x4c8   :  { %v5473_v49 = vadd.f32 %v3625_v26, %v5435_v16 }
 0x4c9   :  { %v3627_v13 = vpop.f32.mrf.mxu1 }
 0x4ca   :  { %v3628_v5 = vadd.f32 %v3627_v13, %v3626_v30  ;;  %v1957_v1 = vadd.f32 %v1956_v2, %v5473_v49 }
 0x4cb   :  { %v3629_v24 = vpop.f32.mrf.mxu1 }
 0x4cc   :  { %v5477_v22 = vadd.f32 %v3628_v5, %v5435_v16 }
 0x4cd   :  { %v3630_v31 = vpop.f32.mrf.mxu1 }
 0x4ce   :  { %v3631_v35 = vadd.f32 %v3630_v31, %v3629_v24  ;;  %v1958_v9 = vadd.f32 %v1957_v1, %v5477_v22 }
 0x4cf   :  { %v3632_v28 = vpop.f32.mrf.mxu1 }
 0x4d0   :  { %v5481_v46 = vadd.f32 %v3631_v35, %v5435_v16 }
 0x4d1   :  { %v3633_v0 = vpop.f32.mrf.mxu1 }
 0x4d2   :  { %v3634_v11 = vadd.f32 %v3633_v0, %v3632_v28  ;;  %v1959_v41 = vadd.f32 %v1958_v9, %v5481_v46 }
 0x4d3   :  { %v3635_v58 = vpop.f32.mrf.mxu1 }
 0x4d4   :  { %v5485_v26 = vadd.f32 %v3634_v11, %v5435_v16 }
 0x4d5   :  { %v3636_v55 = vpop.f32.mrf.mxu1 }
 0x4d6   :  { %v3637_v30 = vadd.f32 %v3636_v55, %v3635_v58  ;;  %v1960_v2 = vadd.f32 %v1959_v41, %v5485_v26 }
 0x4d7   :  { %v3638_v27 = vpop.f32.mrf.mxu1 }
 0x4d8   :  { %v5489_v5 = vadd.f32 %v3637_v30, %v5435_v16 }
 0x4d9   :  { %v3639_v8 = vpop.f32.mrf.mxu1 }
 0x4da   :  { %v3640_v31 = vadd.f32 %v3639_v8, %v3638_v27  ;;  %v1961_v1 = vadd.f32 %v1960_v2, %v5489_v5 }
 0x4db   :  { %v3641_v15 = vpop.f32.mrf.mxu1 }
 0x4dc   :  { %v5493_v35 = vadd.f32 %v3640_v31, %v5435_v16 }
 0x4dd   :  { %v3642_v43 = vpop.f32.mrf.mxu1 }
 0x4de   :  { %v3643_v0 = vadd.f32 %v3642_v43, %v3641_v15  ;;  %v1962_v9 = vadd.f32 %v1961_v1, %v5493_v35 }
 0x4df   :  { %v3644_v34 = vpop.f32.mrf.mxu1 }
 0x4e0   :  { %v5497_v11 = vadd.f32 %v3643_v0, %v5435_v16 }
 0x4e1   :  { %v3645_v47 = vpop.f32.mrf.mxu1 }
 0x4e2   :  { %v3646_v55 = vadd.f32 %v3645_v47, %v3644_v34  ;;  %v1963_v41 = vadd.f32 %v1962_v9, %v5497_v11 }
 0x4e3   :  { %v3647_v42 = vpop.f32.mrf.mxu1 }
 0x4e4   :  { %v5501_v30 = vadd.f32 %v3646_v55, %v5435_v16 }
 0x4e5   :  { %v3648_v52 = vpop.f32.mrf.mxu1 }
 0x4e6   :  { %v3649_v8 = vadd.f32 %v3648_v52, %v3647_v42  ;;  %v1964_v2 = vadd.f32 %v1963_v41, %v5501_v30 }
 0x4e7   :  { %v3650_v45 = vpop.f32.mrf.mxu1 }
 0x4e8   :  { %v5505_v31 = vadd.f32 %v3649_v8, %v5435_v16 }
 0x4e9   :  { %v3651_v61 = vpop.f32.mrf.mxu1 }
 0x4ea   :  { %v3652_v43 = vadd.f32 %v3651_v61, %v3650_v45  ;;  %v1965_v1 = vadd.f32 %v1964_v2, %v5505_v31 }
 0x4eb   :  { %v3653_v4 = vpop.f32.mrf.mxu1 }
 0x4ec   :  { %v5509_v0 = vadd.f32 %v3652_v43, %v5435_v16 }
 0x4ed   :  { %v3654_v48 = vpop.f32.mrf.mxu1 }
 0x4ee   :  { %v3655_v47 = vadd.f32 %v3654_v48, %v3653_v4  ;;  %v1966_v9 = vadd.f32 %v1965_v1, %v5509_v0 }
 0x4ef   :  { %v3656_v3 = vpop.f32.mrf.mxu1 }
 0x4f0   :  { %v5513_v55 = vadd.f32 %v3655_v47, %v5435_v16 }
 0x4f1   :  { %v3657_v32 = vpop.f32.mrf.mxu1 }
 0x4f2   :  { %v3658_v52 = vadd.f32 %v3657_v32, %v3656_v3  ;;  %v1967_v41 = vadd.f32 %v1966_v9, %v5513_v55 }
 0x4f3   :  { %v3659_v25 = vpop.f32.mrf.mxu1 }
 0x4f4   :  { %v5517_v8 = vadd.f32 %v3658_v52, %v5435_v16 }
 0x4f5   :  { %v3660_v60 = vpop.f32.mrf.mxu1 }
 0x4f6   :  { %v3661_v61 = vadd.f32 %v3660_v60, %v3659_v25  ;;  %v1968_v47 = vadd.f32 %v1967_v41, %v5517_v8 }
 0x4f7   :  { %v3662_v40 = vpop.f32.mrf.mxu1 }
 0x4f8   :  { %v5521_v43 = vadd.f32 %v3661_v61, %v5435_v16 }
 0x4f9   :  { %v3663_v13 = vpop.f32.mrf.mxu1 }
 0x4fa   :  { %v3664_v48 = vadd.f32 %v3663_v13, %v3662_v40  ;;  %v1969_v52 = vadd.f32 %v1968_v47, %v5521_v43 }
 0x4fb   :  { %v3665_v24 = vpop.f32.mrf.mxu1 }
 0x4fc   :  { %v5525_v25 = vadd.f32 %v3664_v48, %v5435_v16 }
 0x4fd   :  { %v3666_v28 = vpop.f32.mrf.mxu1 }
 0x4fe   :  { %v3667_v3 = vadd.f32 %v3666_v28, %v3665_v24  ;;  %v1970_v28 = vadd.f32 %v1969_v52, %v5525_v25 }
 0x4ff   :  { %v3668_v58 = vpop.f32.mrf.mxu1 }
 0x500   :  { %v5529_v40 = vadd.f32 %v3667_v3, %v5435_v16 }
 0x501   :  { %v3669_v27 = vpop.f32.mrf.mxu1 }
 0x502   :  { %v3670_v60 = vadd.f32 %v3669_v27, %v3668_v58 }
 0x503   :  { %v3671_v15 = vpop.f32.mrf.mxu1 }
 0x505   :  { %v3672_v34 = vpop.f32.mrf.mxu1 }
 0x506   :  { %v3673_v32 = vadd.f32 %v3672_v34, %v3671_v15  ;;  %v5536_v15 = vadd.f32 %v3670_v60, %v5435_v16 }
 0x507   :  { %v3674_v42 = vpop.f32.mrf.mxu1 }
 0x508   :  { %v5532_v13 = vadd.f32 %v3673_v32, %v5435_v16 }
 0x509   :  { %v3675_v45 = vpop.f32.mrf.mxu1 }
 0x50a   :  { %v3676_v1 = vadd.f32 %v3675_v45, %v3674_v42  ;;  %v1971_v42 = vadd.f32 %v1970_v28, %v5529_v40  ;;  %v1942_v45 = vmul.f32 0.0, %v5532_v13 }
 0x50b   :  { %v3677_v4 = vpop.f32.mrf.mxu1 }
 0x50c   :  { %v5539_v34 = vadd.f32 %v3676_v1, %v5435_v16 }
 0x50d   :  { %v3678_v2 = vpop.f32.mrf.mxu1 }
 0x50e   :  { %v3679_v61 = vadd.f32 %v3678_v2, %v3677_v4  ;;  %v1972_v4 = vadd.f32 %v1971_v42, %v5536_v15  ;;  %v1943_v41 = vmul.f32 0.0, %v5539_v34 }
 0x50f   :  { %v3680_v14 = vpop.f32.mrf.mxu1 }
 0x510   :  { %v5544_v9 = vadd.f32 %v3679_v61, %v5435_v16  ;;  %v1973_v47 = vadd.f32 %v1972_v4, %v1942_v45 }
 0x511   :  { %v3681_v24 = vpop.f32.mrf.mxu1 }
 0x512   :  { %v3682_v58 = vadd.f32 %v3681_v24, %v3680_v14  ;;  %v1944_v14 = vmul.f32 0.0, %v5544_v9  ;;  %v1974_v52 = vadd.f32 %v1973_v47, %v1943_v41 }
 0x513   :  { %v3683_v27 = vpop.f32.mrf.mxu1 }
 0x514   :  { %v5549_v3 = vadd.f32 %v3682_v58, %v5435_v16  ;;  %v1975_v42 = vadd.f32 %v1974_v52, %v1944_v14 }
 0x515   :  { %v3684_v48 = vpop.f32.mrf.mxu1 }
 0x516   :  { %v3685_v32 = vadd.f32 %v3684_v48, %v3683_v27  ;;  %v1945_v61 = vmul.f32 0.0, %v5549_v3 }
 0x517   :  { %v3686_v2 = vpop.f32.mrf.mxu1 }
 0x518   :  { %v5553_v60 = vadd.f32 %v3685_v32, %v5435_v16  ;;  %v1976_v48 = vadd.f32 %v1975_v42, %v1945_v61 }
 0x519   :  { %v3687_v1 = vpop.f32.mrf.mxu1 }
 0x51a   :  { %v3688_v24 = vadd.f32 %v3687_v1, %v3686_v2  ;;  %v1946_v37 = vmul.f32 0.0, %v5553_v60 }
 0x51b   :  { %v3689_v28 = vpop.f32.mrf.mxu1 }
 0x51c   :  { %v5558_v58 = vadd.f32 %v3688_v24, %v5435_v16  ;;  %v1977_v54 = vadd.f32 %v1976_v48, %v1946_v37 }
 0x51d   :  { %v3690_v27 = vpop.f32.mrf.mxu1 }
 0x51e   :  { %v1947_v45 = vmul.f32 0.0, %v5558_v58  ;;  %v3691_v4 = vadd.f32 %v3690_v27, %v3689_v28 }
 0x520   :  { %v5562_v32 = vadd.f32 %v3691_v4, %v5435_v16  ;;  %v1978_v41 = vadd.f32 %v1977_v54, %v1947_v45 }
 0x522   :  { %v1948_v47 = vmul.f32 0.0, %v5562_v32 }
 0x524   :  { %v1979_v2 = vadd.f32 %v1978_v41, %v1948_v47 }
 0x526   :  { %v1980_v1 = vrot.slane %v1979_v2, 4 }
 0x528   :  { %v1981_v14 = vadd.f32 %v1980_v1, %v1979_v2 }
 0x52a   :  { %v1982_v52 = vrot.slane %v1981_v14, 2 }
 0x52c   :  { %v1983_v21 = vadd.f32 %v1982_v52, %v1981_v14 }
 0x52e   :  { %v1984_v50 = vrot.slane %v1983_v21, 1 }
 0x530   :  { %v1985_v24 = vadd.f32 %v1984_v50, %v1983_v21 }
 0x532   :  { %v5565_v29 = vmul.f32 0.005, %v1985_v24 }
 0x534   :  { %v5569_v61 = vsub.f32 %v5441_v10, %v5565_v29  ;;  %v5573_v37 = vsub.f32 %v5438_v19, %v5565_v29  ;;  %v5577_v54 = vsub.f32 %v5444_v63, %v5565_v29  ;;  %v5585_v21 = vsub.f32 %v5449_v23, %v5565_v29 }
 0x535   :  { %v5589_v10 = vsub.f32 %v5453_v36, %v5565_v29  ;;  %v5595_v63 = vsub.f32 %v5457_v56, %v5565_v29  ;;  %v5601_v23 = vsub.f32 %v5461_v59, %v5565_v29  ;;  %v5607_v45 = vsub.f32 %v5465_v53, %v5565_v29 }
 0x536   :  { %v2051_v16 = vmul.f32 %v5569_v61, %v5569_v61  ;;  %v2052_v50 = vmul.f32 %v5573_v37, %v5573_v37  ;;  %v2053_v19 = vmul.f32 %v5577_v54, %v5577_v54  ;;  %v2054_v42 = vmul.f32 %v5585_v21, %v5585_v21 }
 0x537   :  { %v2055_v36 = vmul.f32 %v5589_v10, %v5589_v10  ;;  %v2056_v56 = vmul.f32 %v5595_v63, %v5595_v63  ;;  %v5613_v41 = vsub.f32 %v5469_v38, %v5565_v29  ;;  %v2057_v59 = vmul.f32 %v5601_v23, %v5601_v23 }
 0x538   :  { %v2083_v28 = vadd.f32 %v2052_v50, %v2051_v16  ;;  %v5619_v2 = vsub.f32 %v5473_v49, %v5565_v29  ;;  %v2058_v53 = vmul.f32 %v5607_v45, %v5607_v45  ;;  %v5625_v14 = vsub.f32 %v5477_v22, %v5565_v29 }
 0x539   :  { %v2059_v38 = vmul.f32 %v5613_v41, %v5613_v41  ;;  %v5631_v24 = vsub.f32 %v5481_v46, %v5565_v29  ;;  %v5637_v50 = vsub.f32 %v5485_v26, %v5565_v29 }
 0x53a   :  { %v2084_v27 = vadd.f32 %v2083_v28, %v2053_v19  ;;  %v2060_v49 = vmul.f32 %v5619_v2, %v5619_v2  ;;  %v2061_v22 = vmul.f32 %v5625_v14, %v5625_v14  ;;  %v5643_v28 = vsub.f32 %v5489_v5, %v5565_v29 }
 0x53b   :  { %v2062_v46 = vmul.f32 %v5631_v24, %v5631_v24  ;;  %v2063_v26 = vmul.f32 %v5637_v50, %v5637_v50 }
 0x53c   :  { %v2085_v48 = vadd.f32 %v2084_v27, %v2054_v42  ;;  %v5649_v27 = vsub.f32 %v5493_v35, %v5565_v29  ;;  %v2064_v5 = vmul.f32 %v5643_v28, %v5643_v28 }
 0x53e   :  { %v2086_v4 = vadd.f32 %v2085_v48, %v2055_v36  ;;  %v5655_v48 = vsub.f32 %v5497_v11, %v5565_v29  ;;  %v2065_v35 = vmul.f32 %v5649_v27, %v5649_v27 }
 0x540   :  { %v2087_v47 = vadd.f32 %v2086_v4, %v2056_v56  ;;  %v5661_v4 = vsub.f32 %v5501_v30, %v5565_v29  ;;  %v2066_v11 = vmul.f32 %v5655_v48, %v5655_v48 }
 0x542   :  { %v2088_v1 = vadd.f32 %v2087_v47, %v2057_v59  ;;  %v5667_v47 = vsub.f32 %v5505_v31, %v5565_v29  ;;  %v2067_v30 = vmul.f32 %v5661_v4, %v5661_v4 }
 0x544   :  { %v2089_v52 = vadd.f32 %v2088_v1, %v2058_v53  ;;  %v5673_v1 = vsub.f32 %v5509_v0, %v5565_v29  ;;  %v2068_v31 = vmul.f32 %v5667_v47, %v5667_v47 }
 0x546   :  { %v2090_v16 = vadd.f32 %v2089_v52, %v2059_v38  ;;  %v5679_v52 = vsub.f32 %v5513_v55, %v5565_v29  ;;  %v2069_v0 = vmul.f32 %v5673_v1, %v5673_v1 }
 0x548   :  { %v2091_v19 = vadd.f32 %v2090_v16, %v2060_v49  ;;  %v5685_v16 = vsub.f32 %v5517_v8, %v5565_v29  ;;  %v2070_v55 = vmul.f32 %v5679_v52, %v5679_v52 }
 0x54a   :  { %v2092_v42 = vadd.f32 %v2091_v19, %v2061_v22  ;;  %v5691_v19 = vsub.f32 %v5521_v43, %v5565_v29  ;;  %v2071_v8 = vmul.f32 %v5685_v16, %v5685_v16  ;;  %v2012_v43 = vsub.f32 %v5532_v13, %v5565_v29 }
 0x54c   :  { %v2093_v36 = vadd.f32 %v2092_v42, %v2062_v46  ;;  %v5697_v42 = vsub.f32 %v5525_v25, %v5565_v29  ;;  %v2013_v25 = vsub.f32 %v5539_v34, %v5565_v29  ;;  %v2016_v34 = vsub.f32 %v5553_v60, %v5565_v29 }
 0x54e   :  { %v2094_v56 = vadd.f32 %v2093_v36, %v2063_v26  ;;  %v5703_v36 = vsub.f32 %v5529_v40, %v5565_v29  ;;  %v2014_v40 = vsub.f32 %v5544_v9, %v5565_v29  ;;  %v2017_v9 = vsub.f32 %v5558_v58, %v5565_v29 }
 0x550   :  { %v2095_v59 = vadd.f32 %v2094_v56, %v2064_v5  ;;  %v2072_v5 = vmul.f32 %v5691_v19, %v5691_v19  ;;  %v2074_v13 = vmul.f32 %v5703_v36, %v5703_v36 }
 0x552   :  { %v2096_v53 = vadd.f32 %v2095_v59, %v2065_v35  ;;  %v2011_v35 = vsub.f32 %v5536_v15, %v5565_v29  ;;  %v2073_v59 = vmul.f32 %v5697_v42, %v5697_v42 }
 0x554   :  { %v2097_v38 = vadd.f32 %v2096_v53, %v2066_v11  ;;  %v2044_v53 = vmul.f32 0.0, %v2012_v43  ;;  %v2075_v15 = vmul.f32 %v2011_v35, %v2011_v35 }
 0x556   :  { %v2098_v49 = vadd.f32 %v2097_v38, %v2067_v30  ;;  %v2015_v38 = vsub.f32 %v5549_v3, %v5565_v29 }
 0x558   :  { %v2099_v22 = vadd.f32 %v2098_v49, %v2068_v31  ;;  %v2045_v31 = vmul.f32 0.0, %v2013_v25 }
 0x55a   :  { %v2100_v46 = vadd.f32 %v2099_v22, %v2069_v0  ;;  %v2046_v0 = vmul.f32 0.0, %v2014_v40  ;;  %v2076_v22 = vmul.f32 %v2044_v53, %v2044_v53 }
 0x55c   :  { %v2101_v26 = vadd.f32 %v2100_v46, %v2070_v55  ;;  %v2047_v46 = vmul.f32 0.0, %v2015_v38  ;;  %v2078_v3 = vmul.f32 %v2046_v0, %v2046_v0 }
 0x55e   :  { %v2102_v56 = vadd.f32 %v2101_v26, %v2071_v8  ;;  %v2077_v8 = vmul.f32 %v2045_v31, %v2045_v31 }
 0x560   :  { %v2103_v11 = vadd.f32 %v2102_v56, %v2072_v5  ;;  %v2018_v5 = vsub.f32 %v5562_v32, %v5565_v29  ;;  %v2048_v56 = vmul.f32 0.0, %v2016_v34 }
 0x562   :  { %v2104_v30 = vadd.f32 %v2103_v11, %v2073_v59  ;;  %v2049_v11 = vmul.f32 0.0, %v2017_v9  ;;  %v2050_v17 = vmul.f32 0.0, %v2018_v5  ;;  %v2080_v60 = vmul.f32 %v2048_v56, %v2048_v56 }
 0x564   :  { %v2105_v49 = vadd.f32 %v2104_v30, %v2074_v13  ;;  %v2079_v13 = vmul.f32 %v2047_v46, %v2047_v46  ;;  %v2081_v53 = vmul.f32 %v2049_v11, %v2049_v11  ;;  %v2123_v46 = vld [vmem:[%s6393_s8] sm:$0x1] }
 0x566   :  { %v2106_v55 = vadd.f32 %v2105_v49, %v2075_v15  ;;  %v2082_v49 = vmul.f32 %v2050_v17, %v2050_v17 }
 0x568   :  { %v2107_v26 = vadd.f32 %v2106_v55, %v2076_v22 }
 0x56a   :  { %v2108_v59 = vadd.f32 %v2107_v26, %v2077_v8 }
 0x56c   :  { %v2109_v30 = vadd.f32 %v2108_v59, %v2078_v3 }
 0x56e   :  { %v2110_v20 = vadd.f32 %v2109_v30, %v2079_v13 }
 0x570   :  { %v2111_v15 = vadd.f32 %v2110_v20, %v2080_v60  ;;  %v6686_v20 = vsub.s32 0, %v5201_v6 }
 0x572   :  { %v2112_v12 = vadd.f32 %v2111_v15, %v2081_v53 }
 0x574   :  { %v2113_v58 = vadd.f32 %v2112_v12, %v2082_v49 }
 0x576   :  { %v2114_v51 = vrot.slane %v2113_v58, 4 }
 0x578   :  { %v2115_v31 = vadd.f32 %v2114_v51, %v2113_v58 }
 0x57a   :  { %v2116_v22 = vrot.slane %v2115_v31, 2 }
 0x57c   :  { %v2117_v55 = vadd.f32 %v2116_v22, %v2115_v31 }
 0x57e   :  { %v2118_v7 = vrot.slane %v2117_v55, 1 }
 0x580   :  { %v2119_v29 = vadd.f32 %v2118_v7, %v2117_v55 }
 0x582   :  { %v2120_v32 = vmul.f32 0.005, %v2119_v29 }
 0x584   :  { %v2121_v0 = vadd.f32 1e-05, %v2120_v32 }
 0x586   :  { %4042 = vrsqrt.f32 %v2121_v0 }
 0x593   :  { %v4043_v8 = vpop.eup %4042 }
 0x594   :  { %v2124_v26 = vmul.f32 %v4043_v8, %v2123_v46 }
 0x596   :  { %v5732_v17 = vrot.slane %v2124_v26, %v6686_v20 }
 0x598   :  { %v2160_v12 = vmul.f32 %v5732_v17, %v2018_v5  ;;  %v2143_v51 = vmul.f32 %v5732_v17, %v5649_v27  ;;  %v2144_v7 = vmul.f32 %v5732_v17, %v5655_v48  ;;  %v2153_v56 = vmul.f32 %v5732_v17, %v2011_v35  ;;  %v5749_v27 = vld [vmem:[%s6394_s9] ss:$0 sm:$0xff] }
 0x599   :  { %v2154_v3 = vmul.f32 %v5732_v17, %v2012_v43  ;;  %v2155_v59 = vmul.f32 %v5732_v17, %v2013_v25  ;;  %v2156_v11 = vmul.f32 %v5732_v17, %v2014_v40  ;;  %v2157_v6 = vmul.f32 %v5732_v17, %v2015_v38 }
 0x59a   :  { %v2158_v13 = vmul.f32 %v5732_v17, %v2016_v34  ;;  %v2159_v5 = vmul.f32 %v5732_v17, %v2017_v9  ;;  %v2141_v48 = vmul.f32 %v5732_v17, %v5637_v50  ;;  %v2139_v43 = vmul.f32 %v5732_v17, %v5625_v14 }
 0x59b   :  { %v2140_v35 = vmul.f32 %v5732_v17, %v5631_v24  ;;  %v2129_v25 = vmul.f32 %v5732_v17, %v5569_v61  ;;  %v2130_v40 = vmul.f32 %v5732_v17, %v5573_v37  ;;  %v2142_v38 = vmul.f32 %v5732_v17, %v5643_v28 }
 0x59c   :  { %v2182_v34 = vadd.f32 %v5749_v27, %v2143_v51  ;;  %v2183_v9 = vadd.f32 %v5749_v27, %v2144_v7  ;;  %v2198_v50 = vadd.f32 %v5749_v27, %v2159_v5  ;;  %v2199_v14 = vadd.f32 %v5749_v27, %v2160_v12 }
 0x59d   :  { %v2135_v24 = vmul.f32 %v5732_v17, %v5601_v23  ;;  %v2137_v61 = vmul.f32 %v5732_v17, %v5613_v41  ;;  %v2180_v30 = vadd.f32 %v5749_v27, %v2141_v48  ;;  %v2138_v37 = vmul.f32 %v5732_v17, %v5619_v2 }
 0x59e   :  { %v2151_v28 = vmul.f32 %v5732_v17, %v5697_v42  ;;  %v2178_v60 = vadd.f32 %v5749_v27, %v2139_v43  ;;  %v2179_v53 = vadd.f32 %v5749_v27, %v2140_v35  ;;  %v2181_v15 = vadd.f32 %v5749_v27, %v2142_v38 }
 0x59f   :  { %v2214_v49 = vmax.f32 %v2182_v34, 0.0  ;;  %v2215_v58 = vmax.f32 %v2183_v9, 0.0  ;;  %v2230_v23 = vmax.f32 %v2198_v50, 0.0  ;;  %v2231_v31 = vmax.f32 %v2199_v14, 0.0 }
 0x5a0   :  { %v2168_v41 = vadd.f32 %v5749_v27, %v2129_v25  ;;  %v2169_v22 = vadd.f32 %v5749_v27, %v2130_v40  ;;  %v2196_v55 = vadd.f32 %v5749_v27, %v2157_v6  ;;  %v2212_v2 = vmax.f32 %v2180_v30, 0.0 }
 0x5a1   :  { %v5782_v29 = vpack.c.bf16 %v2215_v58, %v2214_v49  ;;  %v2197_v42 = vadd.f32 %v5749_v27, %v2158_v13  ;;  %v2194_v32 = vadd.f32 %v5749_v27, %v2155_v59  ;;  %v5786_v0 = vpack.c.bf16 %v2231_v31, %v2230_v23 }
 0x5a2   :  { %v2200_v46 = vmax.f32 %v2168_v41, 0.0  ;;  %v2201_v8 = vmax.f32 %v2169_v22, 0.0  ;;  %v2228_v26 = vmax.f32 %v2196_v55, 0.0  ;;  %v2213_v20 = vmax.f32 %v2181_v15, 0.0 }
 0x5a3   :  { %v2229_v12 = vmax.f32 %v2197_v42, 0.0  ;;  %v2195_v51 = vadd.f32 %v5749_v27, %v2156_v11  ;;  %v2226_v7 = vmax.f32 %v2194_v32, 0.0  ;;  %v2152_v6 = vmul.f32 %v5732_v17, %v5703_v36  ;;  %3692 = vmatprep.subr.bf16.mxu0 %v5786_v0 }
 0x5a4   :  { %v5792_v5 = vpack.c.bf16 %v2201_v8, %v2200_v46  ;;  %v2192_v13 = vadd.f32 %v5749_v27, %v2153_v56  ;;  %v2193_v59 = vadd.f32 %v5749_v27, %v2154_v3  ;;  %v2136_v48 = vmul.f32 %v5732_v17, %v5607_v45  ;;  %3693 = vmatpush3.bf16.msra.mxu0 %v5782_v29 }
 0x5a5   :  { %v2149_v43 = vmul.f32 %v5732_v17, %v5685_v16  ;;  %v5801_v11 = vpack.c.bf16 %v2229_v12, %v2228_v26  ;;  %v2227_v35 = vmax.f32 %v2195_v51, 0.0  ;;  %v2176_v36 = vadd.f32 %v5749_v27, %v2137_v61 }
 0x5a6   :  { %v2177_v25 = vadd.f32 %v5749_v27, %v2138_v37  ;;  %2624 = vmatprep.mubr.bf16.mxu1 %v5792_v5  ;;  %v2224_v56 = vmax.f32 %v2192_v13, 0.0  ;;  %v2225_v40 = vmax.f32 %v2193_v59, 0.0  ;;  %v2210_v3 = vmax.f32 %v2178_v60, 0.0 }
 0x5a7   :  { %v2211_v38 = vmax.f32 %v2179_v53, 0.0  ;;  %3694 = vmatprep.subr.bf16.mxu0 %v5801_v11  ;;  %v5807_v45 = vpack.c.bf16 %v2213_v20, %v2212_v2  ;;  %v5809_v16 = vpack.c.bf16 %v2227_v35, %v2226_v7  ;;  %v2150_v34 = vmul.f32 %v5732_v17, %v5691_v19 }
 0x5a8   :  { %v5813_v9 = vpack.c.bf16 %v2225_v40, %v2224_v56  ;;  %v2190_v50 = vadd.f32 %v5749_v27, %v2151_v28  ;;  %v2191_v14 = vadd.f32 %v5749_v27, %v2152_v6  ;;  %v2133_v61 = vmul.f32 %v5732_v17, %v5589_v10 }
 0x5a9   :  { %3695 = vmatpush3.bf16.msra.mxu0 %v5807_v45  ;;  %v2134_v30 = vmul.f32 %v5732_v17, %v5595_v63  ;;  %v2147_v37 = vmul.f32 %v5732_v17, %v5673_v1  ;;  %v2174_v60 = vadd.f32 %v5749_v27, %v2135_v24  ;;  %v2175_v19 = vadd.f32 %v5749_v27, %v2136_v48 }
 0x5aa   :  { %3696 = vmatprep.subr.bf16.mxu0 %v5809_v16  ;;  %v2208_v28 = vmax.f32 %v2176_v36, 0.0  ;;  %v2209_v53 = vmax.f32 %v2177_v25, 0.0  ;;  %v5827_v15 = vpack.c.bf16 %v2211_v38, %v2210_v3  ;;  %v2188_v10 = vadd.f32 %v5749_v27, %v2149_v43  ;;  %v3961_v3 = vld [vmem:[#allocation10 + $0x38] sm:$0xff]   ;;  %v3962_v38 = vld [vmem:[#allocation10 + $0x70] sm:$0xff]  }
 0x5ab   :  { %v2148_v49 = vmul.f32 %v5732_v17, %v5679_v52  ;;  %v2222_v58 = vmax.f32 %v2190_v50, 0.0  ;;  %v2223_v63 = vmax.f32 %v2191_v14, 0.0  ;;  %v2189_v23 = vadd.f32 %v5749_v27, %v2150_v34  ;;  %v3963_v34 = vld [vmem:[#allocation10 + $0x30] sm:$0xff]   ;;  %v3964_v50 = vld [vmem:[#allocation10 + $0x68] sm:$0xff]  }
 0x5ac   :  { %v2131_v1 = vmul.f32 %v5732_v17, %v5577_v54  ;;  %v2132_v24 = vmul.f32 %v5732_v17, %v5585_v21  ;;  %v2145_v31 = vmul.f32 %v5732_v17, %v5661_v4  ;;  %v2146_v41 = vmul.f32 %v5732_v17, %v5667_v47  ;;  %v3965_v14 = vld [vmem:[#allocation10 + $0x28] sm:$0xff]  }
 0x5ad   :  { %3697 = vmatpush3.bf16.msra.mxu0 %v5827_v15  ;;  %v2172_v52 = vadd.f32 %v5749_v27, %v2133_v61  ;;  %v2173_v22 = vadd.f32 %v5749_v27, %v2134_v30  ;;  %v2206_v55 = vmax.f32 %v2174_v60, 0.0  ;;  %v5845_v2 = vpack.c.bf16 %v2209_v53, %v2208_v28  ;;  %v3966_v61 = vld [vmem:[#allocation10 + $0x60] sm:$0xff]   ;;  %v3969_v60 = vld [vmem:[#allocation10 + $0x18] sm:$0xff]   ;;  %v6691_v28 = vld [vmem:[#allocation49_spill] sm:$0xff] }
 0x5ae   :  { %3698 = vmatprep.subr.bf16.mxu0 %v5813_v9  ;;  %v2207_v54 = vmax.f32 %v2175_v19, 0.0  ;;  %v2220_v42 = vmax.f32 %v2188_v10, 0.0  ;;  %v5847_v21 = vpack.c.bf16 %v2223_v63, %v2222_v58  ;;  %v2221_v32 = vmax.f32 %v2189_v23, 0.0  ;;  %v3967_v30 = vld [vmem:[#allocation10 + $0x20] sm:$0xff]   ;;  %v6692_v53 = vld [vmem:[#allocation50_spill] sm:$0xff]  ;;  %v6695_v10 = vld [vmem:[#allocation53_spill] sm:$0xff] }
 0x5af   :  { %v2186_v46 = vadd.f32 %v5749_v27, %v2147_v37  ;;  %v2187_v4 = vadd.f32 %v5749_v27, %v2148_v49  ;;  %v2170_v47 = vadd.f32 %v5749_v27, %v2131_v1  ;;  %v2171_v17 = vadd.f32 %v5749_v27, %v2132_v24  ;;  %v3968_v37 = vld [vmem:[#allocation10 + $0x58] sm:$0xff]   ;;  %v6690_v19 = vld [vmem:[#allocation48_spill] sm:$0xff]  ;;  %v3970_v49 = vld [vmem:[#allocation10 + $0x50] sm:$0xff]  }
 0x5b0   :  { %v2204_v8 = vmax.f32 %v2172_v52, 0.0  ;;  %v5855_v26 = vpack.c.bf16 %v2207_v54, %v2206_v55  ;;  %v2205_v20 = vmax.f32 %v2173_v22, 0.0  ;;  %v2184_v12 = vadd.f32 %v5749_v27, %v2145_v31  ;;  %v6698_v58 = vld [vmem:[#allocation56_spill] sm:$0xff]  ;;  %v3971_v63 = vld [vmem:[#allocation10 + $0x10] sm:$0xff]   ;;  %v3972_v23 = vld [vmem:[#allocation10 + $0x48] sm:$0xff]  }
 0x5b1   :  { %3699 = vmatpush3.bf16.msra.mxu0 %v5845_v2  ;;  %v5858_v51 = vpack.c.bf16 %v2221_v32, %v2220_v42  ;;  %v2218_v7 = vmax.f32 %v2186_v46, 0.0  ;;  %v2219_v6 = vmax.f32 %v2187_v4, 0.0  ;;  %v2185_v13 = vadd.f32 %v5749_v27, %v2146_v41  ;;  %v3960_v27 = vld [vmem:[#allocation10 + $0x78] sm:$0xff]   ;;  %v6699_v1 = vld [vmem:[#allocation57_spill] sm:$0xff]  ;;  %v6700_v24 = vld [vmem:[#allocation58_spill] sm:$0xff] }
 0x5b2   :  { %3700 = vmatprep.subr.bf16.mxu0 %v5847_v21  ;;  %v2202_v59 = vmax.f32 %v2170_v47, 0.0  ;;  %v5863_v48 = vpack.c.bf16 %v2205_v20, %v2204_v8  ;;  %v2203_v43 = vmax.f32 %v2171_v17, 0.0  ;;  %v2216_v36 = vmax.f32 %v2184_v12, 0.0  ;;  %3804 = vmatprep.subr.bf16.mxu1 %v3960_v27  ;;  %v3973_v31 = vld [vmem:[#allocation10 + $0x8] sm:$0xff]   ;;  %v3974_v41 = vld [vmem:[#allocation10 + $0x40] sm:$0xff]   ;;  %v6701_v22 = vld [vmem:[#allocation59_spill] sm:$0xff] }
 0x5b3   :  { %v5865_v35 = vpack.c.bf16 %v2219_v6, %v2218_v7  ;;  %v2217_v25 = vmax.f32 %v2185_v13, 0.0  ;;  %3805 = vmatpush3.bf16.msra.mxu1 %v3961_v3  ;;  %v3975_v52 = vld [vmem:[#allocation10] sm:$0xff]   ;;  %v6704_v42 = vld [vmem:[#allocation61_spill] sm:$0xff]  ;;  %v6706_v46 = vld [vmem:[#allocation34_spill] sm:$0xff] }
 0x5b4   :  { %v5869_v56 = vpack.c.bf16 %v2203_v43, %v2202_v59  ;;  %3806 = vmatprep.subr.bf16.mxu1 %v3962_v38  ;;  %v6702_v55 = vld [vmem:[#allocation60_spill] sm:$0xff]  ;;  %v6705_v32 = vld [vmem:[#allocation33_spill] sm:$0xff]  ;;  %v6707_v4 = vld [vmem:[#allocation35_spill] sm:$0xff] }
 0x5b5   :  { %3701 = vmatpush3.bf16.msra.mxu0 %v5855_v26  ;;  %v5871_v40 = vpack.c.bf16 %v2217_v25, %v2216_v36  ;;  %v6703_v54 = vld [vmem:[#allocation32_spill] sm:$0xff]  ;;  %v6709_v17 = vld [vmem:[#allocation38_spill] sm:$0xff]  ;;  %v6711_v20 = vld [vmem:[#allocation41_spill] sm:$0xff] }
 0x5b6   :  { %3702 = vmatprep.subr.bf16.mxu0 %v5858_v51  ;;  %v6708_v47 = vld [vmem:[#allocation36_spill] sm:$0xff]  ;;  %v6712_v25 = vld [vmem:[#allocation62_spill] sm:$0xff]  ;;  %v6713_v3 = vld [vmem:[#allocation63_spill] sm:$0xff] }
 0x5b7   :  { %3807 = vmatpush3.bf16.msra.mxu1 %v3963_v34  ;;  %v6710_v8 = vld [vmem:[#allocation40_spill] sm:$0xff] }
 0x5b8   :  { %3808 = vmatprep.subr.bf16.mxu1 %v3964_v50 }
 0x5b9   :  { %3703 = vmatpush3.bf16.msra.mxu0 %v5863_v48 }
 0x5ba   :  { %3704 = vmatprep.subr.bf16.mxu0 %v5865_v35 }
 0x5bb   :  { %3809 = vmatpush3.bf16.msra.mxu1 %v3965_v14 }
 0x5bc   :  { %3810 = vmatprep.subr.bf16.mxu1 %v3966_v61 }
 0x5bd   :  { %3705 = vmatpush3.bf16.msra.mxu0 %v5869_v56 }
 0x5be   :  { %3706 = vmatprep.subr.bf16.mxu0 %v5871_v40 }
 0x5bf   :  { %3811 = vmatpush3.bf16.msra.mxu1 %v3967_v30 }
 0x5c0   :  { %3812 = vmatprep.subr.bf16.mxu1 %v3968_v37 }
 0x5c1   :  { %3707 = vmatpush3.bf16.msra.mxu0 %v5792_v5  ;;  %v6688_v5 = vld [vmem:[#allocation46_spill] sm:$0xff] }
 0x5c3   :  { %3813 = vmatpush3.bf16.msra.mxu1 %v3969_v60 }
 0x5c4   :  { %2281 = vmatmul.mubr.bf16.vlgmr.msra.gmra.mxu0 %v6629_v33  ;;  %v6687_v33 = vld [vmem:[#allocation45_spill] sm:$0xff]  ;;  %3814 = vmatprep.subr.bf16.mxu1 %v3970_v49  ;;  %v6716_v49 = vld [vmem:[#allocation30_spill] sm:$0xff] }
 0x5c5   :  { %2288 = vmatprep.mubr.bf16.mxu0 %v6630_v18  ;;  %v6689_v18 = vld [vmem:[#allocation47_spill] sm:$0xff] }
 0x5c7   :  { %3815 = vmatpush3.bf16.msra.mxu1 %v3971_v63  ;;  %v6717_v63 = vld [vmem:[#allocation66_spill] sm:$0xff] }
 0x5c8   :  { %3816 = vmatprep.subr.bf16.mxu1 %v3972_v23 }
 0x5cb   :  { %3817 = vmatpush3.bf16.msra.mxu1 %v3973_v31 }
 0x5cc   :  { %2289 = vmatmul.mubr.bf16.gmra.mxu0 %v6631_v57  ;;  %v6693_v57 = vld [vmem:[#allocation51_spill] sm:$0xff]  ;;  %3818 = vmatprep.subr.bf16.mxu1 %v3974_v41 }
 0x5cd   :  { %2296 = vmatprep.mubr.bf16.mxu0 %v6632_v44  ;;  %v6694_v44 = vld [vmem:[#allocation52_spill] sm:$0xff] }
 0x5cf   :  { %3819 = vmatpush3.bf16.msra.mxu1 %v3975_v52 }
 0x5d4   :  { %2297 = vmatmul.mubr.bf16.gmra.mxu0 %v4654_v62  ;;  %v6696_v62 = vld [vmem:[#allocation54_spill] sm:$0xff] }
 0x5d5   :  { %2304 = vmatprep.mubr.bf16.mxu0 %v6633_v39  ;;  %v6697_v39 = vld [vmem:[#allocation55_spill] sm:$0xff] }
 0x5dc   :  { %2305 = vmatmul.mubr.bf16.gmra.mxu0 %v6687_v33  ;;  %v6714_v33 = vld [vmem:[#allocation64_spill] sm:$0xff] }
 0x5dd   :  { %2312 = vmatprep.mubr.bf16.mxu0 %v6688_v5 }
 0x5e4   :  { %2313 = vmatmul.mubr.bf16.gmra.mxu0 %v6689_v18  ;;  %v6715_v18 = vld [vmem:[#allocation65_spill] sm:$0xff] }
 0x5e5   :  { %2320 = vmatprep.mubr.bf16.mxu0 %v6690_v19 }
 0x5ec   :  { %2321 = vmatmul.mubr.bf16.gmra.mxu0 %v6691_v28 }
 0x5ed   :  { %2328 = vmatprep.mubr.bf16.mxu0 %v6692_v53 }
 0x5f4   :  { %2329 = vmatmul.mubr.bf16.gmra.mxu0 %v6693_v57 }
 0x5f5   :  { %2336 = vmatprep.mubr.bf16.mxu0 %v6694_v44 }
 0x5fc   :  { %2337 = vmatmul.mubr.bf16.gmra.mxu0 %v6695_v10 }
 0x5fd   :  { %2344 = vmatprep.mubr.bf16.mxu0 %v6696_v62 }
 0x604   :  { %2345 = vmatmul.mubr.bf16.gmra.mxu0 %v6697_v39 }
 0x605   :  { %2352 = vmatprep.mubr.bf16.mxu0 %v6698_v58 }
 0x60c   :  { %2353 = vmatmul.mubr.bf16.gmra.mxu0 %v6699_v1 }
 0x60d   :  { %2360 = vmatprep.mubr.bf16.mxu0 %v6700_v24 }
 0x614   :  { %2361 = vmatmul.mubr.bf16.gmra.mxu0 %v6701_v22 }
 0x615   :  { %2368 = vmatprep.mubr.bf16.mxu0 %v6702_v55  ;;  %v6718_v55 = vld [vmem:[#allocation28_spill] sm:$0xff] }
 0x61c   :  { %2369 = vmatmul.mubr.bf16.gmra.mxu0 %v6703_v54 }
 0x61d   :  { %2376 = vmatprep.mubr.bf16.mxu0 %v6704_v42  ;;  %v6719_v42 = vld [vmem:[#allocation67_spill] sm:$0xff] }
 0x624   :  { %2377 = vmatmul.mubr.bf16.gmra.mxu0 %v6705_v32 }
 0x625   :  { %2384 = vmatprep.mubr.bf16.mxu0 %v6706_v46 }
 0x62c   :  { %2385 = vmatmul.mubr.bf16.gmra.mxu0 %v6707_v4 }
 0x62d   :  { %2392 = vmatprep.mubr.bf16.mxu0 %v6708_v47 }
 0x634   :  { %2393 = vmatmul.mubr.bf16.gmra.mxu0 %v6709_v17 }
 0x635   :  { %2400 = vmatprep.mubr.bf16.mxu0 %v6710_v8 }
 0x63c   :  { %2401 = vmatmul.mubr.bf16.gmra.mxu0 %v6711_v20 }
 0x684   :  { %v3708_v12 = vpop.f32.mrf.mxu0 }
 0x686   :  { %v3709_v7 = vpop.f32.mrf.mxu0 }
 0x687   :  { %v3710_v13 = vadd.f32 %v3709_v7, %v3708_v12  ;;  %v6720_v12 = vld [vmem:[#allocation26_spill] sm:$0xff] }
 0x688   :  { %v3711_v6 = vpop.f32.mrf.mxu0 }
 0x689   :  { %v2409_v27 = vmul.f32 %v6712_v25, %v3710_v13 }
 0x68a   :  { %v3712_v59 = vpop.f32.mrf.mxu0 }
 0x68b   :  { %v3713_v43 = vadd.f32 %v3712_v59, %v3711_v6  ;;  %v6721_v6 = vld [vmem:[#allocation68_spill] sm:$0xff] }
 0x68c   :  { %v3714_v36 = vpop.f32.mrf.mxu0 }
 0x68d   :  { %v2410_v38 = vmul.f32 %v6713_v3, %v3713_v43 }
 0x68e   :  { %v3715_v34 = vpop.f32.mrf.mxu0 }
 0x68f   :  { %v2441_v50 = vpack.c.bf16 %v2410_v38, %v2409_v27  ;;  %v3716_v61 = vadd.f32 %v3715_v34, %v3714_v36  ;;  %v6722_v38 = vld [vmem:[#allocation23_spill] sm:$0xff] }
 0x690   :  { %v3717_v14 = vpop.f32.mrf.mxu0 }
 0x691   :  { %2625 = vmatmul.mubr.bf16.vlgmr.msra.gmra.mxu1 %v2441_v50  ;;  %v2411_v5 = vmul.f32 %v6714_v33, %v3716_v61  ;;  %v6723_v50 = vld [vmem:[#allocation69_spill] sm:$0xff] }
 0x692   :  { %v3718_v30 = vpop.f32.mrf.mxu0  ;;  %2632 = vmatprep.mubr.bf16.mxu1 %v5869_v56 }
 0x693   :  { %v3719_v37 = vadd.f32 %v3718_v30, %v3717_v14 }
 0x694   :  { %v3720_v60 = vpop.f32.mrf.mxu0 }
 0x695   :  { %v2412_v19 = vmul.f32 %v6715_v18, %v3719_v37  ;;  %v6724_v18 = vld [vmem:[#allocation21_spill] sm:$0xff] }
 0x696   :  { %v3721_v28 = vpop.f32.mrf.mxu0 }
 0x697   :  { %v2442_v53 = vpack.c.bf16 %v2412_v19, %v2411_v5  ;;  %v3722_v44 = vadd.f32 %v3721_v28, %v3720_v60  ;;  %v6725_v28 = vld [vmem:[#allocation70_spill] sm:$0xff] }
 0x698   :  { %v3723_v57 = vpop.f32.mrf.mxu0 }
 0x699   :  { %2633 = vmatmul.mubr.bf16.gmra.mxu1 %v2442_v53  ;;  %v2413_v58 = vmul.f32 %v6716_v49, %v3722_v44 }
 0x69a   :  { %v3724_v10 = vpop.f32.mrf.mxu0  ;;  %2640 = vmatprep.mubr.bf16.mxu1 %v5863_v48 }
 0x69b   :  { %v3725_v62 = vadd.f32 %v3724_v10, %v3723_v57 }
 0x69c   :  { %v3726_v39 = vpop.f32.mrf.mxu0 }
 0x69d   :  { %v2414_v56 = vmul.f32 %v6717_v63, %v3725_v62 }
 0x69e   :  { %v3727_v23 = vpop.f32.mrf.mxu0 }
 0x69f   :  { %v2443_v1 = vpack.c.bf16 %v2414_v56, %v2413_v58  ;;  %v3728_v31 = vadd.f32 %v3727_v23, %v3726_v39  ;;  %v6726_v58 = vld [vmem:[#allocation19_spill] sm:$0xff] }
 0x6a0   :  { %v3729_v24 = vpop.f32.mrf.mxu0  ;;  %v6727_v56 = vld [vmem:[#allocation71_spill] sm:$0xff] }
 0x6a1   :  { %2641 = vmatmul.mubr.bf16.gmra.mxu1 %v2443_v1  ;;  %v2415_v54 = vmul.f32 %v6718_v55, %v3728_v31  ;;  %v6728_v55 = vld [vmem:[#allocation17_spill] sm:$0xff] }
 0x6a2   :  { %v3730_v41 = vpop.f32.mrf.mxu0  ;;  %2648 = vmatprep.mubr.bf16.mxu1 %v5855_v26 }
 0x6a3   :  { %v3731_v52 = vadd.f32 %v3730_v41, %v3729_v24 }
 0x6a4   :  { %v3732_v22 = vpop.f32.mrf.mxu0 }
 0x6a5   :  { %v2416_v48 = vmul.f32 %v6719_v42, %v3731_v52  ;;  %v6729_v42 = vld [vmem:[#allocation72_spill] sm:$0xff] }
 0x6a6   :  { %v3733_v32 = vpop.f32.mrf.mxu0 }
 0x6a7   :  { %v2444_v46 = vpack.c.bf16 %v2416_v48, %v2415_v54  ;;  %v3734_v47 = vadd.f32 %v3733_v32, %v3732_v22 }
 0x6a8   :  { %v3735_v4 = vpop.f32.mrf.mxu0 }
 0x6a9   :  { %2649 = vmatmul.mubr.bf16.gmra.mxu1 %v2444_v46  ;;  %v2417_v7 = vmul.f32 %v6720_v12, %v3734_v47 }
 0x6aa   :  { %v3736_v17 = vpop.f32.mrf.mxu0  ;;  %2656 = vmatprep.mubr.bf16.mxu1 %v5845_v2 }
 0x6ab   :  { %v3737_v8 = vadd.f32 %v3736_v17, %v3735_v4 }
 0x6ac   :  { %v3738_v20 = vpop.f32.mrf.mxu0 }
 0x6ad   :  { %v2418_v26 = vmul.f32 %v6721_v6, %v3737_v8 }
 0x6ae   :  { %v3739_v13 = vpop.f32.mrf.mxu0 }
 0x6af   :  { %v2445_v59 = vpack.c.bf16 %v2418_v26, %v2417_v7  ;;  %v3740_v36 = vadd.f32 %v3739_v13, %v3738_v20  ;;  %v6730_v20 = vld [vmem:[#allocation31_spill] sm:$0xff]  ;;  %v6731_v7 = vld [vmem:[#allocation73_spill] sm:$0xff] }
 0x6b0   :  { %v3741_v43 = vpop.f32.mrf.mxu0 }
 0x6b1   :  { %2657 = vmatmul.mubr.bf16.gmra.mxu1 %v2445_v59  ;;  %v2419_v34 = vmul.f32 %v6722_v38, %v3740_v36  ;;  %v6733_v38 = vld [vmem:[#allocation74_spill] sm:$0xff] }
 0x6b2   :  { %v3742_v25 = vpop.f32.mrf.mxu0  ;;  %2664 = vmatprep.mubr.bf16.mxu1 %v5827_v15 }
 0x6b3   :  { %v3743_v27 = vadd.f32 %v3742_v25, %v3741_v43 }
 0x6b4   :  { %v3744_v3 = vpop.f32.mrf.mxu0 }
 0x6b5   :  { %v2420_v2 = vmul.f32 %v6723_v50, %v3743_v27  ;;  %v6732_v27 = vld [vmem:[#allocation29_spill] sm:$0xff] }
 0x6b6   :  { %v3745_v14 = vpop.f32.mrf.mxu0 }
 0x6b7   :  { %v2446_v61 = vpack.c.bf16 %v2420_v2, %v2419_v34  ;;  %v3746_v37 = vadd.f32 %v3745_v14, %v3744_v3 }
 0x6b8   :  { %v3747_v30 = vpop.f32.mrf.mxu0 }
 0x6b9   :  { %2665 = vmatmul.mubr.bf16.gmra.mxu1 %v2446_v61  ;;  %v2421_v19 = vmul.f32 %v6724_v18, %v3746_v37 }
 0x6ba   :  { %v3748_v60 = vpop.f32.mrf.mxu0  ;;  %2672 = vmatprep.mubr.bf16.mxu1 %v5807_v45 }
 0x6bb   :  { %v3749_v33 = vadd.f32 %v3748_v60, %v3747_v30  ;;  %v6734_v60 = vld [vmem:[#allocation27_spill] sm:$0xff] }
 0x6bc   :  { %v3750_v5 = vpop.f32.mrf.mxu0 }
 0x6bd   :  { %v2422_v15 = vmul.f32 %v6725_v28, %v3749_v33 }
 0x6be   :  { %v3751_v53 = vpop.f32.mrf.mxu0 }
 0x6bf   :  { %v2447_v57 = vpack.c.bf16 %v2422_v15, %v2421_v19  ;;  %v3752_v10 = vadd.f32 %v3751_v53, %v3750_v5  ;;  %v6735_v5 = vld [vmem:[#allocation75_spill] sm:$0xff] }
 0x6c0   :  { %v3753_v44 = vpop.f32.mrf.mxu0 }
 0x6c1   :  { %2673 = vmatmul.mubr.bf16.gmra.mxu1 %v2447_v57  ;;  %v2423_v63 = vmul.f32 %v6726_v58, %v3752_v10  ;;  %v6736_v10 = vld [vmem:[#allocation25_spill] sm:$0xff] }
 0x6c2   :  { %v3754_v62 = vpop.f32.mrf.mxu0  ;;  %2680 = vmatprep.mubr.bf16.mxu1 %v5782_v29 }
 0x6c3   :  { %v3755_v39 = vadd.f32 %v3754_v62, %v3753_v44 }
 0x6c4   :  { %v3756_v49 = vpop.f32.mrf.mxu0 }
 0x6c5   :  { %v2424_v45 = vmul.f32 %v6727_v56, %v3755_v39  ;;  %v6737_v39 = vld [vmem:[#allocation76_spill] sm:$0xff] }
 0x6c6   :  { %v3757_v23 = vpop.f32.mrf.mxu0 }
 0x6c7   :  { %v2448_v1 = vpack.c.bf16 %v2424_v45, %v2423_v63  ;;  %v3758_v31 = vadd.f32 %v3757_v23, %v3756_v49 }
 0x6c8   :  { %v3759_v24 = vpop.f32.mrf.mxu0 }
 0x6c9   :  { %2681 = vmatmul.mubr.bf16.gmra.mxu1 %v2448_v1  ;;  %v2425_v54 = vmul.f32 %v6728_v55, %v3758_v31 }
 0x6ca   :  { %v3760_v41 = vpop.f32.mrf.mxu0  ;;  %2688 = vmatprep.mubr.bf16.mxu1 %v5871_v40 }
 0x6cb   :  { %v3761_v52 = vadd.f32 %v3760_v41, %v3759_v24  ;;  %v6738_v24 = vld [vmem:[#allocation22_spill] sm:$0xff]  ;;  %v6739_v41 = vld [vmem:[#allocation77_spill] sm:$0xff] }
 0x6cc   :  { %v3762_v22 = vpop.f32.mrf.mxu0 }
 0x6cd   :  { %v2426_v29 = vmul.f32 %v6729_v42, %v3761_v52 }
 0x6ce   :  { %v3763_v48 = vpop.f32.mrf.mxu0 }
 0x6cf   :  { %v2449_v32 = vpack.c.bf16 %v2426_v29, %v2425_v54  ;;  %v3764_v4 = vadd.f32 %v3763_v48, %v3762_v22 }
 0x6d0   :  { %v3765_v46 = vpop.f32.mrf.mxu0 }
 0x6d1   :  { %2689 = vmatmul.mubr.bf16.gmra.mxu1 %v2449_v32  ;;  %v2427_v12 = vmul.f32 %v6730_v20, %v3764_v4  ;;  %v6740_v32 = vld [vmem:[#allocation20_spill] sm:$0xff]  ;;  %v6741_v4 = vld [vmem:[#allocation78_spill] sm:$0xff] }
 0x6d2   :  { %v3766_v47 = vpop.f32.mrf.mxu0  ;;  %2696 = vmatprep.mubr.bf16.mxu1 %v5865_v35 }
 0x6d3   :  { %v3767_v17 = vadd.f32 %v3766_v47, %v3765_v46 }
 0x6d4   :  { %v3768_v8 = vpop.f32.mrf.mxu0 }
 0x6d5   :  { %v2428_v40 = vmul.f32 %v6731_v7, %v3767_v17 }
 0x6d6   :  { %v3769_v6 = vpop.f32.mrf.mxu0 }
 0x6d7   :  { %v2450_v26 = vpack.c.bf16 %v2428_v40, %v2427_v12  ;;  %v3770_v59 = vadd.f32 %v3769_v6, %v3768_v8  ;;  %v6742_v40 = vld [vmem:[#allocation18_spill] sm:$0xff] }
 0x6d8   :  { %v3771_v13 = vpop.f32.mrf.mxu0 }
 0x6d9   :  { %2697 = vmatmul.mubr.bf16.gmra.mxu1 %v2450_v26  ;;  %v2429_v3 = vmul.f32 %v6732_v27, %v3770_v59  ;;  %v6743_v26 = vld [vmem:[#allocation79_spill] sm:$0xff]  ;;  %v6744_v59 = vlaneseq  ;;  %v5960_v27 = vld [vmem:[%s6396_s11] ss:$0 sm:$0xff]  ;;  %s4311_s11 = smov [#allocation11]  }
 0x6da   :  { %v3772_v43 = vpop.f32.mrf.mxu0  ;;  %2704 = vmatprep.mubr.bf16.mxu1 %v5858_v51  ;;  %s3177_s20 = sshll.u32 %s4311_s11, 4  ;;  %s3178_s20 = int_to_ptr.vmem [resolvable:$true] %s3177_s20 }
 0x6db   :  { %v3773_v36 = vadd.f32 %v3772_v43, %v3771_v13  ;;  %v5955_v43 = vand.u32 127, %v6744_v59  ;;  %s4272_s21 = scalar_lea.vmem %s3178_s20, 4096  ;;  %p4277_p12 = scmp.lt.s32.totalorder %s3178_s20, %s3178_s20 }
 0x6dc   :  { %v3774_v25 = vpop.f32.mrf.mxu0  ;;  %p4273_p11 = scmp.ne.s32.totalorder %s3178_s20, %s4272_s21  ;;  %p4278_p13 = scmp.lt.s32.totalorder %s4272_s21, %s4272_s21 }
 0x6dd   :  { %v2430_v35 = vmul.f32 %v6733_v38, %v3773_v36  ;;  %vm2755_vm0 = vcmp.lt.s32.totalorder %v5955_v43, 8 }
 0x6de   :  { %v3775_v34 = vpop.f32.mrf.mxu0  ;;  %p4279_p0 = por %p4278_p13, %p4277_p12 }
 0x6df   :  { %v2451_v50 = vpack.c.bf16 %v2430_v35, %v2429_v3  ;;  %v3776_v14 = vadd.f32 %v3775_v34, %v3774_v25 }
 0x6e0   :  { %v3777_v2 = vpop.f32.mrf.mxu0  ;;  %p4280_p1 = pnand %p4279_p0, %p4273_p11 }
 0x6e1   :  { %2705 = vmatmul.mubr.bf16.gmra.mxu1 %v2451_v50  ;;  %v2431_v33 = vmul.f32 %v6734_v60, %v3776_v14 }
 0x6e2   :  { %v3778_v61 = vpop.f32.mrf.mxu0  ;;  %2712 = vmatprep.mubr.bf16.mxu1 %v5847_v21 }
 0x6e3   :  { %v3779_v30 = vadd.f32 %v3778_v61, %v3777_v2 }
 0x6e4   :  { %v3780_v37 = vpop.f32.mrf.mxu0 }
 0x6e5   :  { %v2432_v51 = vmul.f32 %v6735_v5, %v3779_v30 }
 0x6e6   :  { %v3781_v18 = vpop.f32.mrf.mxu0 }
 0x6e7   :  { %v2452_v19 = vpack.c.bf16 %v2432_v51, %v2431_v33  ;;  %v3782_v15 = vadd.f32 %v3781_v18, %v3780_v37 }
 0x6e8   :  { %v3783_v28 = vpop.f32.mrf.mxu0 }
 0x6e9   :  { %2713 = vmatmul.mubr.bf16.gmra.mxu1 %v2452_v19  ;;  %v2433_v62 = vmul.f32 %v6736_v10, %v3782_v15 }
 0x6ea   :  { %v3784_v53 = vpop.f32.mrf.mxu0  ;;  %2720 = vmatprep.mubr.bf16.mxu1 %v5813_v9 }
 0x6eb   :  { %v3785_v57 = vadd.f32 %v3784_v53, %v3783_v28 }
 0x6ec   :  { %v3786_v44 = vpop.f32.mrf.mxu0 }
 0x6ed   :  { %v2434_v21 = vmul.f32 %v6737_v39, %v3785_v57 }
 0x6ee   :  { %v3787_v49 = vpop.f32.mrf.mxu0 }
 0x6ef   :  { %v2453_v58 = vpack.c.bf16 %v2434_v21, %v2433_v62  ;;  %v3788_v56 = vadd.f32 %v3787_v49, %v3786_v44 }
 0x6f0   :  { %v3789_v63 = vpop.f32.mrf.mxu0 }
 0x6f1   :  { %2721 = vmatmul.mubr.bf16.gmra.mxu1 %v2453_v58  ;;  %v2435_v31 = vmul.f32 %v6738_v24, %v3788_v56 }
 0x6f2   :  { %v3790_v45 = vpop.f32.mrf.mxu0  ;;  %2728 = vmatprep.mubr.bf16.mxu1 %v5809_v16 }
 0x6f3   :  { %v3791_v23 = vadd.f32 %v3790_v45, %v3789_v63 }
 0x6f4   :  { %v3792_v1 = vpop.f32.mrf.mxu0 }
 0x6f5   :  { %v2436_v9 = vmul.f32 %v6739_v41, %v3791_v23 }
 0x6f6   :  { %v3793_v52 = vpop.f32.mrf.mxu0 }
 0x6f7   :  { %v2454_v22 = vpack.c.bf16 %v2436_v9, %v2435_v31  ;;  %v3794_v54 = vadd.f32 %v3793_v52, %v3792_v1 }
 0x6f8   :  { %v3795_v55 = vpop.f32.mrf.mxu0 }
 0x6f9   :  { %2729 = vmatmul.mubr.bf16.gmra.mxu1 %v2454_v22  ;;  %v2437_v46 = vmul.f32 %v6740_v32, %v3794_v54 }
 0x6fa   :  { %v3796_v42 = vpop.f32.mrf.mxu0  ;;  %2736 = vmatprep.mubr.bf16.mxu1 %v5801_v11 }
 0x6fb   :  { %v3797_v29 = vadd.f32 %v3796_v42, %v3795_v55 }
 0x6fc   :  { %v3798_v48 = vpop.f32.mrf.mxu0 }
 0x6fd   :  { %v2438_v16 = vmul.f32 %v6741_v4, %v3797_v29 }
 0x6fe   :  { %v3799_v47 = vpop.f32.mrf.mxu0 }
 0x6ff   :  { %v2455_v17 = vpack.c.bf16 %v2438_v16, %v2437_v46  ;;  %v3800_v20 = vadd.f32 %v3799_v47, %v3798_v48 }
 0x700   :  { %v3801_v8 = vpop.f32.mrf.mxu0 }
 0x701   :  { %2737 = vmatmul.mubr.bf16.gmra.mxu1 %v2455_v17  ;;  %v2439_v6 = vmul.f32 %v6742_v40, %v3800_v20 }
 0x702   :  { %v3802_v12 = vpop.f32.mrf.mxu0  ;;  %2744 = vmatprep.mubr.bf16.mxu1 %v5786_v0 }
 0x703   :  { %v3803_v7 = vadd.f32 %v3802_v12, %v3801_v8 }
 0x705   :  { %v2440_v13 = vmul.f32 %v6743_v26, %v3803_v7 }
 0x707   :  { %v2456_v11 = vpack.c.bf16 %v2440_v13, %v2439_v6 }
 0x709   :  { %2745 = vmatmul.mubr.bf16.gmra.mxu1 %v2456_v11 }
 0x751   :  { %v3820_v36 = vpop.f32.mrf.mxu1 }
 0x753   :  { %v3821_v25 = vpop.f32.mrf.mxu1 }
 0x754   :  { %v3822_v3 = vadd.f32 %v3821_v25, %v3820_v36 }
 0x755   :  { %v3823_v0 = vpop.f32.mrf.mxu1 }
 0x756   :  { %v2627_v38 = vadd.f32 %v3822_v3, %v5960_v27 }
 0x757   :  { %v3824_v35 = vpop.f32.mrf.mxu1 }
 0x758   :  { %v3825_v34 = vadd.f32 %v3824_v35, %v3823_v0  ;;  %v5966_v50 = vsel %vm2755_vm0, %v2627_v38, -1e+30 }
 0x759   :  { %v3826_v2 = vpop.f32.mrf.mxu1  ;;  %2788 = vmax.xlane.f32.xlu0 %v5966_v50 }
 0x75a   :  { %v2630_v14 = vadd.f32 %v3825_v34, %v5960_v27 }
 0x75b   :  { %v3827_v61 = vpop.f32.mrf.mxu1 }
 0x75c   :  { %v3828_v30 = vadd.f32 %v3827_v61, %v3826_v2  ;;  %v5972_v37 = vsel %vm2755_vm0, %v2630_v14, -1e+30 }
 0x75d   :  { %v3829_v60 = vpop.f32.mrf.mxu1  ;;  %2790 = vmax.xlane.f32.xlu1 %v5972_v37 }
 0x75e   :  { %v2635_v33 = vadd.f32 %v3828_v30, %v5960_v27 }
 0x75f   :  { %v3830_v5 = vpop.f32.mrf.mxu1 }
 0x760   :  { %v3831_v51 = vadd.f32 %v3830_v5, %v3829_v60  ;;  %v5978_v18 = vsel %vm2755_vm0, %v2635_v33, -1e+30 }
 0x761   :  { %v3832_v19 = vpop.f32.mrf.mxu1  ;;  %2792 = vmax.xlane.f32.xlu0 %v5978_v18 }
 0x762   :  { %v2638_v28 = vadd.f32 %v3831_v51, %v5960_v27 }
 0x763   :  { %v3833_v15 = vpop.f32.mrf.mxu1 }
 0x764   :  { %v3834_v53 = vadd.f32 %v3833_v15, %v3832_v19  ;;  %v5984_v57 = vsel %vm2755_vm0, %v2638_v28, -1e+30 }
 0x765   :  { %v3835_v44 = vpop.f32.mrf.mxu1  ;;  %2794 = vmax.xlane.f32.xlu1 %v5984_v57 }
 0x766   :  { %v2643_v10 = vadd.f32 %v3834_v53, %v5960_v27 }
 0x767   :  { %v3836_v62 = vpop.f32.mrf.mxu1 }
 0x768   :  { %v3837_v39 = vadd.f32 %v3836_v62, %v3835_v44  ;;  %v5990_v21 = vsel %vm2755_vm0, %v2643_v10, -1e+30 }
 0x769   :  { %v3838_v49 = vpop.f32.mrf.mxu1  ;;  %2796 = vmax.xlane.f32.xlu0 %v5990_v21 }
 0x76a   :  { %v2646_v58 = vadd.f32 %v3837_v39, %v5960_v27 }
 0x76b   :  { %v3839_v63 = vpop.f32.mrf.mxu1 }
 0x76c   :  { %v3840_v56 = vadd.f32 %v3839_v63, %v3838_v49  ;;  %v5996_v45 = vsel %vm2755_vm0, %v2646_v58, -1e+30 }
 0x76d   :  { %v3841_v23 = vpop.f32.mrf.mxu1  ;;  %2798 = vmax.xlane.f32.xlu1 %v5996_v45 }
 0x76e   :  { %v2651_v1 = vadd.f32 %v3840_v56, %v5960_v27 }
 0x76f   :  { %v3842_v24 = vpop.f32.mrf.mxu1 }
 0x770   :  { %v3843_v31 = vadd.f32 %v3842_v24, %v3841_v23  ;;  %v6002_v41 = vsel %vm2755_vm0, %v2651_v1, -1e+30 }
 0x771   :  { %v3844_v9 = vpop.f32.mrf.mxu1  ;;  %2800 = vmax.xlane.f32.xlu0 %v6002_v41 }
 0x772   :  { %v2654_v52 = vadd.f32 %v3843_v31, %v5960_v27 }
 0x773   :  { %v3845_v22 = vpop.f32.mrf.mxu1 }
 0x774   :  { %v3846_v55 = vadd.f32 %v3845_v22, %v3844_v9  ;;  %v6008_v54 = vsel %vm2755_vm0, %v2654_v52, -1e+30 }
 0x775   :  { %v3847_v42 = vpop.f32.mrf.mxu1  ;;  %2802 = vmax.xlane.f32.xlu1 %v6008_v54 }
 0x776   :  { %v2659_v29 = vadd.f32 %v3846_v55, %v5960_v27 }
 0x777   :  { %v3848_v48 = vpop.f32.mrf.mxu1 }
 0x778   :  { %v3849_v32 = vadd.f32 %v3848_v48, %v3847_v42  ;;  %v6014_v46 = vsel %vm2755_vm0, %v2659_v29, -1e+30 }
 0x779   :  { %v3850_v4 = vpop.f32.mrf.mxu1  ;;  %2804 = vmax.xlane.f32.xlu0 %v6014_v46 }
 0x77a   :  { %v2662_v16 = vadd.f32 %v3849_v32, %v5960_v27 }
 0x77b   :  { %v3851_v47 = vpop.f32.mrf.mxu1 }
 0x77c   :  { %v3852_v17 = vadd.f32 %v3851_v47, %v3850_v4  ;;  %v6020_v8 = vsel %vm2755_vm0, %v2662_v16, -1e+30 }
 0x77d   :  { %v3853_v20 = vpop.f32.mrf.mxu1  ;;  %2806 = vmax.xlane.f32.xlu1 %v6020_v8 }
 0x77e   :  { %v2667_v12 = vadd.f32 %v3852_v17, %v5960_v27 }
 0x77f   :  { %v3854_v7 = vpop.f32.mrf.mxu1 }
 0x780   :  { %v3855_v40 = vadd.f32 %v3854_v7, %v3853_v20  ;;  %v6026_v6 = vsel %vm2755_vm0, %v2667_v12, -1e+30 }
 0x781   :  { %v3856_v26 = vpop.f32.mrf.mxu1  ;;  %2808 = vmax.xlane.f32.xlu0 %v6026_v6 }
 0x782   :  { %v2670_v13 = vadd.f32 %v3855_v40, %v5960_v27 }
 0x783   :  { %v3857_v11 = vpop.f32.mrf.mxu1 }
 0x784   :  { %v3858_v59 = vadd.f32 %v3857_v11, %v3856_v26  ;;  %v6032_v36 = vsel %vm2755_vm0, %v2670_v13, -1e+30 }
 0x785   :  { %v3859_v25 = vpop.f32.mrf.mxu1  ;;  %2810 = vmax.xlane.f32.xlu1 %v6032_v36 }
 0x786   :  { %v2675_v3 = vadd.f32 %v3858_v59, %v5960_v27 }
 0x787   :  { %v3860_v0 = vpop.f32.mrf.mxu1 }
 0x788   :  { %v3861_v38 = vadd.f32 %v3860_v0, %v3859_v25  ;;  %v6038_v35 = vsel %vm2755_vm0, %v2675_v3, -1e+30 }
 0x789   :  { %v3862_v34 = vpop.f32.mrf.mxu1  ;;  %2812 = vmax.xlane.f32.xlu0 %v6038_v35 }
 0x78a   :  { %v2678_v2 = vadd.f32 %v3861_v38, %v5960_v27 }
 0x78b   :  { %v3863_v14 = vpop.f32.mrf.mxu1 }
 0x78c   :  { %v3864_v61 = vadd.f32 %v3863_v14, %v3862_v34  ;;  %v6044_v30 = vsel %vm2755_vm0, %v2678_v2, -1e+30 }
 0x78d   :  { %v3865_v60 = vpop.f32.mrf.mxu1  ;;  %2814 = vmax.xlane.f32.xlu1 %v6044_v30 }
 0x78e   :  { %v2683_v33 = vadd.f32 %v3864_v61, %v5960_v27 }
 0x78f   :  { %v3866_v5 = vpop.f32.mrf.mxu1 }
 0x790   :  { %v3867_v51 = vadd.f32 %v3866_v5, %v3865_v60  ;;  %v6050_v19 = vsel %vm2755_vm0, %v2683_v33, -1e+30 }
 0x791   :  { %v3868_v28 = vpop.f32.mrf.mxu1  ;;  %2816 = vmax.xlane.f32.xlu0 %v6050_v19 }
 0x792   :  { %v2686_v15 = vadd.f32 %v3867_v51, %v5960_v27 }
 0x793   :  { %v3869_v53 = vpop.f32.mrf.mxu1 }
 0x794   :  { %v3870_v44 = vadd.f32 %v3869_v53, %v3868_v28  ;;  %v6056_v10 = vsel %vm2755_vm0, %v2686_v15, -1e+30 }
 0x795   :  { %v3871_v62 = vpop.f32.mrf.mxu1  ;;  %2818 = vmax.xlane.f32.xlu1 %v6056_v10 }
 0x796   :  { %v2691_v39 = vadd.f32 %v3870_v44, %v5960_v27 }
 0x797   :  { %v3872_v49 = vpop.f32.mrf.mxu1 }
 0x798   :  { %v3873_v58 = vadd.f32 %v3872_v49, %v3871_v62  ;;  %v6062_v63 = vsel %vm2755_vm0, %v2691_v39, -1e+30 }
 0x799   :  { %v3874_v56 = vpop.f32.mrf.mxu1  ;;  %2820 = vmax.xlane.f32.xlu0 %v6062_v63 }
 0x79a   :  { %v2694_v23 = vadd.f32 %v3873_v58, %v5960_v27 }
 0x79b   :  { %v3875_v1 = vpop.f32.mrf.mxu1 }
 0x79c   :  { %v3876_v24 = vadd.f32 %v3875_v1, %v3874_v56  ;;  %v6068_v31 = vsel %vm2755_vm0, %v2694_v23, -1e+30 }
 0x79d   :  { %v3877_v9 = vpop.f32.mrf.mxu1  ;;  %2822 = vmax.xlane.f32.xlu1 %v6068_v31 }
 0x79e   :  { %v2699_v52 = vadd.f32 %v3876_v24, %v5960_v27 }
 0x79f   :  { %v3878_v22 = vpop.f32.mrf.mxu1 }
 0x7a0   :  { %v3879_v55 = vadd.f32 %v3878_v22, %v3877_v9  ;;  %v6074_v42 = vsel %vm2755_vm0, %v2699_v52, -1e+30 }
 0x7a1   :  { %v3880_v29 = vpop.f32.mrf.mxu1  ;;  %2824 = vmax.xlane.f32.xlu0 %v6074_v42 }
 0x7a2   :  { %v2702_v48 = vadd.f32 %v3879_v55, %v5960_v27 }
 0x7a3   :  { %v3881_v32 = vpop.f32.mrf.mxu1 }
 0x7a4   :  { %v3882_v4 = vadd.f32 %v3881_v32, %v3880_v29  ;;  %v6080_v16 = vsel %vm2755_vm0, %v2702_v48, -1e+30 }
 0x7a5   :  { %v3883_v47 = vpop.f32.mrf.mxu1  ;;  %2826 = vmax.xlane.f32.xlu1 %v6080_v16 }
 0x7a6   :  { %v2707_v17 = vadd.f32 %v3882_v4, %v5960_v27 }
 0x7a7   :  { %v3884_v20 = vpop.f32.mrf.mxu1 }
 0x7a8   :  { %v3885_v12 = vadd.f32 %v3884_v20, %v3883_v47  ;;  %v6086_v7 = vsel %vm2755_vm0, %v2707_v17, -1e+30 }
 0x7a9   :  { %v3886_v40 = vpop.f32.mrf.mxu1  ;;  %2828 = vmax.xlane.f32.xlu0 %v6086_v7 }
 0x7aa   :  { %v2710_v26 = vadd.f32 %v3885_v12, %v5960_v27 }
 0x7ab   :  { %v3887_v13 = vpop.f32.mrf.mxu1 }
 0x7ac   :  { %v3888_v11 = vadd.f32 %v3887_v13, %v3886_v40  ;;  %v6092_v59 = vsel %vm2755_vm0, %v2710_v26, -1e+30 }
 0x7ad   :  { %v3889_v25 = vpop.f32.mrf.mxu1  ;;  %2830 = vmax.xlane.f32.xlu1 %v6092_v59 }
 0x7ae   :  { %v2715_v3 = vadd.f32 %v3888_v11, %v5960_v27 }
 0x7af   :  { %v3890_v0 = vpop.f32.mrf.mxu1 }
 0x7b0   :  { %v3891_v38 = vadd.f32 %v3890_v0, %v3889_v25  ;;  %v6098_v34 = vsel %vm2755_vm0, %v2715_v3, -1e+30 }
 0x7b1   :  { %v3892_v2 = vpop.f32.mrf.mxu1  ;;  %2832 = vmax.xlane.f32.xlu0 %v6098_v34 }
 0x7b2   :  { %v2718_v14 = vadd.f32 %v3891_v38, %v5960_v27 }
 0x7b3   :  { %v3893_v61 = vpop.f32.mrf.mxu1 }
 0x7b4   :  { %v3894_v60 = vadd.f32 %v3893_v61, %v3892_v2  ;;  %v6104_v33 = vsel %vm2755_vm0, %v2718_v14, -1e+30 }
 0x7b5   :  { %v3895_v5 = vpop.f32.mrf.mxu1  ;;  %2834 = vmax.xlane.f32.xlu1 %v6104_v33 }
 0x7b6   :  { %v2723_v51 = vadd.f32 %v3894_v60, %v5960_v27 }
 0x7b7   :  { %v3896_v28 = vpop.f32.mrf.mxu1 }
 0x7b8   :  { %v3897_v15 = vadd.f32 %v3896_v28, %v3895_v5  ;;  %v6110_v53 = vsel %vm2755_vm0, %v2723_v51, -1e+30 }
 0x7b9   :  { %v3898_v44 = vpop.f32.mrf.mxu1  ;;  %2836 = vmax.xlane.f32.xlu0 %v6110_v53 }
 0x7ba   :  { %v2726_v62 = vadd.f32 %v3897_v15, %v5960_v27 }
 0x7bb   :  { %v3899_v39 = vpop.f32.mrf.mxu1 }
 0x7bc   :  { %v3900_v49 = vadd.f32 %v3899_v39, %v3898_v44  ;;  %v6116_v58 = vsel %vm2755_vm0, %v2726_v62, -1e+30 }
 0x7bd   :  { %v3901_v56 = vpop.f32.mrf.mxu1  ;;  %2838 = vmax.xlane.f32.xlu1 %v6116_v58 }
 0x7be   :  { %v2731_v23 = vadd.f32 %v3900_v49, %v5960_v27 }
 0x7bf   :  { %v3902_v1 = vpop.f32.mrf.mxu1 }
 0x7c0   :  { %v3903_v24 = vadd.f32 %v3902_v1, %v3901_v56  ;;  %v6122_v9 = vsel %vm2755_vm0, %v2731_v23, -1e+30 }
 0x7c1   :  { %v3904_v52 = vpop.f32.mrf.mxu1  ;;  %2840 = vmax.xlane.f32.xlu0 %v6122_v9 }
 0x7c2   :  { %v2734_v22 = vadd.f32 %v3903_v24, %v5960_v27 }
 0x7c3   :  { %v3905_v55 = vpop.f32.mrf.mxu1 }
 0x7c4   :  { %v3906_v29 = vadd.f32 %v3905_v55, %v3904_v52  ;;  %v6128_v48 = vsel %vm2755_vm0, %v2734_v22, -1e+30 }
 0x7c5   :  { %v3907_v32 = vpop.f32.mrf.mxu1  ;;  %2842 = vmax.xlane.f32.xlu1 %v6128_v48 }
 0x7c6   :  { %v2739_v4 = vadd.f32 %v3906_v29, %v5960_v27 }
 0x7c7   :  { %v3908_v47 = vpop.f32.mrf.mxu1 }
 0x7c8   :  { %v3909_v17 = vadd.f32 %v3908_v47, %v3907_v32  ;;  %v6134_v20 = vsel %vm2755_vm0, %v2739_v4, -1e+30 }
 0x7c9   :  { %v3910_v12 = vpop.f32.mrf.mxu1  ;;  %2844 = vmax.xlane.f32.xlu0 %v6134_v20 }
 0x7ca   :  { %v2742_v40 = vadd.f32 %v3909_v17, %v5960_v27 }
 0x7cb   :  { %v3911_v26 = vpop.f32.mrf.mxu1 }
 0x7cc   :  { %v3912_v13 = vadd.f32 %v3911_v26, %v3910_v12  ;;  %v6140_v11 = vsel %vm2755_vm0, %v2742_v40, -1e+30 }
 0x7cd   :  { %v3913_v25 = vpop.f32.mrf.mxu1  ;;  %2846 = vmax.xlane.f32.xlu1 %v6140_v11 }
 0x7ce   :  { %v2747_v3 = vadd.f32 %v3912_v13, %v5960_v27 }
 0x7cf   :  { %v3914_v0 = vpop.f32.mrf.mxu1 }
 0x7d0   :  { %v3915_v38 = vadd.f32 %v3914_v0, %v3913_v25  ;;  %v6146_v2 = vsel %vm2755_vm0, %v2747_v3, -1e+30 }
 0x7d1   :  { %2848 = vmax.xlane.f32.xlu0 %v6146_v2 }
 0x7d2   :  { %v2750_v14 = vadd.f32 %v3915_v38, %v5960_v27 }
 0x7d4   :  { %v6152_v61 = vsel %vm2755_vm0, %v2750_v14, -1e+30 }
 0x7d5   :  { %2850 = vmax.xlane.f32.xlu1 %v6152_v61 }
 0x7e2   :  { %v2789_v60 = vpop.xlane.xlu0 %2788 }
 0x7e3   :  { %v6156_v5 = vsub.f32 %v5966_v50, %v2789_v60 }
 0x7e5   :  { %v2884_v51 = vmul.f32 1.442695, %v6156_v5 }
 0x7e6   :  { %v2791_v28 = vpop.xlane.xlu1 %2790 }
 0x7e7   :  { %4044 = vpow2.f32 %v2884_v51  ;;  %v6160_v15 = vsub.f32 %v5972_v37, %v2791_v28 }
 0x7e9   :  { %v2886_v44 = vmul.f32 1.442695, %v6160_v15 }
 0x7ea   :  { %v2793_v27 = vpop.xlane.xlu0 %2792 }
 0x7eb   :  { %4046 = vpow2.f32 %v2886_v44  ;;  %v6164_v62 = vsub.f32 %v5978_v18, %v2793_v27 }
 0x7ed   :  { %v2888_v39 = vmul.f32 1.442695, %v6164_v62 }
 0x7ee   :  { %v2795_v49 = vpop.xlane.xlu1 %2794 }
 0x7ef   :  { %4048 = vpow2.f32 %v2888_v39  ;;  %v6168_v50 = vsub.f32 %v5984_v57, %v2795_v49 }
 0x7f1   :  { %v2890_v56 = vmul.f32 1.442695, %v6168_v50 }
 0x7f2   :  { %v2797_v23 = vpop.xlane.xlu0 %2796 }
 0x7f3   :  { %4050 = vpow2.f32 %v2890_v56  ;;  %v6172_v37 = vsub.f32 %v5990_v21, %v2797_v23 }
 0x7f4   :  { %v4045_v1 = vpop.eup %4044 }
 0x7f5   :  { %v2892_v24 = vmul.f32 1.442695, %v6172_v37  ;;  %2948 = vadd.xlane.f32.xlu0 %v4045_v1 }
 0x7f6   :  { %v2799_v18 = vpop.xlane.xlu1 %2798 }
 0x7f7   :  { %4052 = vpow2.f32 %v2892_v24  ;;  %v6176_v52 = vsub.f32 %v5996_v45, %v2799_v18 }
 0x7f8   :  { %v4047_v22 = vpop.eup %4046 }
 0x7f9   :  { %v2894_v57 = vmul.f32 1.442695, %v6176_v52  ;;  %2950 = vadd.xlane.f32.xlu1 %v4047_v22 }
 0x7fa   :  { %v2801_v55 = vpop.xlane.xlu0 %2800 }
 0x7fb   :  { %4054 = vpow2.f32 %v2894_v57  ;;  %v6180_v29 = vsub.f32 %v6002_v41, %v2801_v55 }
 0x7fc   :  { %v4049_v21 = vpop.eup %4048 }
 0x7fd   :  { %v2896_v32 = vmul.f32 1.442695, %v6180_v29  ;;  %2952 = vadd.xlane.f32.xlu0 %v4049_v21 }
 0x7fe   :  { %v2803_v4 = vpop.xlane.xlu1 %2802 }
 0x7ff   :  { %4056 = vpow2.f32 %v2896_v32  ;;  %v6184_v47 = vsub.f32 %v6008_v54, %v2803_v4 }
 0x800   :  { %v4051_v45 = vpop.eup %4050 }
 0x801   :  { %v2898_v17 = vmul.f32 1.442695, %v6184_v47  ;;  %2954 = vadd.xlane.f32.xlu1 %v4051_v45 }
 0x802   :  { %v2805_v12 = vpop.xlane.xlu0 %2804 }
 0x803   :  { %4058 = vpow2.f32 %v2898_v17  ;;  %v6188_v40 = vsub.f32 %v6014_v46, %v2805_v12 }
 0x804   :  { %v4053_v41 = vpop.eup %4052 }
 0x805   :  { %v2900_v26 = vmul.f32 1.442695, %v6188_v40  ;;  %2956 = vadd.xlane.f32.xlu0 %v4053_v41 }
 0x806   :  { %v2807_v13 = vpop.xlane.xlu1 %2806 }
 0x807   :  { %4060 = vpow2.f32 %v2900_v26  ;;  %v6192_v25 = vsub.f32 %v6020_v8, %v2807_v13 }
 0x808   :  { %v4055_v54 = vpop.eup %4054 }
 0x809   :  { %v2902_v3 = vmul.f32 1.442695, %v6192_v25  ;;  %2958 = vadd.xlane.f32.xlu1 %v4055_v54 }
 0x80a   :  { %v2809_v0 = vpop.xlane.xlu0 %2808 }
 0x80b   :  { %4062 = vpow2.f32 %v2902_v3  ;;  %v6196_v38 = vsub.f32 %v6026_v6, %v2809_v0 }
 0x80c   :  { %v4057_v46 = vpop.eup %4056 }
 0x80d   :  { %v2904_v14 = vmul.f32 1.442695, %v6196_v38  ;;  %2960 = vadd.xlane.f32.xlu0 %v4057_v46 }
 0x80e   :  { %v2811_v60 = vpop.xlane.xlu1 %2810 }
 0x80f   :  { %4064 = vpow2.f32 %v2904_v14  ;;  %v6200_v51 = vsub.f32 %v6032_v36, %v2811_v60 }
 0x810   :  { %v4059_v8 = vpop.eup %4058 }
 0x811   :  { %v2906_v28 = vmul.f32 1.442695, %v6200_v51  ;;  %2962 = vadd.xlane.f32.xlu1 %v4059_v8 }
 0x812   :  { %v2813_v44 = vpop.xlane.xlu0 %2812 }
 0x813   :  { %4066 = vpow2.f32 %v2906_v28  ;;  %v6204_v27 = vsub.f32 %v6038_v35, %v2813_v44 }
 0x814   :  { %v4061_v6 = vpop.eup %4060 }
 0x815   :  { %v2908_v39 = vmul.f32 1.442695, %v6204_v27  ;;  %2964 = vadd.xlane.f32.xlu0 %v4061_v6 }
 0x816   :  { %v2815_v49 = vpop.xlane.xlu1 %2814 }
 0x817   :  { %4068 = vpow2.f32 %v2908_v39  ;;  %v6208_v56 = vsub.f32 %v6044_v30, %v2815_v49 }
 0x818   :  { %v4063_v36 = vpop.eup %4062 }
 0x819   :  { %v2910_v23 = vmul.f32 1.442695, %v6208_v56  ;;  %2966 = vadd.xlane.f32.xlu1 %v4063_v36 }
 0x81a   :  { %v2817_v1 = vpop.xlane.xlu0 %2816 }
 0x81b   :  { %4070 = vpow2.f32 %v2910_v23  ;;  %v6212_v24 = vsub.f32 %v6050_v19, %v2817_v1 }
 0x81c   :  { %v4065_v35 = vpop.eup %4064 }
 0x81d   :  { %v2912_v18 = vmul.f32 1.442695, %v6212_v24  ;;  %2968 = vadd.xlane.f32.xlu0 %v4065_v35 }
 0x81e   :  { %v2819_v22 = vpop.xlane.xlu1 %2818 }
 0x81f   :  { %4072 = vpow2.f32 %v2912_v18  ;;  %v6216_v57 = vsub.f32 %v6056_v10, %v2819_v22 }
 0x820   :  { %v4067_v30 = vpop.eup %4066 }
 0x821   :  { %v2914_v55 = vmul.f32 1.442695, %v6216_v57  ;;  %2970 = vadd.xlane.f32.xlu1 %v4067_v30 }
 0x822   :  { %v2821_v21 = vpop.xlane.xlu0 %2820 }
 0x823   :  { %4074 = vpow2.f32 %v2914_v55  ;;  %v6220_v32 = vsub.f32 %v6062_v63, %v2821_v21 }
 0x824   :  { %v4069_v19 = vpop.eup %4068 }
 0x825   :  { %v2916_v4 = vmul.f32 1.442695, %v6220_v32  ;;  %2972 = vadd.xlane.f32.xlu0 %v4069_v19 }
 0x826   :  { %v2823_v45 = vpop.xlane.xlu1 %2822 }
 0x827   :  { %4076 = vpow2.f32 %v2916_v4  ;;  %v6224_v17 = vsub.f32 %v6068_v31, %v2823_v45 }
 0x828   :  { %v4071_v10 = vpop.eup %4070 }
 0x829   :  { %v2918_v12 = vmul.f32 1.442695, %v6224_v17  ;;  %2974 = vadd.xlane.f32.xlu1 %v4071_v10 }
 0x82a   :  { %v2825_v41 = vpop.xlane.xlu0 %2824 }
 0x82b   :  { %4078 = vpow2.f32 %v2918_v12  ;;  %v6228_v26 = vsub.f32 %v6074_v42, %v2825_v41 }
 0x82c   :  { %v4073_v63 = vpop.eup %4072 }
 0x82d   :  { %v2920_v13 = vmul.f32 1.442695, %v6228_v26  ;;  %2976 = vadd.xlane.f32.xlu0 %v4073_v63 }
 0x82e   :  { %v2827_v54 = vpop.xlane.xlu1 %2826 }
 0x82f   :  { %4080 = vpow2.f32 %v2920_v13  ;;  %v6232_v3 = vsub.f32 %v6080_v16, %v2827_v54 }
 0x830   :  { %v4075_v31 = vpop.eup %4074 }
 0x831   :  { %v2922_v0 = vmul.f32 1.442695, %v6232_v3  ;;  %2978 = vadd.xlane.f32.xlu1 %v4075_v31 }
 0x832   :  { %v2829_v46 = vpop.xlane.xlu0 %2828 }
 0x833   :  { %4082 = vpow2.f32 %v2922_v0  ;;  %v6236_v14 = vsub.f32 %v6086_v7, %v2829_v46 }
 0x834   :  { %v4077_v42 = vpop.eup %4076 }
 0x835   :  { %v2924_v60 = vmul.f32 1.442695, %v6236_v14  ;;  %2980 = vadd.xlane.f32.xlu0 %v4077_v42 }
 0x836   :  { %v2831_v8 = vpop.xlane.xlu1 %2830 }
 0x837   :  { %4084 = vpow2.f32 %v2924_v60  ;;  %v6240_v28 = vsub.f32 %v6092_v59, %v2831_v8 }
 0x838   :  { %v4079_v16 = vpop.eup %4078 }
 0x839   :  { %v2926_v44 = vmul.f32 1.442695, %v6240_v28  ;;  %2982 = vadd.xlane.f32.xlu1 %v4079_v16 }
 0x83a   :  { %v2833_v6 = vpop.xlane.xlu0 %2832 }
 0x83b   :  { %4086 = vpow2.f32 %v2926_v44  ;;  %v6244_v39 = vsub.f32 %v6098_v34, %v2833_v6 }
 0x83c   :  { %v4081_v7 = vpop.eup %4080 }
 0x83d   :  { %v2928_v49 = vmul.f32 1.442695, %v6244_v39  ;;  %2984 = vadd.xlane.f32.xlu0 %v4081_v7 }
 0x83e   :  { %v2835_v36 = vpop.xlane.xlu1 %2834 }
 0x83f   :  { %4088 = vpow2.f32 %v2928_v49  ;;  %v6248_v23 = vsub.f32 %v6104_v33, %v2835_v36 }
 0x840   :  { %v4083_v59 = vpop.eup %4082 }
 0x841   :  { %v2930_v1 = vmul.f32 1.442695, %v6248_v23  ;;  %2986 = vadd.xlane.f32.xlu1 %v4083_v59 }
 0x842   :  { %v2837_v35 = vpop.xlane.xlu0 %2836 }
 0x843   :  { %4090 = vpow2.f32 %v2930_v1  ;;  %v6252_v18 = vsub.f32 %v6110_v53, %v2837_v35 }
 0x844   :  { %v4085_v34 = vpop.eup %4084 }
 0x845   :  { %v2932_v22 = vmul.f32 1.442695, %v6252_v18  ;;  %2988 = vadd.xlane.f32.xlu0 %v4085_v34 }
 0x846   :  { %v2839_v30 = vpop.xlane.xlu1 %2838 }
 0x847   :  { %4092 = vpow2.f32 %v2932_v22  ;;  %v6256_v55 = vsub.f32 %v6116_v58, %v2839_v30 }
 0x848   :  { %v4087_v33 = vpop.eup %4086 }
 0x849   :  { %v2934_v21 = vmul.f32 1.442695, %v6256_v55  ;;  %2990 = vadd.xlane.f32.xlu1 %v4087_v33 }
 0x84a   :  { %v2841_v19 = vpop.xlane.xlu0 %2840 }
 0x84b   :  { %4094 = vpow2.f32 %v2934_v21  ;;  %v6260_v4 = vsub.f32 %v6122_v9, %v2841_v19 }
 0x84c   :  { %v4089_v53 = vpop.eup %4088 }
 0x84d   :  { %v2936_v45 = vmul.f32 1.442695, %v6260_v4  ;;  %2992 = vadd.xlane.f32.xlu0 %v4089_v53 }
 0x84e   :  { %v2843_v10 = vpop.xlane.xlu1 %2842 }
 0x84f   :  { %4096 = vpow2.f32 %v2936_v45  ;;  %v6264_v12 = vsub.f32 %v6128_v48, %v2843_v10 }
 0x850   :  { %v4091_v58 = vpop.eup %4090 }
 0x851   :  { %v2938_v41 = vmul.f32 1.442695, %v6264_v12  ;;  %2994 = vadd.xlane.f32.xlu1 %v4091_v58 }
 0x852   :  { %v2845_v63 = vpop.xlane.xlu0 %2844 }
 0x853   :  { %4098 = vpow2.f32 %v2938_v41  ;;  %v6268_v13 = vsub.f32 %v6134_v20, %v2845_v63 }
 0x854   :  { %v4093_v9 = vpop.eup %4092 }
 0x855   :  { %v2940_v54 = vmul.f32 1.442695, %v6268_v13  ;;  %2996 = vadd.xlane.f32.xlu0 %v4093_v9 }
 0x856   :  { %v2847_v31 = vpop.xlane.xlu1 %2846 }
 0x857   :  { %4100 = vpow2.f32 %v2940_v54  ;;  %v6272_v0 = vsub.f32 %v6140_v11, %v2847_v31 }
 0x858   :  { %v4095_v48 = vpop.eup %4094 }
 0x859   :  { %v2942_v46 = vmul.f32 1.442695, %v6272_v0  ;;  %2998 = vadd.xlane.f32.xlu1 %v4095_v48 }
 0x85a   :  { %v2849_v42 = vpop.xlane.xlu0 %2848 }
 0x85b   :  { %4102 = vpow2.f32 %v2942_v46  ;;  %v6276_v60 = vsub.f32 %v6146_v2, %v2849_v42 }
 0x85c   :  { %v4097_v20 = vpop.eup %4096 }
 0x85d   :  { %v2944_v8 = vmul.f32 1.442695, %v6276_v60  ;;  %3000 = vadd.xlane.f32.xlu0 %v4097_v20 }
 0x85e   :  { %v2851_v16 = vpop.xlane.xlu1 %2850 }
 0x85f   :  { %4104 = vpow2.f32 %v2944_v8  ;;  %v6280_v44 = vsub.f32 %v6152_v61, %v2851_v16 }
 0x860   :  { %v4099_v11 = vpop.eup %4098 }
 0x861   :  { %v2946_v6 = vmul.f32 1.442695, %v6280_v44  ;;  %3002 = vadd.xlane.f32.xlu1 %v4099_v11 }
 0x863   :  { %4106 = vpow2.f32 %v2946_v6 }
 0x864   :  { %v4101_v7 = vpop.eup %4100 }
 0x865   :  { %3004 = vadd.xlane.f32.xlu0 %v4101_v7 }
 0x868   :  { %v4103_v49 = vpop.eup %4102 }
 0x869   :  { %3006 = vadd.xlane.f32.xlu1 %v4103_v49 }
 0x86c   :  { %v4105_v2 = vpop.eup %4104 }
 0x86d   :  { %3008 = vadd.xlane.f32.xlu0 %v4105_v2 }
 0x870   :  { %v4107_v36 = vpop.eup %4106 }
 0x871   :  { %3010 = vadd.xlane.f32.xlu1 %v4107_v36 }
 0x87e   :  { %v2949_v59 = vpop.xlane.xlu0 %2948 }
 0x87f   :  { %4108 = vlog2.f32 %v2949_v59 }
 0x882   :  { %v2951_v1 = vpop.xlane.xlu1 %2950 }
 0x883   :  { %4110 = vlog2.f32 %v2951_v1 }
 0x886   :  { %v2953_v35 = vpop.xlane.xlu0 %2952 }
 0x887   :  { %4112 = vlog2.f32 %v2953_v35 }
 0x88a   :  { %v2955_v61 = vpop.xlane.xlu1 %2954 }
 0x88b   :  { %4114 = vlog2.f32 %v2955_v61 }
 0x88c   :  { %v4109_v34 = vpop.eup %4108 }
 0x88d   :  { %v3013_v22 = vmul.f32 0.6931472, %v4109_v34 }
 0x88e   :  { %v2957_v30 = vpop.xlane.xlu0 %2956 }
 0x88f   :  { %v3076_v33 = vsub.f32 %v6156_v5, %v3013_v22  ;;  %4116 = vlog2.f32 %v2957_v30 }
 0x890   :  { %v4111_v21 = vpop.eup %4110 }
 0x891   :  { %v3108_v19 = vsel %vm2755_vm0, %v3076_v33, 0.0  ;;  %v3015_v53 = vmul.f32 0.6931472, %v4111_v21 }
 0x892   :  { %3140 = vst [vmem:[#allocation11] sm:$0xff] %v3108_v19  ;;  %v2959_v45 = vpop.xlane.xlu1 %2958 }
 0x893   :  { %v3077_v10 = vsub.f32 %v6160_v15, %v3015_v53  ;;  %4118 = vlog2.f32 %v2959_v45 }
 0x894   :  { %v4113_v58 = vpop.eup %4112 }
 0x895   :  { %v3109_v41 = vsel %vm2755_vm0, %v3077_v10, 0.0  ;;  %v3017_v63 = vmul.f32 0.6931472, %v4113_v58 }
 0x896   :  { %3141 = vst [vmem:[#allocation11 + $0x8] sm:$0xff] %v3109_v41  ;;  %v2961_v9 = vpop.xlane.xlu0 %2960 }
 0x897   :  { %v3078_v5 = vsub.f32 %v6164_v62, %v3017_v63  ;;  %4120 = vlog2.f32 %v2961_v9 }
 0x898   :  { %v4115_v54 = vpop.eup %4114 }
 0x899   :  { %v3110_v31 = vsel %vm2755_vm0, %v3078_v5, 0.0  ;;  %v3019_v48 = vmul.f32 0.6931472, %v4115_v54 }
 0x89a   :  { %3142 = vst [vmem:[#allocation11 + $0x10] sm:$0xff] %v3110_v31  ;;  %v2963_v46 = vpop.xlane.xlu1 %2962 }
 0x89b   :  { %v3079_v15 = vsub.f32 %v6168_v50, %v3019_v48  ;;  %4122 = vlog2.f32 %v2963_v46 }
 0x89c   :  { %v4117_v42 = vpop.eup %4116 }
 0x89d   :  { %v3111_v20 = vsel %vm2755_vm0, %v3079_v15, 0.0  ;;  %v3021_v8 = vmul.f32 0.6931472, %v4117_v42 }
 0x89e   :  { %3143 = vst [vmem:[#allocation11 + $0x18] sm:$0xff] %v3111_v20  ;;  %v2965_v16 = vpop.xlane.xlu0 %2964 }
 0x89f   :  { %v3080_v62 = vsub.f32 %v6172_v37, %v3021_v8  ;;  %4124 = vlog2.f32 %v2965_v16 }
 0x8a0   :  { %v4119_v11 = vpop.eup %4118 }
 0x8a1   :  { %v3112_v6 = vsel %vm2755_vm0, %v3080_v62, 0.0  ;;  %v3023_v7 = vmul.f32 0.6931472, %v4119_v11 }
 0x8a2   :  { %3144 = vst [vmem:[#allocation11 + $0x20] sm:$0xff] %v3112_v6  ;;  %v2967_v49 = vpop.xlane.xlu1 %2966 }
 0x8a3   :  { %v3081_v50 = vsub.f32 %v6176_v52, %v3023_v7  ;;  %4126 = vlog2.f32 %v2967_v49 }
 0x8a4   :  { %v4121_v2 = vpop.eup %4120 }
 0x8a5   :  { %v3113_v36 = vsel %vm2755_vm0, %v3081_v50, 0.0  ;;  %v3025_v59 = vmul.f32 0.6931472, %v4121_v2 }
 0x8a6   :  { %3145 = vst [vmem:[#allocation11 + $0x28] sm:$0xff] %v3113_v36  ;;  %v2969_v1 = vpop.xlane.xlu0 %2968 }
 0x8a7   :  { %v3082_v37 = vsub.f32 %v6180_v29, %v3025_v59  ;;  %4128 = vlog2.f32 %v2969_v1 }
 0x8a8   :  { %v4123_v35 = vpop.eup %4122 }
 0x8a9   :  { %v3114_v61 = vsel %vm2755_vm0, %v3082_v37, 0.0  ;;  %v3027_v34 = vmul.f32 0.6931472, %v4123_v35 }
 0x8aa   :  { %3146 = vst [vmem:[#allocation11 + $0x30] sm:$0xff] %v3114_v61  ;;  %v2971_v22 = vpop.xlane.xlu1 %2970 }
 0x8ab   :  { %v3083_v52 = vsub.f32 %v6184_v47, %v3027_v34  ;;  %4130 = vlog2.f32 %v2971_v22 }
 0x8ac   :  { %v4125_v30 = vpop.eup %4124 }
 0x8ad   :  { %v3115_v33 = vsel %vm2755_vm0, %v3083_v52, 0.0  ;;  %v3029_v21 = vmul.f32 0.6931472, %v4125_v30 }
 0x8ae   :  { %3147 = vst [vmem:[#allocation11 + $0x38] sm:$0xff] %v3115_v33  ;;  %v2973_v19 = vpop.xlane.xlu0 %2972 }
 0x8af   :  { %v3084_v29 = vsub.f32 %v6188_v40, %v3029_v21  ;;  %4132 = vlog2.f32 %v2973_v19 }
 0x8b0   :  { %v4127_v53 = vpop.eup %4126 }
 0x8b1   :  { %v3116_v45 = vsel %vm2755_vm0, %v3084_v29, 0.0  ;;  %v3031_v10 = vmul.f32 0.6931472, %v4127_v53 }
 0x8b2   :  { %3148 = vst [vmem:[#allocation11 + $0x40] sm:$0xff] %v3116_v45  ;;  %v2975_v58 = vpop.xlane.xlu1 %2974 }
 0x8b3   :  { %v3085_v47 = vsub.f32 %v6192_v25, %v3031_v10  ;;  %4134 = vlog2.f32 %v2975_v58 }
 0x8b4   :  { %v4129_v41 = vpop.eup %4128 }
 0x8b5   :  { %v3117_v63 = vsel %vm2755_vm0, %v3085_v47, 0.0  ;;  %v3033_v9 = vmul.f32 0.6931472, %v4129_v41 }
 0x8b6   :  { %3149 = vst [vmem:[#allocation11 + $0x48] sm:$0xff] %v3117_v63  ;;  %v2977_v5 = vpop.xlane.xlu0 %2976 }
 0x8b7   :  { %v3086_v40 = vsub.f32 %v6196_v38, %v3033_v9  ;;  %4136 = vlog2.f32 %v2977_v5 }
 0x8b8   :  { %v4131_v54 = vpop.eup %4130 }
 0x8b9   :  { %v3118_v31 = vsel %vm2755_vm0, %v3086_v40, 0.0  ;;  %v3035_v48 = vmul.f32 0.6931472, %v4131_v54 }
 0x8ba   :  { %3150 = vst [vmem:[#allocation11 + $0x50] sm:$0xff] %v3118_v31  ;;  %v2979_v46 = vpop.xlane.xlu1 %2978 }
 0x8bb   :  { %v3087_v25 = vsub.f32 %v6200_v51, %v3035_v48  ;;  %4138 = vlog2.f32 %v2979_v46 }
 0x8bc   :  { %v4133_v15 = vpop.eup %4132 }
 0x8bd   :  { %v3119_v42 = vsel %vm2755_vm0, %v3087_v25, 0.0  ;;  %v3037_v20 = vmul.f32 0.6931472, %v4133_v15 }
 0x8be   :  { %3151 = vst [vmem:[#allocation11 + $0x58] sm:$0xff] %v3119_v42  ;;  %v2981_v8 = vpop.xlane.xlu0 %2980 }
 0x8bf   :  { %v3088_v38 = vsub.f32 %v6204_v27, %v3037_v20  ;;  %4140 = vlog2.f32 %v2981_v8 }
 0x8c0   :  { %v4135_v16 = vpop.eup %4134 }
 0x8c1   :  { %v3120_v62 = vsel %vm2755_vm0, %v3088_v38, 0.0  ;;  %v3039_v11 = vmul.f32 0.6931472, %v4135_v16 }
 0x8c2   :  { %3152 = vst [vmem:[#allocation11 + $0x60] sm:$0xff] %v3120_v62  ;;  %v2983_v6 = vpop.xlane.xlu1 %2982 }
 0x8c3   :  { %v3089_v51 = vsub.f32 %v6208_v56, %v3039_v11  ;;  %4142 = vlog2.f32 %v2983_v6 }
 0x8c4   :  { %v4137_v7 = vpop.eup %4136 }
 0x8c5   :  { %v3121_v49 = vsel %vm2755_vm0, %v3089_v51, 0.0  ;;  %v3041_v50 = vmul.f32 0.6931472, %v4137_v7 }
 0x8c6   :  { %3153 = vst [vmem:[#allocation11 + $0x68] sm:$0xff] %v3121_v49  ;;  %v2985_v2 = vpop.xlane.xlu0 %2984 }
 0x8c7   :  { %v3090_v27 = vsub.f32 %v6212_v24, %v3041_v50  ;;  %4144 = vlog2.f32 %v2985_v2 }
 0x8c8   :  { %v4139_v36 = vpop.eup %4138 }
 0x8c9   :  { %v3122_v59 = vsel %vm2755_vm0, %v3090_v27, 0.0  ;;  %v3043_v1 = vmul.f32 0.6931472, %v4139_v36 }
 0x8ca   :  { %3154 = vst [vmem:[#allocation11 + $0x70] sm:$0xff] %v3122_v59  ;;  %v2987_v37 = vpop.xlane.xlu1 %2986 }
 0x8cb   :  { %v3091_v56 = vsub.f32 %v6216_v57, %v3043_v1  ;;  %4146 = vlog2.f32 %v2987_v37 }
 0x8cc   :  { %v4141_v35 = vpop.eup %4140 }
 0x8cd   :  { %v3123_v61 = vsel %vm2755_vm0, %v3091_v56, 0.0  ;;  %v3045_v34 = vmul.f32 0.6931472, %v4141_v35 }
 0x8ce   :  { %3155 = vst [vmem:[#allocation11 + $0x78] sm:$0xff] %v3123_v61  ;;  %v2989_v22 = vpop.xlane.xlu0 %2988 }
 0x8cf   :  { %v3092_v24 = vsub.f32 %v6220_v32, %v3045_v34  ;;  %4148 = vlog2.f32 %v2989_v22 }
 0x8d0   :  { %v4143_v52 = vpop.eup %4142 }
 0x8d1   :  { %v3124_v30 = vsel %vm2755_vm0, %v3092_v24, 0.0  ;;  %v3047_v33 = vmul.f32 0.6931472, %v4143_v52 }
 0x8d2   :  { %3156 = vst [vmem:[#allocation11 + $0x80] sm:$0xff] %v3124_v30  ;;  %v2991_v21 = vpop.xlane.xlu1 %2990 }
 0x8d3   :  { %v3093_v57 = vsub.f32 %v6224_v17, %v3047_v33  ;;  %4150 = vlog2.f32 %v2991_v21 }
 0x8d4   :  { %v4145_v19 = vpop.eup %4144 }
 0x8d5   :  { %v3125_v29 = vsel %vm2755_vm0, %v3093_v57, 0.0  ;;  %v3049_v53 = vmul.f32 0.6931472, %v4145_v19 }
 0x8d6   :  { %3157 = vst [vmem:[#allocation11 + $0x88] sm:$0xff] %v3125_v29  ;;  %v2993_v45 = vpop.xlane.xlu0 %2992 }
 0x8d7   :  { %v3094_v32 = vsub.f32 %v6228_v26, %v3049_v53  ;;  %4152 = vlog2.f32 %v2993_v45 }
 0x8d8   :  { %v4147_v10 = vpop.eup %4146 }
 0x8d9   :  { %v3126_v58 = vsel %vm2755_vm0, %v3094_v32, 0.0  ;;  %v3051_v47 = vmul.f32 0.6931472, %v4147_v10 }
 0x8da   :  { %3158 = vst [vmem:[#allocation11 + $0x90] sm:$0xff] %v3126_v58  ;;  %v2995_v41 = vpop.xlane.xlu1 %2994 }
 0x8db   :  { %v3095_v17 = vsub.f32 %v6232_v3, %v3051_v47  ;;  %4154 = vlog2.f32 %v2995_v41 }
 0x8dc   :  { %v4149_v63 = vpop.eup %4148 }
 0x8dd   :  { %v3127_v9 = vsel %vm2755_vm0, %v3095_v17, 0.0  ;;  %v3053_v5 = vmul.f32 0.6931472, %v4149_v63 }
 0x8de   :  { %3159 = vst [vmem:[#allocation11 + $0x98] sm:$0xff] %v3127_v9  ;;  %v2997_v40 = vpop.xlane.xlu0 %2996 }
 0x8df   :  { %v3096_v26 = vsub.f32 %v6236_v14, %v3053_v5  ;;  %4156 = vlog2.f32 %v2997_v40 }
 0x8e0   :  { %v4151_v54 = vpop.eup %4150 }
 0x8e1   :  { %v3128_v31 = vsel %vm2755_vm0, %v3096_v26, 0.0  ;;  %v3055_v48 = vmul.f32 0.6931472, %v4151_v54 }
 0x8e2   :  { %3160 = vst [vmem:[#allocation11 + $0xa0] sm:$0xff] %v3128_v31  ;;  %v2999_v46 = vpop.xlane.xlu1 %2998 }
 0x8e3   :  { %v3097_v3 = vsub.f32 %v6240_v28, %v3055_v48  ;;  %4158 = vlog2.f32 %v2999_v46 }
 0x8e4   :  { %v4153_v25 = vpop.eup %4152 }
 0x8e5   :  { %v3129_v15 = vsel %vm2755_vm0, %v3097_v3, 0.0  ;;  %v3057_v42 = vmul.f32 0.6931472, %v4153_v25 }
 0x8e6   :  { %3161 = vst [vmem:[#allocation11 + $0xa8] sm:$0xff] %v3129_v15  ;;  %v3001_v20 = vpop.xlane.xlu0 %3000 }
 0x8e7   :  { %v3098_v14 = vsub.f32 %v6244_v39, %v3057_v42  ;;  %4160 = vlog2.f32 %v3001_v20 }
 0x8e8   :  { %v4155_v8 = vpop.eup %4154 }
 0x8e9   :  { %v3130_v38 = vsel %vm2755_vm0, %v3098_v14, 0.0  ;;  %v3059_v16 = vmul.f32 0.6931472, %v4155_v8 }
 0x8ea   :  { %3162 = vst [vmem:[#allocation11 + $0xb0] sm:$0xff] %v3130_v38  ;;  %v3003_v62 = vpop.xlane.xlu1 %3002 }
 0x8eb   :  { %v3099_v28 = vsub.f32 %v6248_v23, %v3059_v16  ;;  %4162 = vlog2.f32 %v3003_v62 }
 0x8ec   :  { %v4157_v11 = vpop.eup %4156 }
 0x8ed   :  { %v3131_v6 = vsel %vm2755_vm0, %v3099_v28, 0.0  ;;  %v3061_v51 = vmul.f32 0.6931472, %v4157_v11 }
 0x8ee   :  { %3163 = vst [vmem:[#allocation11 + $0xb8] sm:$0xff] %v3131_v6  ;;  %v3005_v7 = vpop.xlane.xlu0 %3004 }
 0x8ef   :  { %v3100_v39 = vsub.f32 %v6252_v18, %v3061_v51  ;;  %4164 = vlog2.f32 %v3005_v7 }
 0x8f0   :  { %v4159_v49 = vpop.eup %4158 }
 0x8f1   :  { %v3132_v50 = vsel %vm2755_vm0, %v3100_v39, 0.0  ;;  %v3063_v2 = vmul.f32 0.6931472, %v4159_v49 }
 0x8f2   :  { %3164 = vst [vmem:[#allocation11 + $0xc0] sm:$0xff] %v3132_v50  ;;  %v3007_v27 = vpop.xlane.xlu1 %3006 }
 0x8f3   :  { %v3101_v23 = vsub.f32 %v6256_v55, %v3063_v2  ;;  %4166 = vlog2.f32 %v3007_v27 }
 0x8f4   :  { %v4161_v36 = vpop.eup %4160 }
 0x8f5   :  { %v3133_v59 = vsel %vm2755_vm0, %v3101_v23, 0.0  ;;  %v3065_v1 = vmul.f32 0.6931472, %v4161_v36 }
 0x8f6   :  { %3165 = vst [vmem:[#allocation11 + $0xc8] sm:$0xff] %v3133_v59  ;;  %v3009_v37 = vpop.xlane.xlu0 %3008 }
 0x8f7   :  { %v3102_v18 = vsub.f32 %v6260_v4, %v3065_v1  ;;  %4168 = vlog2.f32 %v3009_v37 }
 0x8f8   :  { %v4163_v56 = vpop.eup %4162 }
 0x8f9   :  { %v3134_v35 = vsel %vm2755_vm0, %v3102_v18, 0.0  ;;  %v3067_v61 = vmul.f32 0.6931472, %v4163_v56 }
 0x8fa   :  { %3166 = vst [vmem:[#allocation11 + $0xd0] sm:$0xff] %v3134_v35  ;;  %v3011_v34 = vpop.xlane.xlu1 %3010 }
 0x8fb   :  { %v3103_v55 = vsub.f32 %v6264_v12, %v3067_v61  ;;  %4170 = vlog2.f32 %v3011_v34 }
 0x8fc   :  { %v4165_v22 = vpop.eup %4164 }
 0x8fd   :  { %v3135_v24 = vsel %vm2755_vm0, %v3103_v55, 0.0  ;;  %v3069_v52 = vmul.f32 0.6931472, %v4165_v22 }
 0x8fe   :  { %3167 = vst [vmem:[#allocation11 + $0xd8] sm:$0xff] %v3135_v24 }
 0x8ff   :  { %v3104_v30 = vsub.f32 %v6268_v13, %v3069_v52 }
 0x900   :  { %v4167_v4 = vpop.eup %4166 }
 0x901   :  { %v3136_v33 = vsel %vm2755_vm0, %v3104_v30, 0.0  ;;  %v3071_v21 = vmul.f32 0.6931472, %v4167_v4 }
 0x902   :  { %3168 = vst [vmem:[#allocation11 + $0xe0] sm:$0xff] %v3136_v33 }
 0x903   :  { %v3105_v57 = vsub.f32 %v6272_v0, %v3071_v21 }
 0x904   :  { %v4169_v19 = vpop.eup %4168 }
 0x905   :  { %v3137_v12 = vsel %vm2755_vm0, %v3105_v57, 0.0  ;;  %v3073_v29 = vmul.f32 0.6931472, %v4169_v19 }
 0x906   :  { %3169 = vst [vmem:[#allocation11 + $0xe8] sm:$0xff] %v3137_v12 }
 0x907   :  { %v3106_v53 = vsub.f32 %v6276_v60, %v3073_v29 }
 0x908   :  { %v4171_v45 = vpop.eup %4170 }
 0x909   :  { %v3138_v13 = vsel %vm2755_vm0, %v3106_v53, 0.0  ;;  %v3075_v32 = vmul.f32 0.6931472, %v4171_v45 }
 0x90a   :  { %3170 = vst [vmem:[#allocation11 + $0xf0] sm:$0xff] %v3138_v13 }
 0x90b   :  { %v3107_v10 = vsub.f32 %v6280_v44, %v3075_v32 }
 0x90d   :  { %v3139_v0 = vsel %vm2755_vm0, %v3107_v10, 0.0 }
 0x90e   :  { %3171 = vst [vmem:[#allocation11 + $0xf8] sm:$0xff] %v3139_v0 }
 0x90f   :  { %4283 = shalt.err (!%p4280_p1)
}
 0x910   :  { %3183 = dma.vmem_to_hbm [thread:$0]  %s3178_s20, 4096, %s6397_s12, [#allocation4], %s4301_s24, %s4301_s24, %s4302_s25  }
 0x911   :  { %4298 = dma.done.wait [#allocation4], 4096  }
 0x912   :  { %4299 = vsyncadd [#allocation4], 4294963200 }
 0x913   :  { %3187 = vsyncpa [#allocation3], 1 }
 0x914   :  { %3188 = vsyncpa [#allocation6], 1 }
 0x915   :  { %3189 = vsyncpa [#allocation9], 1 }
 0x916   :  { %3190 = vsyncpa [#allocation4], 1 }

</bundles_post_ra>
